<compile_context>
chip_gen: v6e
topology: v6e:2x2x1
jax: 0.10.0
libtpu: 0.0.40
codegen_flags: <defaults>
</compile_context>

<pallas_src>
import functools

import jax
import jax.numpy as jnp
from jax.experimental import pallas as pl
from jax.experimental.pallas import tpu as pltpu

IN_DIM = 8 * 8      # 64 logical input features
K_PAD = 128         # contraction dim padded to a full lane width (incl. bias col)
H1 = 1024
H2 = 512
OUT_DIM = 1


def _round_up(x, m):
    return (x + m - 1) // m * m


def _tensorcores_per_device():
    """How many TensorCores one Pallas device spans (v4 megacore / v7x -> 2)."""
    try:
        dev = jax.devices()[0]
    except Exception:
        return 1
    n = getattr(dev, "num_cores", None)
    if isinstance(n, int) and n > 0:
        return n
    kind = str(getattr(dev, "device_kind", "")).lower()
    return 2 if ("v4" in kind or "v7" in kind or "7x" in kind) else 1


_NUM_TC = _tensorcores_per_device()


def _plan_tiles(batch, tile_cap, num_tc):
    """Pick (eff_tile, b_pad). Multi-tile grids use 128-lane-aligned tiles so
    every blocked lane dim is either a multiple of 128 or the full array dim."""
    tile_cap = max(128, _round_up(tile_cap, 128))
    if num_tc >= 2 and batch > 128:
        # Keep >= 2 balanced tiles so the "parallel" axis shards across both TCs.
        per_core = _round_up(-(-batch // num_tc), 128)
        eff_tile = min(tile_cap, per_core)
    else:
        # Single tile (bf16 packs 16 rows per sublane group -> multiple of 16).
        eff_tile = min(tile_cap, max(16, _round_up(batch, 16)))
    b_pad = _round_up(batch, eff_tile)
    if b_pad // eff_tile > 1 and eff_tile % 128 != 0:   # safety net
        eff_tile = _round_up(eff_tile, 128)
        b_pad = _round_up(batch, eff_tile)
    return eff_tile, b_pad


def prepare_params(w1, b1, w2, b2, w3, b3):
    """One-time weight prep (call once, reuse across forward calls).

    Weights are given in (in_features, out_features) layout:
      w1 (64,1024), b1 (1024,), w2 (1024,512), b2 (512,), w3 (512,1), b3 (1,).
    """
    w1 = jnp.asarray(w1, jnp.float32)
    b1 = jnp.asarray(b1, jnp.float32)
    # W1^T padded 64 -> 128 on the contraction dim, with b1 folded into column
    # IN_DIM (the input carries a matching constant-1 feature there).
    w1t = jnp.zeros((H1, K_PAD), jnp.float32)
    w1t = w1t.at[:, :IN_DIM].set(w1.T)
    w1t = w1t.at[:, IN_DIM].set(b1)
    w1t_bf = w1t.astype(jnp.bfloat16)                                  # (1024, 128)
    w2t_bf = jnp.asarray(w2, jnp.float32).T.astype(jnp.bfloat16)       # (512, 1024)
    b2_c = jnp.asarray(b2, jnp.float32).reshape(H2, 1)                 # (512, 1)
    w3_c = jnp.asarray(w3, jnp.float32).reshape(H2, 1)                 # (512, 1)
    b3_r = jnp.asarray(b3, jnp.float32).reshape(1, OUT_DIM)            # (1, 1)
    return (w1t_bf, w2t_bf, b2_c, w3_c, b3_r)


def _mlp_kernel(xt_ref, w1t_ref, w2t_ref, b2_ref, w3_ref, b3_ref, o_ref):
    # Feature-major: xt is (128, TB) bf16 with a constant-1 bias row at index 64.
    xt = xt_ref[...]
    h1 = jnp.dot(w1t_ref[...], xt, preferred_element_type=jnp.float32)   # (1024, TB) f32
    h1 = jnp.maximum(h1, 0.0).astype(jnp.bfloat16)                       # fused ReLU + cast
    h2 = jnp.dot(w2t_ref[...], h1, preferred_element_type=jnp.float32)   # (512, TB) f32
    h2 = jnp.maximum(h2 + b2_ref[...], 0.0)                              # ReLU (b2 lane-bcast)
    # 512 -> 1 projection as VPU multiply + sublane reduce: result is already a
    # lane-dense (1, TB) row (no 1-column MXU drain, no relayout, unmasked store).
    y = jnp.sum(h2 * w3_ref[...], axis=0, keepdims=True)                 # (1, TB) f32
    o_ref[...] = jnp.tanh(y + b3_ref[...]).astype(o_ref.dtype)


@functools.partial(jax.jit, static_argnames=("eff_tile", "b_pad"))
def _forward_padded(x, w1t_bf, w2t_bf, b2_c, w3_c, b3_r, *, eff_tile, b_pad):
    batch = x.shape[0]
    num_tiles = b_pad // eff_tile

    # Feature-major input, zero-padded to (128, b_pad); bias row = 1.0.
    xt = jnp.zeros((K_PAD, b_pad), jnp.bfloat16)
    xt = xt.at[:IN_DIM, :batch].set(x.astype(jnp.bfloat16).T)
    xt = xt.at[IN_DIM, :].set(1.0)

    flops = 2 * b_pad * (K_PAD * H1 + H1 * H2 + H2 * OUT_DIM)
    bytes_accessed = (
        xt.size * 2 + w1t_bf.size * 2 + w2t_bf.size * 2
        + (b2_c.size + w3_c.size + b3_r.size) * 4
        + b_pad * 4
    )

    out = pl.pallas_call(
        _mlp_kernel,
        out_shape=jax.ShapeDtypeStruct((1, b_pad), jnp.float32),
        grid_spec=pltpu.PrefetchScalarGridSpec(
            num_scalar_prefetch=0,
            grid=(num_tiles,),
            in_specs=[
                pl.BlockSpec((K_PAD, eff_tile), lambda i: (0, i)),  # x^T batch tile
                pl.BlockSpec((H1, K_PAD), lambda i: (0, 0)),        # W1^T (+b1), resident
                pl.BlockSpec((H2, H1), lambda i: (0, 0)),           # W2^T, resident
                pl.BlockSpec((H2, 1), lambda i: (0, 0)),            # b2 column
                pl.BlockSpec((H2, 1), lambda i: (0, 0)),            # w3 column
                pl.BlockSpec((1, OUT_DIM), lambda i: (0, 0)),       # b3
            ],
            out_specs=pl.BlockSpec((1, eff_tile), lambda i: (0, i)),  # lane-dense row
        ),
        compiler_params=pltpu.CompilerParams(
            dimension_semantics=("parallel",),   # batch tiles shard across TCs
        ),
        cost_estimate=pl.CostEstimate(
            flops=flops,
            transcendentals=b_pad,
            bytes_accessed=bytes_accessed,
        ),
    )(xt, w1t_bf, w2t_bf, b2_c, w3_c, b3_r)

    return out[0, :batch].reshape(batch, OUT_DIM)


def ex_value_forward(x, params, *, tile_cap=1024):
    """ExValue forward. x: (B, 64) f32; params from prepare_params. Returns (B, 1) f32."""
    batch, feat = x.shape
    assert feat == IN_DIM
    eff_tile, b_pad = _plan_tiles(batch, tile_cap, _NUM_TC)
    return _forward_padded(x, *params, eff_tile=eff_tile, b_pad=b_pad)


def _ref_forward(x, w1, b1, w2, b2, w3, b3):
    h = jnp.maximum(x @ w1 + b1.reshape(1, -1), 0.0)
    h = jnp.maximum(h @ w2 + b2.reshape(1, -1), 0.0)
    return jnp.tanh(h @ w3 + b3.reshape(1, -1))


def _init_linear(key, fan_in, fan_out):
    """Mimics nn.Linear default init; W returned pre-transposed (in, out)."""
    kw, kb = jax.random.split(key)
    bound = 1.0 / jnp.sqrt(float(fan_in))
    w = jax.random.uniform(kw, (fan_in, fan_out), jnp.float32, -bound, bound)
    b = jax.random.uniform(kb, (fan_out,), jnp.float32, -bound, bound)
    return w, b


if __name__ == "__main__":
    key = jax.random.PRNGKey(0)
    kx1, kx2, k1, k2, k3 = jax.random.split(key, 5)

    w1, b1 = _init_linear(k1, IN_DIM, H1)
    w2, b2 = _init_linear(k2, H1, H2)
    w3, b3 = _init_linear(k3, H2, OUT_DIM)

    # One-time weight prep (padding / transposes / bf16 casts hoisted here).
    params = prepare_params(w1, b1, w2, b2, w3, b3)

    # Small ragged batch (exercises batch + feature padding, single grid step).
    x_small = jax.random.normal(kx1, (37, IN_DIM), jnp.float32)
    out_small = jax.block_until_ready(ex_value_forward(x_small, params))
    ref_small = _ref_forward(x_small, w1, b1, w2, b2, w3, b3)
    assert out_small.shape == (37, OUT_DIM)
    assert jnp.allclose(out_small, ref_small, atol=3e-2), \
        float(jnp.max(jnp.abs(out_small - ref_small)))

    # Larger batch (multi-tile grid on 2-TC devices, single big tile on 1-TC).
    x_big = jax.random.normal(kx2, (512, IN_DIM), jnp.float32)
    out_big = jax.block_until_ready(ex_value_forward(x_big, params))
    ref_big = _ref_forward(x_big, w1, b1, w2, b2, w3, b3)
    assert out_big.shape == (512, OUT_DIM)
    assert jnp.allclose(out_big, ref_big, atol=3e-2), \
        float(jnp.max(jnp.abs(out_big - ref_big)))

    print("KERNEL_OK")
</pallas_src>

<mosaic_0001>
module attributes {stable_mosaic.version = 11 : i64} {
  func.func @_mlp_kernel(%arg0: i32, %arg1: memref<128x48xbf16, #tpu.memory_space<vmem>>, %arg2: memref<1024x128xbf16, #tpu.memory_space<vmem>>, %arg3: memref<512x1024xbf16, #tpu.memory_space<vmem>>, %arg4: memref<512x1xf32, #tpu.memory_space<vmem>>, %arg5: memref<512x1xf32, #tpu.memory_space<vmem>>, %arg6: memref<1x1xf32, #tpu.memory_space<vmem>>, %arg7: memref<1x48xf32, #tpu.memory_space<vmem>>) attributes {dimension_semantics = [#tpu.dimension_semantics<parallel>], iteration_bounds = array<i64: 1>, scalar_prefetch = 0 : i64, scratch_operands = 0 : i64, tpu.core_type = #tpu.core_type<tc>, window_params = [{transform_indices = @transform_0, window_bounds = array<i64: 128, 48>}, {pipeline_mode = #tpu.pipeline_mode<synchronous>, transform_indices = @transform_1, window_bounds = array<i64: 1024, 128>}, {pipeline_mode = #tpu.pipeline_mode<synchronous>, transform_indices = @transform_2, window_bounds = array<i64: 512, 1024>}, {pipeline_mode = #tpu.pipeline_mode<synchronous>, transform_indices = @transform_3, window_bounds = array<i64: 512, 1>}, {pipeline_mode = #tpu.pipeline_mode<synchronous>, transform_indices = @transform_4, window_bounds = array<i64: 512, 1>}, {pipeline_mode = #tpu.pipeline_mode<synchronous>, transform_indices = @transform_5, window_bounds = array<i64: 1, 1>}, {transform_indices = @transform_6, window_bounds = array<i64: 1, 48>}]} {
    %c0 = arith.constant 0 : index
    %c0_0 = arith.constant 0 : index
    %0 = vector.load %arg1[%c0, %c0_0] : memref<128x48xbf16, #tpu.memory_space<vmem>>, vector<128x48xbf16>
    %c0_1 = arith.constant 0 : index
    %c0_2 = arith.constant 0 : index
    %1 = vector.load %arg2[%c0_1, %c0_2] : memref<1024x128xbf16, #tpu.memory_space<vmem>>, vector<1024x128xbf16>
    %cst = arith.constant dense<0.000000e+00> : vector<1024x48xf32>
    %2 = tpu.matmul %1, %0, %cst {dimension_numbers = #tpu.dot_dimension_numbers<[1], [0], [0], [1], [0, 0, 1, 1], [], []>} : vector<1024x128xbf16>, vector<128x48xbf16>, vector<1024x48xf32> -> vector<1024x48xf32>
    %cst_3 = arith.constant 0.000000e+00 : f32
    %3 = vector.broadcast %cst_3 : f32 to vector<1024x48xf32>
    %4 = arith.maximumf %2, %3 : vector<1024x48xf32>
    %5 = arith.truncf %4 : vector<1024x48xf32> to vector<1024x48xbf16>
    %c0_4 = arith.constant 0 : index
    %c0_5 = arith.constant 0 : index
    %6 = vector.load %arg3[%c0_4, %c0_5] : memref<512x1024xbf16, #tpu.memory_space<vmem>>, vector<512x1024xbf16>
    %cst_6 = arith.constant dense<0.000000e+00> : vector<512x48xf32>
    %7 = tpu.matmul %6, %5, %cst_6 {dimension_numbers = #tpu.dot_dimension_numbers<[1], [0], [0], [1], [0, 0, 1, 1], [], []>} : vector<512x1024xbf16>, vector<1024x48xbf16>, vector<512x48xf32> -> vector<512x48xf32>
    %c0_7 = arith.constant 0 : index
    %c0_8 = arith.constant 0 : index
    %8 = vector.load %arg4[%c0_7, %c0_8] : memref<512x1xf32, #tpu.memory_space<vmem>>, vector<512x1xf32>
    %9 = vector.broadcast %8 : vector<512x1xf32> to vector<512x48xf32>
    %10 = arith.addf %7, %9 : vector<512x48xf32>
    %cst_9 = arith.constant 0.000000e+00 : f32
    %11 = vector.broadcast %cst_9 : f32 to vector<512x48xf32>
    %12 = arith.maximumf %10, %11 : vector<512x48xf32>
    %c0_10 = arith.constant 0 : index
    %c0_11 = arith.constant 0 : index
    %13 = vector.load %arg5[%c0_10, %c0_11] : memref<512x1xf32, #tpu.memory_space<vmem>>, vector<512x1xf32>
    %14 = vector.broadcast %13 : vector<512x1xf32> to vector<512x48xf32>
    %15 = arith.mulf %12, %14 : vector<512x48xf32>
    %cst_12 = arith.constant dense<0.000000e+00> : vector<48xf32>
    %16 = vector.multi_reduction <add>, %15, %cst_12 [0] : vector<512x48xf32> to vector<48xf32>
    %17 = vector.shape_cast %16 : vector<48xf32> to vector<1x48xf32>
    %c0_13 = arith.constant 0 : index
    %c0_14 = arith.constant 0 : index
    %18 = vector.load %arg6[%c0_13, %c0_14] : memref<1x1xf32, #tpu.memory_space<vmem>>, vector<1x1xf32>
    %19 = vector.broadcast %18 : vector<1x1xf32> to vector<1x48xf32>
    %20 = arith.addf %17, %19 : vector<1x48xf32>
    %21 = math.tanh %20 : vector<1x48xf32>
    %c0_15 = arith.constant 0 : index
    %c0_16 = arith.constant 0 : index
    %22 = vector.load %arg7[%c0_15, %c0_16] : memref<1x48xf32, #tpu.memory_space<vmem>>, vector<1x48xf32>
    tpu.vector_store %arg7[%c0_15, %c0_16], %21 {strides = array<i32>} : memref<1x48xf32, #tpu.memory_space<vmem>>, vector<1x48xf32>,
    return
  }
  func.func @transform_0(%arg0: i32) -> (i32, i32) {
    %c0_i32 = arith.constant 0 : i32
    %c0_i32_0 = arith.constant 0 : i32
    return %c0_i32, %arg0 : i32, i32
  }
  func.func @transform_1(%arg0: i32) -> (i32, i32) {
    %c0_i32 = arith.constant 0 : i32
    %c0_i32_0 = arith.constant 0 : i32
    %c0_i32_1 = arith.constant 0 : i32
    return %c0_i32, %c0_i32_0 : i32, i32
  }
  func.func @transform_2(%arg0: i32) -> (i32, i32) {
    %c0_i32 = arith.constant 0 : i32
    %c0_i32_0 = arith.constant 0 : i32
    %c0_i32_1 = arith.constant 0 : i32
    return %c0_i32, %c0_i32_0 : i32, i32
  }
  func.func @transform_3(%arg0: i32) -> (i32, i32) {
    %c0_i32 = arith.constant 0 : i32
    %c0_i32_0 = arith.constant 0 : i32
    %c0_i32_1 = arith.constant 0 : i32
    return %c0_i32, %c0_i32_0 : i32, i32
  }
  func.func @transform_4(%arg0: i32) -> (i32, i32) {
    %c0_i32 = arith.constant 0 : i32
    %c0_i32_0 = arith.constant 0 : i32
    %c0_i32_1 = arith.constant 0 : i32
    return %c0_i32, %c0_i32_0 : i32, i32
  }
  func.func @transform_5(%arg0: i32) -> (i32, i32) {
    %c0_i32 = arith.constant 0 : i32
    %c0_i32_0 = arith.constant 0 : i32
    %c0_i32_1 = arith.constant 0 : i32
    return %c0_i32, %c0_i32_0 : i32, i32
  }
  func.func @transform_6(%arg0: i32) -> (i32, i32) {
    %c0_i32 = arith.constant 0 : i32
    %c0_i32_0 = arith.constant 0 : i32
    return %c0_i32, %arg0 : i32, i32
  }
}

</mosaic_0001>

<bundles_post_ra>
// kernel: _forward_padded.1
= control target key start
LH: loop header
LB: loop body
LE: loop exit
PB: predicated region body
PF: predicated region fallthrough
CT: control target
= control target key end

     0   :  { %s7533_s0 = inlined_call_operand.vmem [shape: bf16[128,48], index: 0, kind: input, shape index: {}]   ;;  %s7534_s1 = inlined_call_operand.vmem [shape: bf16[1024,128], index: 1, kind: input, shape index: {}]   ;;  %s7535_s2 = inlined_call_operand.hbm [shape: bf16[512,1024], index: 2, kind: input, shape index: {}]   ;;  %s7536_s3 = inlined_call_operand.vmem [shape: f32[512,1], index: 3, kind: input, shape index: {}]   ;;  %s7537_s4 = inlined_call_operand.vmem [shape: f32[512,1], index: 4, kind: input, shape index: {}]   ;;  %s7538_s5 = inlined_call_operand.<no memory space> [shape: f32[1,1], index: 5, kind: input, shape index: {}]   ;;  %s7539_s6 = inlined_call_operand.vmem [shape: f32[1,48], index: 6, kind: output, shape index: {}]  }
   0x1   :  { %v11_v0 = vstv %s7538_s5 }
   0x2   :  { %12 = vst [vmem:[#allocation2] sm:$0x1] %v11_v0 }
   0x3   :  { %13 = vsyncpa [#allocation4], 0  ;;  %s5756_s23 = smov [#allocation3]  }
   0x4   :  { %s23_s24 = sshll.u32 %s5756_s23, 4  ;;  %s24_s24 = int_to_ptr.vmem [resolvable:$true] %s23_s24 }
   0x5   :  { %s5742_s25 = scalar_lea.vmem %s24_s24, 32768  ;;  %p5747_p1 = scmp.lt.s32.totalorder %s24_s24, %s24_s24 }
   0x6   :  { %p5743_p0 = scmp.ne.s32.totalorder %s24_s24, %s5742_s25  ;;  %p5748_p2 = scmp.lt.s32.totalorder %s5742_s25, %s5742_s25 }
   0x8   :  { %p5749_p3 = por %p5748_p2, %p5747_p1 }
   0xa   :  { %p5750_p4 = pnand %p5749_p3, %p5743_p0 }
   0xc   :  { %5753 = shalt.err (!%p5750_p4)
}
   0xd   :  { %s5757_s26 = smov 512   ;;  %s5758_s27 = smov 32  }
   0xe   :  { %29 = dma.hbm_to_vmem [thread:$0]  %s7535_s2, 32768, %s24_s24, [#allocation4], %s5757_s26, %s5757_s26, %s5758_s27  }
   0xf   :  { %5754 = dma.done.wait [#allocation4], 32768  }
  0x10   :  { %5755 = vsyncadd [#allocation4], 4294934528  ;;  %v5660_v1 = vld [vmem:[%s7533_s0 + $0x38] sm:$0xff]   ;;  %v5661_v2 = vld [vmem:[%s7533_s0 + $0x30] sm:$0xff]   ;;  %v7542_v60 = vmov 0   ;;  %vm4941_vm0 = vcmask 392192  }
  0x11   :  { %5494 = vmatprep.subr.bf16.mxu0 %v5660_v1  ;;  %5638 = vmatprep.subr.bf16.mxu1 %v5660_v1  ;;  %v5662_v3 = vld [vmem:[%s7533_s0 + $0x28] sm:$0xff]   ;;  %v5663_v4 = vld [vmem:[%s7533_s0 + $0x20] sm:$0xff]   ;;  %v5664_v6 = vld [vmem:[%s7533_s0 + $0x18] sm:$0xff]   ;;  %vm5087_vm1 = vcmask 385024  }
  0x12   :  { %5495 = vmatpush3.bf16.msra.mxu0 %v5660_v1  ;;  %5646 = vmatpush3.bf16.msra.mxu1 %v5660_v1  ;;  %v5668_v5 = vld [vmem:[%s7534_s1] sm:$0xff]   ;;  %v5665_v7 = vld [vmem:[%s7533_s0 + $0x10] sm:$0xff]   ;;  %v5666_v8 = vld [vmem:[%s7533_s0 + $0x8] sm:$0xff]  }
  0x13   :  { %5496 = vmatprep.subr.bf16.mxu0 %v5661_v2  ;;  %5639 = vmatprep.subr.bf16.mxu1 %v5661_v2  ;;  %v5667_v9 = vld [vmem:[%s7533_s0] sm:$0xff]   ;;  %v5669_v11 = vld [vmem:[%s7534_s1 + $0x8] sm:$0xff]   ;;  %v5670_v12 = vld [vmem:[%s7534_s1 + $0x10] sm:$0xff]  }
  0x14   :  { %5510 = vmatprep.mubr.bf16.mxu0 %v5668_v5  ;;  %v5687_v10 = vld [vmem:[%s7534_s1 + $0x100] sm:$0xff]   ;;  %v5689_v13 = vld [vmem:[%s7534_s1 + $0x108] sm:$0xff]   ;;  %v5691_v14 = vld [vmem:[%s7534_s1 + $0x110] sm:$0xff]   ;;  %5658 = vset.pattern.permute.xlu0 %v7542_v60 }
  0x15   :  { %5574 = vmatprep.mubr.bf16.mxu1 %v5687_v10  ;;  %v5671_v15 = vld [vmem:[%s7534_s1 + $0x18] sm:$0xff]   ;;  %v5672_v16 = vld [vmem:[%s7534_s1 + $0x20] sm:$0xff]   ;;  %v5673_v19 = vld [vmem:[%s7534_s1 + $0x28] sm:$0xff]   ;;  %5659 = vset.pattern.permute.xlu1 %v7542_v60 }
  0x16   :  { %5497 = vmatpush3.bf16.msra.mxu0 %v5661_v2  ;;  %5647 = vmatpush3.bf16.msra.mxu1 %v5661_v2  ;;  %v5693_v17 = vld [vmem:[%s7534_s1 + $0x118] sm:$0xff]   ;;  %v5695_v18 = vld [vmem:[%s7534_s1 + $0x120] sm:$0xff]   ;;  %v5674_v20 = vld [vmem:[%s7534_s1 + $0x30] sm:$0xff]  }
  0x17   :  { %5498 = vmatprep.subr.bf16.mxu0 %v5662_v3  ;;  %5640 = vmatprep.subr.bf16.mxu1 %v5662_v3  ;;  %v5697_v21 = vld [vmem:[%s7534_s1 + $0x128] sm:$0xff]   ;;  %v5699_v22 = vld [vmem:[%s7534_s1 + $0x130] sm:$0xff]   ;;  %v5675_v23 = vld [vmem:[%s7534_s1 + $0x38] sm:$0xff]  }
  0x18   :  { %v5676_v24 = vld [vmem:[%s7534_s1 + $0x40] sm:$0xff]   ;;  %v5701_v25 = vld [vmem:[%s7534_s1 + $0x138] sm:$0xff]   ;;  %v5677_v27 = vld [vmem:[%s7534_s1 + $0x48] sm:$0xff]  }
  0x19   :  { %v5703_v26 = vld [vmem:[%s7534_s1 + $0x140] sm:$0xff]   ;;  %v5678_v28 = vld [vmem:[%s7534_s1 + $0x50] sm:$0xff]   ;;  %v5705_v29 = vld [vmem:[%s7534_s1 + $0x148] sm:$0xff]  }
  0x1a   :  { %5499 = vmatpush3.bf16.msra.mxu0 %v5662_v3  ;;  %5648 = vmatpush3.bf16.msra.mxu1 %v5662_v3  ;;  %v5707_v30 = vld [vmem:[%s7534_s1 + $0x150] sm:$0xff]   ;;  %v5679_v31 = vld [vmem:[%s7534_s1 + $0x58] sm:$0xff]   ;;  %v5680_v33 = vld [vmem:[%s7534_s1 + $0x60] sm:$0xff]  }
  0x1b   :  { %5500 = vmatprep.subr.bf16.mxu0 %v5663_v4  ;;  %5641 = vmatprep.subr.bf16.mxu1 %v5663_v4  ;;  %v5709_v32 = vld [vmem:[%s7534_s1 + $0x158] sm:$0xff]   ;;  %v5711_v34 = vld [vmem:[%s7534_s1 + $0x160] sm:$0xff]   ;;  %v5681_v35 = vld [vmem:[%s7534_s1 + $0x68] sm:$0xff]  }
  0x1c   :  { %v5713_v36 = vld [vmem:[%s7534_s1 + $0x168] sm:$0xff]   ;;  %v5682_v37 = vld [vmem:[%s7534_s1 + $0x70] sm:$0xff]   ;;  %v5683_v39 = vld [vmem:[%s7534_s1 + $0x78] sm:$0xff]  }
  0x1d   :  { %v5714_v38 = vld [vmem:[%s7534_s1 + $0x170] sm:$0xff]   ;;  %v5715_v40 = vld [vmem:[%s7534_s1 + $0x178] sm:$0xff]   ;;  %v5684_v41 = vld [vmem:[%s7534_s1 + $0x80] sm:$0xff]  }
  0x1e   :  { %5501 = vmatpush3.bf16.msra.mxu0 %v5663_v4  ;;  %5649 = vmatpush3.bf16.msra.mxu1 %v5663_v4  ;;  %v5716_v42 = vld [vmem:[%s7534_s1 + $0x180] sm:$0xff]   ;;  %v5685_v43 = vld [vmem:[%s7534_s1 + $0x88] sm:$0xff]   ;;  %v5686_v45 = vld [vmem:[%s7534_s1 + $0x90] sm:$0xff]  }
  0x1f   :  { %5502 = vmatprep.subr.bf16.mxu0 %v5664_v6  ;;  %5642 = vmatprep.subr.bf16.mxu1 %v5664_v6  ;;  %v5717_v44 = vld [vmem:[%s7534_s1 + $0x188] sm:$0xff]   ;;  %v5718_v46 = vld [vmem:[%s7534_s1 + $0x190] sm:$0xff]   ;;  %v5688_v47 = vld [vmem:[%s7534_s1 + $0x98] sm:$0xff]  }
  0x20   :  { %v5719_v48 = vld [vmem:[%s7534_s1 + $0x198] sm:$0xff]   ;;  %v5690_v49 = vld [vmem:[%s7534_s1 + $0xa0] sm:$0xff]   ;;  %v5692_v51 = vld [vmem:[%s7534_s1 + $0xa8] sm:$0xff]  }
  0x21   :  { %v5720_v50 = vld [vmem:[%s7534_s1 + $0x1a0] sm:$0xff]   ;;  %v5721_v52 = vld [vmem:[%s7534_s1 + $0x1a8] sm:$0xff]   ;;  %v5694_v53 = vld [vmem:[%s7534_s1 + $0xb0] sm:$0xff]  }
  0x22   :  { %5503 = vmatpush3.bf16.msra.mxu0 %v5664_v6  ;;  %5650 = vmatpush3.bf16.msra.mxu1 %v5664_v6  ;;  %v5722_v54 = vld [vmem:[%s7534_s1 + $0x1b0] sm:$0xff]   ;;  %v5696_v55 = vld [vmem:[%s7534_s1 + $0xb8] sm:$0xff]   ;;  %v5698_v57 = vld [vmem:[%s7534_s1 + $0xc0] sm:$0xff]  }
  0x23   :  { %5504 = vmatprep.subr.bf16.mxu0 %v5665_v7  ;;  %5643 = vmatprep.subr.bf16.mxu1 %v5665_v7  ;;  %v5723_v56 = vld [vmem:[%s7534_s1 + $0x1b8] sm:$0xff]   ;;  %v5700_v58 = vld [vmem:[%s7534_s1 + $0xc8] sm:$0xff]   ;;  %v5702_v59 = vld [vmem:[%s7534_s1 + $0xd0] sm:$0xff]  }
  0x24   :  { %v5704_v61 = vld [vmem:[%s7534_s1 + $0xd8] sm:$0xff]   ;;  %v5706_v62 = vld [vmem:[%s7534_s1 + $0xe0] sm:$0xff]   ;;  %v5708_v63 = vld [vmem:[%s7534_s1 + $0xe8] sm:$0xff]  }
  0x25   :  { %v5710_v0 = vld [vmem:[%s7534_s1 + $0xf0] sm:$0xff]   ;;  %v5712_v1 = vld [vmem:[%s7534_s1 + $0xf8] sm:$0xff]   ;;  %v5724_v2 = vld [vmem:[%s7534_s1 + $0x1c0] sm:$0xff]  }
  0x26   :  { %5505 = vmatpush3.bf16.msra.mxu0 %v5665_v7  ;;  %5651 = vmatpush3.bf16.msra.mxu1 %v5665_v7  ;;  %v5725_v3 = vld [vmem:[%s7534_s1 + $0x1c8] sm:$0xff]   ;;  %v5726_v4 = vld [vmem:[%s7534_s1 + $0x1d0] sm:$0xff]   ;;  %v5727_v5 = vld [vmem:[%s7534_s1 + $0x1d8] sm:$0xff]  }
  0x27   :  { %5506 = vmatprep.subr.bf16.mxu0 %v5666_v8  ;;  %5644 = vmatprep.subr.bf16.mxu1 %v5666_v8  ;;  %v5728_v6 = vld [vmem:[%s7534_s1 + $0x1e0] sm:$0xff]   ;;  %v5729_v7 = vld [vmem:[%s7534_s1 + $0x1e8] sm:$0xff]  }
  0x28   :  { %v6021_v10 = vld [vmem:[#allocation3] sm:$0xff] }
  0x2a   :  { %5507 = vmatpush3.bf16.msra.mxu0 %v5666_v8  ;;  %5652 = vmatpush3.bf16.msra.mxu1 %v5666_v8  ;;  %v5730_v8 = vld [vmem:[%s7534_s1 + $0x1f0] sm:$0xff]  }
  0x2b   :  { %5508 = vmatprep.subr.bf16.mxu0 %v5667_v9  ;;  %5645 = vmatprep.subr.bf16.mxu1 %v5667_v9 }
  0x2e   :  { %5509 = vmatpush3.bf16.msra.mxu0 %v5667_v9  ;;  %5653 = vmatpush3.bf16.msra.mxu1 %v5667_v9  ;;  %v5731_v9 = vld [vmem:[%s7534_s1 + $0x1f8] sm:$0xff]  }
  0x2f   :  { %3273 = vmatprep.subr.bf16.mxu1 %v7542_v60  ;;  %3562 = vmatprep.subr.bf16.mxu0 %v7542_v60 }
  0x31   :  { %5511 = vmatmul.mubr.bf16.vlgmr.msra.gmra.mxu0 %v5669_v11  ;;  %5575 = vmatmul.mubr.bf16.vlgmr.msra.gmra.mxu1 %v5689_v13  ;;  %v6023_v11 = vld [vmem:[#allocation3 + $0x20] sm:$0xff] }
  0x32   :  { %5514 = vmatprep.mubr.bf16.mxu0 %v5670_v12  ;;  %5578 = vmatprep.mubr.bf16.mxu1 %v5691_v14  ;;  %v5167_v12 = vcombine.high %v6021_v10, %v6023_v11 }
  0x39   :  { %5515 = vmatmul.mubr.bf16.gmra.mxu0 %v5671_v15  ;;  %5579 = vmatmul.mubr.bf16.gmra.mxu1 %v5693_v17 }
  0x3a   :  { %5518 = vmatprep.mubr.bf16.mxu0 %v5672_v16  ;;  %5582 = vmatprep.mubr.bf16.mxu1 %v5695_v18 }
  0x41   :  { %5519 = vmatmul.mubr.bf16.gmra.mxu0 %v5673_v19  ;;  %5583 = vmatmul.mubr.bf16.gmra.mxu1 %v5697_v21 }
  0x42   :  { %5522 = vmatprep.mubr.bf16.mxu0 %v5674_v20  ;;  %5586 = vmatprep.mubr.bf16.mxu1 %v5699_v22 }
  0x49   :  { %5523 = vmatmul.mubr.bf16.gmra.mxu0 %v5675_v23  ;;  %5587 = vmatmul.mubr.bf16.gmra.mxu1 %v5701_v25 }
  0x4a   :  { %5526 = vmatprep.mubr.bf16.mxu0 %v5676_v24  ;;  %5590 = vmatprep.mubr.bf16.mxu1 %v5703_v26 }
  0x51   :  { %5527 = vmatmul.mubr.bf16.gmra.mxu0 %v5677_v27  ;;  %5591 = vmatmul.mubr.bf16.gmra.mxu1 %v5705_v29 }
  0x52   :  { %5530 = vmatprep.mubr.bf16.mxu0 %v5678_v28  ;;  %5594 = vmatprep.mubr.bf16.mxu1 %v5707_v30 }
  0x59   :  { %5531 = vmatmul.mubr.bf16.gmra.mxu0 %v5679_v31  ;;  %5595 = vmatmul.mubr.bf16.gmra.mxu1 %v5709_v32 }
  0x5a   :  { %5534 = vmatprep.mubr.bf16.mxu0 %v5680_v33  ;;  %5598 = vmatprep.mubr.bf16.mxu1 %v5711_v34 }
  0x61   :  { %5535 = vmatmul.mubr.bf16.gmra.mxu0 %v5681_v35  ;;  %5599 = vmatmul.mubr.bf16.gmra.mxu1 %v5713_v36 }
  0x62   :  { %5538 = vmatprep.mubr.bf16.mxu0 %v5682_v37  ;;  %5602 = vmatprep.mubr.bf16.mxu1 %v5714_v38 }
  0x69   :  { %5539 = vmatmul.mubr.bf16.gmra.mxu0 %v5683_v39  ;;  %5603 = vmatmul.mubr.bf16.gmra.mxu1 %v5715_v40 }
  0x6a   :  { %5542 = vmatprep.mubr.bf16.mxu0 %v5684_v41  ;;  %5606 = vmatprep.mubr.bf16.mxu1 %v5716_v42 }
  0x71   :  { %5543 = vmatmul.mubr.bf16.gmra.mxu0 %v5685_v43  ;;  %5607 = vmatmul.mubr.bf16.gmra.mxu1 %v5717_v44  ;;  %v6075_v44 = vld [vmem:[#allocation3 + $0x8] sm:$0xff] }
  0x72   :  { %5546 = vmatprep.mubr.bf16.mxu0 %v5686_v45  ;;  %5610 = vmatprep.mubr.bf16.mxu1 %v5718_v46  ;;  %7544 = vst [vmem:[#allocation6_spill] sm:$0xff] %v6075_v44 }
  0x79   :  { %5547 = vmatmul.mubr.bf16.gmra.mxu0 %v5688_v47  ;;  %5611 = vmatmul.mubr.bf16.gmra.mxu1 %v5719_v48  ;;  %v6077_v47 = vld [vmem:[#allocation3 + $0x28] sm:$0xff] }
  0x7a   :  { %5550 = vmatprep.mubr.bf16.mxu0 %v5690_v49  ;;  %5614 = vmatprep.mubr.bf16.mxu1 %v5720_v50  ;;  %7545 = vst [vmem:[#allocation7_spill] sm:$0xff] %v6077_v47 }
  0x81   :  { %5551 = vmatmul.mubr.bf16.gmra.mxu0 %v5692_v51  ;;  %5615 = vmatmul.mubr.bf16.gmra.mxu1 %v5721_v52  ;;  %v5169_v51 = vcombine.high %v6075_v44, %v6077_v47 }
  0x82   :  { %5554 = vmatprep.mubr.bf16.mxu0 %v5694_v53  ;;  %5618 = vmatprep.mubr.bf16.mxu1 %v5722_v54 }
  0x89   :  { %5555 = vmatmul.mubr.bf16.gmra.mxu0 %v5696_v55  ;;  %5619 = vmatmul.mubr.bf16.gmra.mxu1 %v5723_v56 }
  0x8a   :  { %5558 = vmatprep.mubr.bf16.mxu0 %v5698_v57  ;;  %5622 = vmatprep.mubr.bf16.mxu1 %v5724_v2 }
  0x91   :  { %5559 = vmatmul.mubr.bf16.gmra.mxu0 %v5700_v58  ;;  %5623 = vmatmul.mubr.bf16.gmra.mxu1 %v5725_v3 }
  0x92   :  { %5562 = vmatprep.mubr.bf16.mxu0 %v5702_v59  ;;  %5626 = vmatprep.mubr.bf16.mxu1 %v5726_v4 }
  0x99   :  { %5563 = vmatmul.mubr.bf16.gmra.mxu0 %v5704_v61  ;;  %5627 = vmatmul.mubr.bf16.gmra.mxu1 %v5727_v5 }
  0x9a   :  { %5566 = vmatprep.mubr.bf16.mxu0 %v5706_v62  ;;  %5630 = vmatprep.mubr.bf16.mxu1 %v5728_v6 }
  0xa1   :  { %5567 = vmatmul.mubr.bf16.gmra.mxu0 %v5708_v63  ;;  %5631 = vmatmul.mubr.bf16.gmra.mxu1 %v5729_v7 }
  0xa2   :  { %5570 = vmatprep.mubr.bf16.mxu0 %v5710_v0  ;;  %5634 = vmatprep.mubr.bf16.mxu1 %v5730_v8 }
  0xa9   :  { %5571 = vmatmul.mubr.bf16.gmra.mxu0 %v5712_v1  ;;  %5635 = vmatmul.mubr.bf16.gmra.mxu1 %v5731_v9 }
  0xaa   :  { %3305 = vmatprep.mubr.bf16.mxu1 %v5167_v12  ;;  %3594 = vmatprep.mubr.bf16.mxu0 %v5169_v51 }
  0xf1   :  { %v6029_v14 = vpop.f32.mrf.mxu0  ;;  %v6031_v15 = vpop.f32.mrf.mxu1 }
  0xf3   :  { %v6033_v16 = vpop.f32.mrf.mxu0  ;;  %v6035_v17 = vpop.f32.mrf.mxu1 }
  0xf5   :  { %v6037_v18 = vpop.f32.mrf.mxu0  ;;  %v6039_v19 = vpop.f32.mrf.mxu1 }
  0xf7   :  { %v6041_v20 = vpop.f32.mrf.mxu0  ;;  %v6043_v21 = vpop.f32.mrf.mxu1 }
  0xf9   :  { %v6045_v22 = vpop.f32.mrf.mxu0  ;;  %v6047_v23 = vpop.f32.mrf.mxu1 }
  0xfb   :  { %v6049_v24 = vpop.f32.mrf.mxu0  ;;  %v6051_v25 = vpop.f32.mrf.mxu1 }
  0xfd   :  { %v6053_v26 = vpop.f32.mrf.mxu0  ;;  %v6055_v27 = vpop.f32.mrf.mxu1 }
  0xfe   :  { %v1168_v12 = vmax.f32 %v6053_v26, 0.0  ;;  %v1165_v26 = vmax.f32 %v6049_v24, 0.0 }
  0xff   :  { %v6057_v28 = vpop.f32.mrf.mxu0  ;;  %v6059_v29 = vpop.f32.mrf.mxu1 }
 0x101   :  { %v5520_v30 = vpop.f32.mrf.mxu0  ;;  %v6061_v31 = vpop.f32.mrf.mxu1 }
 0x102   :  { %v1171_v0 = vmax.f32 %v5520_v30, 0.0 }
 0x103   :  { %v682_v32 = vpop.f32.mrf.mxu0  ;;  %v6063_v33 = vpop.f32.mrf.mxu1 }
 0x104   :  { %v1169_v7 = vmax.f32 %v682_v32, 0.0 }
 0x105   :  { %v5521_v34 = vpop.f32.mrf.mxu0  ;;  %v6065_v35 = vpop.f32.mrf.mxu1 }
 0x106   :  { %v1172_v59 = vmax.f32 %v5521_v34, 0.0 }
 0x107   :  { %v685_v36 = vpop.f32.mrf.mxu0  ;;  %v6067_v37 = vpop.f32.mrf.mxu1 }
 0x108   :  { %v1294_v3 = vpack.c.bf16 %v1172_v59, %v1171_v0  ;;  %v1170_v4 = vmax.f32 %v685_v36, 0.0  ;;  %v1167_v36 = vmax.f32 %v6045_v22, 0.0 }
 0x109   :  { %v5524_v38 = vpop.f32.mrf.mxu0  ;;  %v6069_v39 = vpop.f32.mrf.mxu1 }
 0x10a   :  { %v1175_v45 = vmax.f32 %v5524_v38, 0.0  ;;  %v1293_v30 = vpack.c.bf16 %v1170_v4, %v1169_v7 }
 0x10b   :  { %v698_v40 = vpop.f32.mrf.mxu0  ;;  %v6071_v41 = vpop.f32.mrf.mxu1 }
 0x10c   :  { %v1173_v56 = vmax.f32 %v698_v40, 0.0 }
 0x10d   :  { %v5525_v42 = vpop.f32.mrf.mxu0  ;;  %v6073_v43 = vpop.f32.mrf.mxu1 }
 0x10e   :  { %v1176_v46 = vmax.f32 %v5525_v42, 0.0  ;;  %v1292_v42 = vpack.c.bf16 %v1168_v12, %v1167_v36 }
 0x10f   :  { %v701_v48 = vpop.f32.mrf.mxu0  ;;  %v6079_v49 = vpop.f32.mrf.mxu1 }
 0x110   :  { %v1296_v52 = vpack.c.bf16 %v1176_v46, %v1175_v45  ;;  %v1174_v53 = vmax.f32 %v701_v48, 0.0  ;;  %v1166_v45 = vmax.f32 %v6057_v28, 0.0 }
 0x111   :  { %v6085_v54 = vpop.f32.mrf.mxu0  ;;  %v6087_v55 = vpop.f32.mrf.mxu1 }
 0x112   :  { %3274 = vmatpush1.bf16.msra.mxu1 %v1296_v52  ;;  %v1295_v61 = vpack.c.bf16 %v1174_v53, %v1173_v56  ;;  %v1164_v52 = vmax.f32 %v6037_v18, 0.0  ;;  %v1291_v53 = vpack.c.bf16 %v1166_v45, %v1165_v26  ;;  %v1161_v18 = vmax.f32 %v6033_v16, 0.0 }
 0x113   :  { %v6089_v57 = vpop.f32.mrf.mxu0  ;;  %3275 = vmatprep.subr.bf16.mxu1 %v7542_v60  ;;  %v6092_v58 = vpop.f32.mrf.mxu1 }
 0x115   :  { %v6094_v62 = vpop.f32.mrf.mxu0  ;;  %v6096_v63 = vpop.f32.mrf.mxu1 }
 0x116   :  { %3276 = vmatpush1.bf16.msra.mxu1 %v1295_v61  ;;  %v1163_v61 = vmax.f32 %v6029_v14, 0.0 }
 0x117   :  { %v6098_v1 = vpop.f32.mrf.mxu0  ;;  %3277 = vmatprep.subr.bf16.mxu1 %v7542_v60  ;;  %v6101_v2 = vpop.f32.mrf.mxu1 }
 0x118   :  { %7546 = vst [vmem:[#allocation8_spill] sm:$0xff] %v6101_v2  ;;  %v1290_v24 = vpack.c.bf16 %v1164_v52, %v1163_v61  ;;  %v7554_v2 = vmov 0  }
 0x119   :  { %v6103_v5 = vpop.f32.mrf.mxu0  ;;  %v6105_v6 = vpop.f32.mrf.mxu1 }
 0x11a   :  { %3278 = vmatpush1.bf16.msra.mxu1 %v1294_v3  ;;  %v1162_v3 = vmax.f32 %v6041_v20, 0.0 }
 0x11b   :  { %v6107_v8 = vpop.f32.mrf.mxu0  ;;  %3279 = vmatprep.subr.bf16.mxu1 %v7542_v60  ;;  %v6110_v9 = vpop.f32.mrf.mxu1 }
 0x11c   :  { %v1289_v14 = vpack.c.bf16 %v1162_v3, %v1161_v18 }
 0x11d   :  { %v6113_v34 = vpop.f32.mrf.mxu0  ;;  %v6115_v38 = vpop.f32.mrf.mxu1 }
 0x11e   :  { %3280 = vmatpush1.bf16.msra.mxu1 %v1293_v30 }
 0x11f   :  { %v6118_v40 = vpop.f32.mrf.mxu0  ;;  %3281 = vmatprep.subr.bf16.mxu1 %v7542_v60  ;;  %v6121_v32 = vpop.f32.mrf.mxu1 }
 0x121   :  { %v5536_v46 = vpop.f32.mrf.mxu0  ;;  %v6124_v48 = vpop.f32.mrf.mxu1 }
 0x122   :  { %3282 = vmatpush1.bf16.msra.mxu1 %v1292_v42 }
 0x123   :  { %v746_v51 = vpop.f32.mrf.mxu0  ;;  %3283 = vmatprep.subr.bf16.mxu1 %v7542_v60  ;;  %v6128_v22 = vpop.f32.mrf.mxu1 }
 0x125   :  { %v5537_v56 = vpop.f32.mrf.mxu0  ;;  %v6131_v59 = vpop.f32.mrf.mxu1 }
 0x126   :  { %3284 = vmatpush1.bf16.msra.mxu1 %v1291_v53 }
 0x127   :  { %v749_v28 = vpop.f32.mrf.mxu0  ;;  %3285 = vmatprep.subr.bf16.mxu1 %v7542_v60  ;;  %v6135_v0 = vpop.f32.mrf.mxu1 }
 0x129   :  { %v5540_v4 = vpop.f32.mrf.mxu0  ;;  %v6138_v7 = vpop.f32.mrf.mxu1 }
 0x12a   :  { %3286 = vmatpush1.bf16.msra.mxu1 %v1290_v24  ;;  %v1191_v45 = vmax.f32 %v5540_v4, 0.0  ;;  %v1188_v4 = vmax.f32 %v5537_v56, 0.0 }
 0x12b   :  { %v762_v12 = vpop.f32.mrf.mxu0  ;;  %3287 = vmatprep.subr.bf16.mxu1 %v7542_v60  ;;  %v6142_v30 = vpop.f32.mrf.mxu1 }
 0x12c   :  { %v1189_v24 = vmax.f32 %v762_v12, 0.0 }
 0x12d   :  { %v5541_v36 = vpop.f32.mrf.mxu0  ;;  %v6144_v42 = vpop.f32.mrf.mxu1 }
 0x12e   :  { %v1192_v26 = vmax.f32 %v5541_v36, 0.0  ;;  %3288 = vmatpush1.bf16.msra.mxu1 %v1289_v14  ;;  %v1187_v36 = vmax.f32 %v5536_v46, 0.0  ;;  %v1184_v46 = vmax.f32 %v6113_v34, 0.0 }
 0x12f   :  { %v765_v52 = vpop.f32.mrf.mxu0  ;;  %3289 = vmatprep.subr.bf16.mxu1 %v7542_v60  ;;  %v6147_v20 = vpop.f32.mrf.mxu1 }
 0x130   :  { %v1304_v53 = vpack.c.bf16 %v1192_v26, %v1191_v45  ;;  %v1190_v16 = vmax.f32 %v765_v52, 0.0  ;;  %v1302_v12 = vpack.c.bf16 %v1188_v4, %v1187_v36  ;;  %v1186_v26 = vmax.f32 %v749_v28, 0.0 }
 0x131   :  { %v6149_v61 = vpop.f32.mrf.mxu0  ;;  %v6151_v50 = vpop.f32.mrf.mxu1  ;;  %v1182_v36 = vmax.f32 %v6118_v40, 0.0 }
 0x132   :  { %3290 = vmatpush2.bf16.msra.mxu1 %v1304_v53  ;;  %7547 = vst [vmem:[#allocation9_spill] sm:$0xff] %v6151_v50  ;;  %v1303_v18 = vpack.c.bf16 %v1190_v16, %v1189_v24  ;;  %v1185_v53 = vmax.f32 %v746_v51, 0.0 }
 0x133   :  { %v6153_v3 = vpop.f32.mrf.mxu0  ;;  %3291 = vmatprep.subr.bf16.mxu1 %v7542_v60  ;;  %v6158_v13 = vpop.f32.mrf.mxu1 }
 0x134   :  { %7548 = vst [vmem:[#allocation10_spill] sm:$0xff] %v6158_v13  ;;  %v1301_v16 = vpack.c.bf16 %v1186_v26, %v1185_v53  ;;  %v1181_v13 = vmax.f32 %v6107_v8, 0.0 }
 0x135   :  { %v6156_v14 = vpop.f32.mrf.mxu0  ;;  %v6165_v50 = vpop.f32.mrf.mxu1 }
 0x136   :  { %3292 = vmatpush2.bf16.msra.mxu1 %v1303_v18  ;;  %7549 = vst [vmem:[#allocation11_spill] sm:$0xff] %v6165_v50  ;;  %v1183_v18 = vmax.f32 %v6103_v5, 0.0  ;;  %v1180_v5 = vmax.f32 %v6094_v62, 0.0  ;;  %v1299_v53 = vpack.c.bf16 %v1182_v36, %v1181_v13  ;;  %v1177_v50 = vmax.f32 %v6089_v57, 0.0 }
 0x137   :  { %v6160_v45 = vpop.f32.mrf.mxu0  ;;  %3293 = vmatprep.subr.bf16.mxu1 %v7542_v60  ;;  %v6174_v4 = vpop.f32.mrf.mxu1  ;;  %v1240_v36 = vmax.f32 %v6073_v43, 0.0 }
 0x138   :  { %7550 = vst [vmem:[#allocation12_spill] sm:$0xff] %v6174_v4  ;;  %v1300_v51 = vpack.c.bf16 %v1184_v46, %v1183_v18  ;;  %v1179_v46 = vmax.f32 %v6085_v54, 0.0  ;;  %v1239_v54 = vmax.f32 %v6069_v39, 0.0  ;;  %v1609_v39 = vld [vmem:[%s7536_s3] sm:$0xff] }
 0x139   :  { %v6163_v52 = vpop.f32.mrf.mxu0  ;;  %v6183_v34 = vpop.f32.mrf.mxu1  ;;  %1675 = vperm.xlu0 %5658, %v1609_v39   ;;  %v1234_v39 = vmax.f32 %v6067_v37, 0.0 }
 0x13a   :  { %3294 = vmatpush2.bf16.msra.mxu1 %v1302_v12  ;;  %7551 = vst [vmem:[#allocation13_spill] sm:$0xff] %v6183_v34  ;;  %v1298_v8 = vpack.c.bf16 %v1180_v5, %v1179_v46 }
 0x13b   :  { %v6167_v56 = vpop.f32.mrf.mxu0  ;;  %3295 = vmatprep.subr.bf16.mxu1 %v7542_v60  ;;  %v6192_v40 = vpop.f32.mrf.mxu1 }
 0x13c   :  { %7552 = vst [vmem:[#allocation14_spill] sm:$0xff] %v6192_v40  ;;  %v1365_v40 = vld [vmem:[#allocation3 + $0x60] sm:$0xff] }
 0x13d   :  { %v6171_v24 = vpop.f32.mrf.mxu0  ;;  %v6199_v62 = vpop.f32.mrf.mxu1 }
 0x13e   :  { %3296 = vmatpush2.bf16.msra.mxu1 %v1301_v16  ;;  %7553 = vst [vmem:[#allocation15_spill] sm:$0xff] %v6199_v62  ;;  %v1328_v62 = vpack.c.bf16 %v1240_v36, %v1239_v54 }
 0x13f   :  { %v6176_v28 = vpop.f32.mrf.mxu0  ;;  %3297 = vmatprep.subr.bf16.mxu1 %v7542_v60  ;;  %v6204_v44 = vpop.f32.mrf.mxu1 }
 0x141   :  { %v6180_v12 = vpop.f32.mrf.mxu0 }
 0x142   :  { %3298 = vmatpush2.bf16.msra.mxu1 %v1300_v51  ;;  %v1178_v51 = vmax.f32 %v6098_v1, 0.0 }
 0x143   :  { %v6185_v26 = vpop.f32.mrf.mxu0  ;;  %3299 = vmatprep.subr.bf16.mxu1 %v7542_v60 }
 0x144   :  { %v1297_v34 = vpack.c.bf16 %v1178_v51, %v1177_v50  ;;  %v1236_v51 = vmax.f32 %v6065_v35, 0.0 }
 0x145   :  { %v6189_v16 = vpop.f32.mrf.mxu0 }
 0x146   :  { %3300 = vmatpush2.bf16.msra.mxu1 %v1299_v53  ;;  %v1361_v53 = vld [vmem:[#allocation3 + $0x40] sm:$0xff] }
 0x147   :  { %v6194_v18 = vpop.f32.mrf.mxu0  ;;  %3301 = vmatprep.subr.bf16.mxu1 %v7542_v60  ;;  %v5175_v1 = vcombine.high %v1361_v53, %v1365_v40  ;;  %v5174_v35 = vcombine.low %v1361_v53, %v1365_v40 }
 0x149   :  { %v5556_v4 = vpop.f32.mrf.mxu0 }
 0x14a   :  { %3302 = vmatpush2.bf16.msra.mxu1 %v1298_v8  ;;  %v1207_v5 = vmax.f32 %v5556_v4, 0.0  ;;  %v1237_v8 = vmax.f32 %v6071_v41, 0.0  ;;  %v7555_v4 = vcombine.low %v6021_v10, %v6023_v11  ;;  %v6217_v41 = vpop.f32.mrf.mxu1  ;;  %v1610_v10 = vld [vmem:[%s7536_s3 + $0x8] sm:$0xff]  ;;  %v1204_v11 = vmax.f32 %v6189_v16, 0.0  ;;  %v1611_v16 = vld [vmem:[%s7536_s3 + $0x10] sm:$0xff] }
 0x14b   :  { %v826_v13 = vpop.f32.mrf.mxu0  ;;  %3303 = vmatprep.subr.bf16.mxu1 %v7542_v60  ;;  %v1238_v60 = vmax.f32 %v6079_v49, 0.0  ;;  %v1235_v49 = vmax.f32 %v6061_v31, 0.0  ;;  %1680 = vperm.xlu0 %5658, %v1610_v10  }
 0x14c   :  { %1685 = vperm.xlu1 %5659, %v1611_v16   ;;  %v1227_v16 = vmax.f32 %v6031_v15, 0.0  ;;  %v1196_v15 = vmax.f32 %v6156_v14, 0.0  ;;  %v1226_v14 = vmax.f32 %v6043_v21, 0.0  ;;  %v1193_v21 = vmax.f32 %v6153_v3, 0.0 }
 0x14d   :  { %v5557_v47 = vpop.f32.mrf.mxu0  ;;  %v1327_v36 = vpack.c.bf16 %v1238_v60, %v1237_v8  ;;  %v1326_v8 = vpack.c.bf16 %v1236_v51, %v1235_v49  ;;  %v1381_v51 = vld [vmem:[#allocation3 + $0xe0] sm:$0xff] }
 0x14e   :  { %v1208_v46 = vmax.f32 %v5557_v47, 0.0  ;;  %3304 = vmatpush2.bf16.msra.mxu1 %v1297_v34  ;;  %v1205_v34 = vmax.f32 %v826_v13, 0.0 }
 0x14f   :  { %v829_v57 = vpop.f32.mrf.mxu0  ;;  %3851 = vmatprep.subr.bf16.mxu1 %v7554_v2 }
 0x150   :  { %v1312_v43 = vpack.c.bf16 %v1208_v46, %v1207_v5  ;;  %v1206_v50 = vmax.f32 %v829_v57, 0.0  ;;  %v1369_v5 = vld [vmem:[#allocation3 + $0x80] sm:$0xff]  ;;  %v1233_v57 = vmax.f32 %v6063_v33, 0.0  ;;  %v1201_v33 = vmax.f32 %v6185_v26, 0.0  ;;  %v1612_v26 = vld [vmem:[%s7536_s3 + $0x18] sm:$0xff] }
 0x151   :  { %v6212_v47 = vpop.f32.mrf.mxu0  ;;  %3306 = vmatmul.mubr.bf16.vlgmr.msra.gmra.mxu1 %v7555_v4  ;;  %v1373_v46 = vld [vmem:[#allocation3 + $0xa0] sm:$0xff]  ;;  %v1232_v4 = vmax.f32 %v6055_v27, 0.0  ;;  %1690 = vperm.xlu1 %5659, %v1612_v26   ;;  %v1195_v26 = vmax.f32 %v6149_v61, 0.0 }
 0x152   :  { %3563 = vmatpush1.bf16.msra.mxu0 %v1312_v43  ;;  %3313 = vmatprep.mubr.bf16.mxu1 %v5175_v1  ;;  %v1311_v13 = vpack.c.bf16 %v1206_v50, %v1205_v34  ;;  %v1203_v1 = vmax.f32 %v6180_v12, 0.0  ;;  %v5183_v60 = vcombine.high %v1369_v5, %v1373_v46  ;;  %v1202_v12 = vmax.f32 %v6194_v18, 0.0  ;;  %v1377_v18 = vld [vmem:[#allocation3 + $0xc0] sm:$0xff] }
 0x153   :  { %v6221_v54 = vpop.f32.mrf.mxu0  ;;  %3564 = vmatprep.subr.bf16.mxu0 %v7554_v2  ;;  %3852 = vmatpush1.bf16.msra.mxu1 %v1328_v62  ;;  %v6232_v62 = vpop.f32.mrf.mxu1  ;;  %v1231_v50 = vmax.f32 %v6047_v23, 0.0  ;;  %v1325_v34 = vpack.c.bf16 %v1234_v39, %v1233_v57  ;;  %v5182_v27 = vcombine.low %v1369_v5, %v1373_v46  ;;  %v1230_v57 = vmax.f32 %v6059_v29, 0.0  ;;  %v6277_v29 = vld [vmem:[#allocation3 + $0x100] sm:$0xff] }
 0x154   :  { %3853 = vmatprep.subr.bf16.mxu1 %v7554_v2  ;;  %v1310_v40 = vpack.c.bf16 %v1204_v11, %v1203_v1  ;;  %v1309_v10 = vpack.c.bf16 %v1202_v12, %v1201_v33  ;;  %v1199_v11 = vmax.f32 %v6163_v52, 0.0  ;;  %v1229_v1 = vmax.f32 %v6051_v25, 0.0  ;;  %v6286_v33 = vld [vmem:[#allocation3 + $0x120] sm:$0xff] }
 0x155   :  { %v6229_v31 = vpop.f32.mrf.mxu0  ;;  %v6247_v37 = vpop.f32.mrf.mxu1  ;;  %v1198_v52 = vmax.f32 %v6176_v28, 0.0  ;;  %v1197_v25 = vmax.f32 %v6167_v56, 0.0  ;;  %v1614_v56 = vld [vmem:[%s7536_s3 + $0x28] sm:$0xff]  ;;  %v1617_v61 = vld [vmem:[%s7536_s3 + $0x40] sm:$0xff] }
 0x156   :  { %3565 = vmatpush1.bf16.msra.mxu0 %v1311_v13  ;;  %v5191_v13 = vcombine.high %v1377_v18, %v1381_v51  ;;  %v1323_v12 = vpack.c.bf16 %v1230_v57, %v1229_v1  ;;  %1700 = vperm.xlu1 %5659, %v1614_v56  }
 0x157   :  { %v6236_v43 = vpop.f32.mrf.mxu0  ;;  %3566 = vmatprep.subr.bf16.mxu0 %v7554_v2  ;;  %3854 = vmatpush1.bf16.msra.mxu1 %v1327_v36  ;;  %v1200_v36 = vmax.f32 %v6171_v24, 0.0  ;;  %v1613_v24 = vld [vmem:[%s7536_s3 + $0x20] sm:$0xff] }
 0x158   :  { %3855 = vmatprep.subr.bf16.mxu1 %v7554_v2  ;;  %1695 = vperm.xlu0 %5658, %v1613_v24  }
 0x159   :  { %v6244_v53 = vpop.f32.mrf.mxu0  ;;  %3314 = vmatmul.mubr.bf16.gmra.mxu1 %v5174_v35  ;;  %v6262_v35 = vpop.f32.mrf.mxu1  ;;  %v1308_v5 = vpack.c.bf16 %v1200_v36, %v1199_v11  ;;  %v5199_v36 = vcombine.high %v6277_v29, %v6286_v33 }
 0x15a   :  { %3567 = vmatpush1.bf16.msra.mxu0 %v1310_v40  ;;  %3321 = vmatprep.mubr.bf16.mxu1 %v5183_v60  ;;  %v1324_v60 = vpack.c.bf16 %v1232_v4, %v1231_v50  ;;  %v1228_v40 = vmax.f32 %v6039_v19, 0.0  ;;  %v1615_v50 = vld [vmem:[%s7536_s3 + $0x30] sm:$0xff]  ;;  %v1307_v4 = vpack.c.bf16 %v1198_v52, %v1197_v25  ;;  %v1393_v52 = vld [vmem:[#allocation3 + $0x140] sm:$0xff] }
 0x15b   :  { %v6251_v49 = vpop.f32.mrf.mxu0  ;;  %3568 = vmatprep.subr.bf16.mxu0 %v7554_v2  ;;  %3856 = vmatpush1.bf16.msra.mxu1 %v1326_v8  ;;  %v6279_v39 = vpop.f32.mrf.mxu1  ;;  %v1397_v25 = vld [vmem:[#allocation3 + $0x160] sm:$0xff] }
 0x15c   :  { %3857 = vmatprep.subr.bf16.mxu1 %v7554_v2  ;;  %1705 = vperm.xlu0 %5658, %v1615_v50   ;;  %v1322_v11 = vpack.c.bf16 %v1228_v40, %v1227_v16  ;;  %v1619_v16 = vld [vmem:[%s7536_s3 + $0x50] sm:$0xff]  ;;  %v5207_v50 = vcombine.high %v1393_v52, %v1397_v25 }
 0x15d   :  { %v6259_v23 = vpop.f32.mrf.mxu0 }
 0x15e   :  { %3569 = vmatpush1.bf16.msra.mxu0 %v1309_v10  ;;  %v6301_v10 = vpop.f32.mrf.mxu1 }
 0x15f   :  { %v6266_v8 = vpop.f32.mrf.mxu0  ;;  %3570 = vmatprep.subr.bf16.mxu0 %v7554_v2  ;;  %3858 = vmatpush1.bf16.msra.mxu1 %v1325_v34  ;;  %v5190_v34 = vcombine.low %v1377_v18, %v1381_v51  ;;  %v1306_v18 = vpack.c.bf16 %v1196_v15, %v1195_v26  ;;  %v1194_v51 = vmax.f32 %v6160_v45, 0.0  ;;  %v1255_v45 = vmax.f32 %v6138_v7, 0.0  ;;  %v1618_v7 = vld [vmem:[%s7536_s3 + $0x48] sm:$0xff] }
 0x160   :  { %3859 = vmatprep.subr.bf16.mxu1 %v7554_v2  ;;  %1715 = vperm.xlu0 %5658, %v1617_v61   ;;  %v1252_v61 = vmax.f32 %v6131_v59, 0.0 }
 0x161   :  { %v6274_v46 = vpop.f32.mrf.mxu0  ;;  %3322 = vmatmul.mubr.bf16.gmra.mxu1 %v5182_v27  ;;  %v1225_v27 = vmax.f32 %v6035_v17, 0.0  ;;  %v1616_v17 = vld [vmem:[%s7536_s3 + $0x38] sm:$0xff]  ;;  %v1305_v3 = vpack.c.bf16 %v1194_v51, %v1193_v21  ;;  %v1401_v51 = vld [vmem:[#allocation3 + $0x180] sm:$0xff] }
 0x162   :  { %3571 = vmatpush1.bf16.msra.mxu0 %v1308_v5  ;;  %3329 = vmatprep.mubr.bf16.mxu1 %v5191_v13  ;;  %v1256_v5 = vmax.f32 %v6144_v42, 0.0  ;;  %v1219_v59 = vmax.f32 %v6274_v46, 0.0 }
 0x163   :  { %v6283_v28 = vpop.f32.mrf.mxu0  ;;  %3572 = vmatprep.subr.bf16.mxu0 %v7554_v2  ;;  %3860 = vmatpush1.bf16.msra.mxu1 %v1324_v60  ;;  %v6317_v60 = vpop.f32.mrf.mxu1  ;;  %v1321_v57 = vpack.c.bf16 %v1226_v14, %v1225_v27 }
 0x164   :  { %3861 = vmatprep.subr.bf16.mxu1 %v7554_v2  ;;  %1710 = vperm.xlu1 %5659, %v1616_v17   ;;  %v1336_v26 = vpack.c.bf16 %v1256_v5, %v1255_v45  ;;  %v1623_v17 = vld [vmem:[%s7536_s3 + $0x70] sm:$0xff] }
 0x165   :  { %v6296_v19 = vpop.f32.mrf.mxu0  ;;  %1725 = vperm.xlu0 %5658, %v1619_v16   ;;  %v6331_v15 = vpop.f32.mrf.mxu1  ;;  %v1249_v16 = vmax.f32 %v6128_v22, 0.0  ;;  %v1624_v22 = vld [vmem:[%s7536_s3 + $0x78] sm:$0xff] }
 0x166   :  { %3573 = vmatpush1.bf16.msra.mxu0 %v1307_v4  ;;  %v1220_v21 = vmax.f32 %v6296_v19, 0.0  ;;  %v1250_v19 = vmax.f32 %v6135_v0, 0.0  ;;  %v1217_v0 = vmax.f32 %v6283_v28, 0.0  ;;  %v1216_v28 = vmax.f32 %v6259_v23, 0.0 }
 0x167   :  { %v6305_v13 = vpop.f32.mrf.mxu0  ;;  %3574 = vmatprep.subr.bf16.mxu0 %v7554_v2  ;;  %3862 = vmatpush1.bf16.msra.mxu1 %v1323_v12  ;;  %v5198_v12 = vcombine.low %v6277_v29, %v6286_v33  ;;  %v1254_v29 = vmax.f32 %v6147_v20, 0.0  ;;  %v1621_v33 = vld [vmem:[%s7536_s3 + $0x60] sm:$0xff]  ;;  %v6343_v14 = vpop.f32.mrf.mxu1  ;;  %v1251_v20 = vmax.f32 %v6124_v48, 0.0  ;;  %v1622_v48 = vld [vmem:[%s7536_s3 + $0x68] sm:$0xff]  ;;  %v1246_v23 = vmax.f32 %v6121_v32, 0.0 }
 0x168   :  { %3863 = vmatprep.subr.bf16.mxu1 %v7554_v2  ;;  %1720 = vperm.xlu1 %5659, %v1618_v7   ;;  %v1248_v7 = vmax.f32 %v6115_v38, 0.0  ;;  %v1215_v38 = vmax.f32 %v6244_v53, 0.0  ;;  %v1213_v32 = vmax.f32 %v6251_v49, 0.0  ;;  %v1212_v49 = vmax.f32 %v6229_v31, 0.0  ;;  %v7556_v31 = vld [vmem:[#allocation8_spill] sm:$0xff] }
 0x169   :  { %v5572_v1 = vpop.f32.mrf.mxu0  ;;  %3330 = vmatmul.mubr.bf16.gmra.mxu1 %v5190_v34  ;;  %v1253_v34 = vmax.f32 %v6142_v30, 0.0  ;;  %1735 = vperm.xlu0 %5658, %v1621_v33   ;;  %v6357_v5 = vpop.f32.mrf.mxu1  ;;  %v1245_v33 = vmax.f32 %v6110_v9, 0.0  ;;  %v1628_v9 = vld [vmem:[%s7536_s3 + $0x98] sm:$0xff] }
 0x16a   :  { %3575 = vmatpush1.bf16.msra.mxu0 %v1306_v18  ;;  %3337 = vmatprep.mubr.bf16.mxu1 %v5199_v36  ;;  %v1223_v42 = vmax.f32 %v5572_v1, 0.0  ;;  %v1405_v1 = vld [vmem:[#allocation3 + $0x1a0] sm:$0xff] }
 0x16b   :  { %v890_v24 = vpop.f32.mrf.mxu0  ;;  %3576 = vmatprep.subr.bf16.mxu0 %v7554_v2  ;;  %3864 = vmatpush1.bf16.msra.mxu1 %v1322_v11  ;;  %v1620_v11 = vld [vmem:[%s7536_s3 + $0x58] sm:$0xff]  ;;  %v1335_v18 = vpack.c.bf16 %v1254_v29, %v1253_v34  ;;  %v5215_v45 = vcombine.high %v1401_v51, %v1405_v1  ;;  %v6371_v46 = vpop.f32.mrf.mxu1  ;;  %v5214_v34 = vcombine.low %v1401_v51, %v1405_v1  ;;  %v1421_v51 = vld [vmem:[#allocation3 + $0x220] sm:$0xff]  ;;  %v1631_v1 = vld [vmem:[%s7536_s3 + $0xb0] sm:$0xff] }
 0x16c   :  { %3865 = vmatprep.subr.bf16.mxu1 %v7554_v2  ;;  %v1221_v30 = vmax.f32 %v890_v24, 0.0  ;;  %1730 = vperm.xlu1 %5659, %v1620_v11   ;;  %v5206_v24 = vcombine.low %v1393_v52, %v1397_v25  ;;  %v1625_v52 = vld [vmem:[%s7536_s3 + $0x80] sm:$0xff]  ;;  %v1318_v25 = vpack.c.bf16 %v1220_v21, %v1219_v59  ;;  %v1316_v11 = vpack.c.bf16 %v1216_v28, %v1215_v38 }
 0x16d   :  { %v5573_v40 = vpop.f32.mrf.mxu0  ;;  %1745 = vperm.xlu0 %5658, %v1623_v17   ;;  %v6385_v29 = vpop.f32.mrf.mxu1  ;;  %v1269_v28 = vmax.f32 %v6301_v10, 0.0  ;;  %v7557_v38 = vld [vmem:[#allocation6_spill] sm:$0xff]  ;;  %v1636_v10 = vld [vmem:[%s7536_s3 + $0xd8] sm:$0xff] }
 0x16e   :  { %v1224_v56 = vmax.f32 %v5573_v40, 0.0  ;;  %3577 = vmatpush1.bf16.msra.mxu0 %v1305_v3  ;;  %v1334_v3 = vpack.c.bf16 %v1252_v61, %v1251_v20  ;;  %v1218_v40 = vmax.f32 %v6305_v13, 0.0  ;;  %v1333_v13 = vpack.c.bf16 %v1250_v19, %v1249_v16  ;;  %v1633_v16 = vld [vmem:[%s7536_s3 + $0xc0] sm:$0xff] }
 0x16f   :  { %v893_v4 = vpop.f32.mrf.mxu0  ;;  %3578 = vmatprep.subr.bf16.mxu0 %v7554_v2  ;;  %3866 = vmatpush1.bf16.msra.mxu1 %v1321_v57  ;;  %v6399_v53 = vpop.f32.mrf.mxu1  ;;  %v1243_v20 = vmax.f32 %v6087_v55, 0.0  ;;  %v1244_v61 = vmax.f32 %v6096_v63, 0.0  ;;  %v1630_v55 = vld [vmem:[%s7536_s3 + $0xa8] sm:$0xff]  ;;  %v1211_v63 = vmax.f32 %v6212_v47, 0.0  ;;  %v1210_v19 = vmax.f32 %v6236_v43, 0.0 }
 0x170   :  { %v1320_v36 = vpack.c.bf16 %v1224_v56, %v1223_v42  ;;  %v1222_v27 = vmax.f32 %v893_v4, 0.0  ;;  %3867 = vmatprep.subr.bf16.mxu1 %v7554_v2  ;;  %1740 = vperm.xlu1 %5659, %v1622_v48   ;;  %v1409_v42 = vld [vmem:[#allocation3 + $0x1c0] sm:$0xff]  ;;  %v1317_v4 = vpack.c.bf16 %v1218_v40, %v1217_v0  ;;  %v1241_v48 = vmax.f32 %v6092_v58, 0.0  ;;  %v1632_v58 = vld [vmem:[%s7536_s3 + $0xb8] sm:$0xff] }
 0x171   :  { %3338 = vmatmul.mubr.bf16.gmra.mxu1 %v5198_v12  ;;  %1755 = vperm.xlu0 %5658, %v1625_v52   ;;  %v1247_v12 = vmax.f32 %v6105_v6, 0.0  ;;  %v1413_v56 = vld [vmem:[#allocation3 + $0x1e0] sm:$0xff]  ;;  %v1330_v59 = vpack.c.bf16 %v1244_v61, %v1243_v20  ;;  %v1209_v47 = vmax.f32 %v6221_v54, 0.0  ;;  %v1271_v43 = vmax.f32 %v6279_v39, 0.0  ;;  %v1635_v54 = vld [vmem:[%s7536_s3 + $0xd0] sm:$0xff] }
 0x172   :  { %3579 = vmatpush2.bf16.msra.mxu0 %v1320_v36  ;;  %3345 = vmatprep.mubr.bf16.mxu1 %v5207_v50  ;;  %v1319_v57 = vpack.c.bf16 %v1222_v27, %v1221_v30  ;;  %v1627_v50 = vld [vmem:[%s7536_s3 + $0x90] sm:$0xff]  ;;  %v1626_v6 = vld [vmem:[%s7536_s3 + $0x88] sm:$0xff]  ;;  %v1629_v27 = vld [vmem:[%s7536_s3 + $0xa0] sm:$0xff]  ;;  %v1214_v30 = vmax.f32 %v6266_v8, 0.0  ;;  %v1331_v8 = vpack.c.bf16 %v1246_v23, %v1245_v33  ;;  %v5222_v21 = vcombine.low %v1409_v42, %v1413_v56 }
 0x173   :  { %3580 = vmatprep.subr.bf16.mxu0 %v7554_v2  ;;  %3868 = vmatpush2.bf16.msra.mxu1 %v1336_v26  ;;  %v5223_v26 = vcombine.high %v1409_v42, %v1413_v56  ;;  %v1332_v36 = vpack.c.bf16 %v1248_v7, %v1247_v12  ;;  %v1425_v52 = vld [vmem:[#allocation3 + $0x240] sm:$0xff]  ;;  %v1272_v0 = vmax.f32 %v6317_v60, 0.0  ;;  %v1362_v12 = vld [vmem:[#allocation3 + $0x48] sm:$0xff]  ;;  %v1267_v23 = vmax.f32 %v6217_v41, 0.0 }
 0x174   :  { %3869 = vmatprep.subr.bf16.mxu1 %v7554_v2  ;;  %1750 = vperm.xlu1 %5659, %v1624_v22   ;;  %v1315_v17 = vpack.c.bf16 %v1214_v30, %v1213_v32  ;;  %v1366_v7 = vld [vmem:[#allocation3 + $0x68] sm:$0xff]  ;;  %v1437_v30 = vld [vmem:[#allocation3 + $0x2a0] sm:$0xff] }
 0x175   :  { %1765 = vperm.xlu0 %5658, %v1627_v50   ;;  %v1634_v56 = vld [vmem:[%s7536_s3 + $0xc8] sm:$0xff]  ;;  %v5177_v50 = vcombine.high %v1362_v12, %v1366_v7  ;;  %v1639_v20 = vld [vmem:[%s7536_s3 + $0xf0] sm:$0xff] }
 0x176   :  { %3581 = vmatpush2.bf16.msra.mxu0 %v1319_v57  ;;  %v1374_v32 = vld [vmem:[#allocation3 + $0xa8] sm:$0xff] }
 0x177   :  { %3582 = vmatprep.subr.bf16.mxu0 %v7554_v2  ;;  %3870 = vmatpush2.bf16.msra.mxu1 %v1335_v18  ;;  %v1417_v18 = vld [vmem:[#allocation3 + $0x200] sm:$0xff] }
 0x178   :  { %3871 = vmatprep.subr.bf16.mxu1 %v7554_v2  ;;  %1760 = vperm.xlu1 %5659, %v1626_v6   ;;  %v5231_v57 = vcombine.high %v1417_v18, %v1421_v51  ;;  %v5230_v42 = vcombine.low %v1417_v18, %v1421_v51  ;;  %v1637_v6 = vld [vmem:[%s7536_s3 + $0xe0] sm:$0xff] }
 0x179   :  { %3346 = vmatmul.mubr.bf16.gmra.mxu1 %v5206_v24  ;;  %1775 = vperm.xlu0 %5658, %v1629_v27   ;;  %v6413_v24 = vpop.f32.mrf.mxu1  ;;  %v1268_v27 = vmax.f32 %v6247_v37, 0.0  ;;  %v1638_v37 = vld [vmem:[%s7536_s3 + $0xe8] sm:$0xff] }
 0x17a   :  { %3583 = vmatpush2.bf16.msra.mxu0 %v1318_v25  ;;  %3353 = vmatprep.mubr.bf16.mxu1 %v5215_v45  ;;  %v1242_v45 = vmax.f32 %v7556_v31, 0.0  ;;  %v1429_v25 = vld [vmem:[#allocation3 + $0x260] sm:$0xff] }
 0x17b   :  { %3584 = vmatprep.subr.bf16.mxu0 %v7554_v2  ;;  %3872 = vmatpush2.bf16.msra.mxu1 %v1334_v3  ;;  %v1314_v3 = vpack.c.bf16 %v1212_v49, %v1211_v63  ;;  %v6427_v40 = vpop.f32.mrf.mxu1  ;;  %v5239_v39 = vcombine.high %v1425_v52, %v1429_v25  ;;  %v5238_v61 = vcombine.low %v1425_v52, %v1429_v25 }
 0x17c   :  { %3873 = vmatprep.subr.bf16.mxu1 %v7554_v2  ;;  %1770 = vperm.xlu1 %5659, %v1628_v9   ;;  %v1329_v22 = vpack.c.bf16 %v1242_v45, %v1241_v48  ;;  %v1370_v9 = vld [vmem:[#allocation3 + $0x88] sm:$0xff]  ;;  %v1342_v49 = vpack.c.bf16 %v1268_v27, %v1267_v23  ;;  %v1445_v45 = vld [vmem:[#allocation3 + $0x2e0] sm:$0xff] }
 0x17d   :  { %1785 = vperm.xlu0 %5658, %v1631_v1   ;;  %v6439_v60 = vpop.f32.mrf.mxu1  ;;  %v5185_v51 = vcombine.high %v1370_v9, %v1374_v32  ;;  %v1265_v1 = vmax.f32 %v6232_v62, 0.0  ;;  %v1441_v62 = vld [vmem:[#allocation3 + $0x2c0] sm:$0xff]  ;;  %v7561_v48 = vld [vmem:[#allocation15_spill] sm:$0xff] }
 0x17e   :  { %3585 = vmatpush2.bf16.msra.mxu0 %v1317_v4  ;;  %v1344_v4 = vpack.c.bf16 %v1272_v0, %v1271_v43  ;;  %v5255_v52 = vcombine.high %v1441_v62, %v1445_v45  ;;  %v1642_v43 = vld [vmem:[%s7536_s3 + $0x108] sm:$0xff] }
 0x17f   :  { %3586 = vmatprep.subr.bf16.mxu0 %v7554_v2  ;;  %3874 = vmatpush2.bf16.msra.mxu1 %v1333_v13  ;;  %v1313_v13 = vpack.c.bf16 %v1210_v19, %v1209_v47  ;;  %v1643_v19 = vld [vmem:[%s7536_s3 + $0x110] sm:$0xff]  ;;  %v5184_v47 = vcombine.low %v1370_v9, %v1374_v32  ;;  %v7562_v0 = vld [vmem:[#allocation14_spill] sm:$0xff] }
 0x180   :  { %3875 = vmatprep.subr.bf16.mxu1 %v7554_v2  ;;  %1780 = vperm.xlu1 %5659, %v1630_v55   ;;  %v1640_v55 = vld [vmem:[%s7536_s3 + $0xf8] sm:$0xff]  ;;  %v7565_v9 = vld [vmem:[#allocation10_spill] sm:$0xff] }
 0x181   :  { %3354 = vmatmul.mubr.bf16.gmra.mxu1 %v5214_v34  ;;  %1795 = vperm.xlu0 %5658, %v1633_v16   ;;  %v1270_v34 = vmax.f32 %v6331_v15, 0.0  ;;  %v6453_v15 = vpop.f32.mrf.mxu1  ;;  %v1378_v16 = vld [vmem:[#allocation3 + $0xc8] sm:$0xff]  ;;  %v1257_v32 = vmax.f32 %v7565_v9, 0.0 }
 0x182   :  { %3587 = vmatpush2.bf16.msra.mxu0 %v1316_v11  ;;  %3361 = vmatprep.mubr.bf16.mxu1 %v5223_v26  ;;  %v7558_v26 = vld [vmem:[#allocation7_spill] sm:$0xff] }
 0x183   :  { %3588 = vmatprep.subr.bf16.mxu0 %v7554_v2  ;;  %3876 = vmatpush2.bf16.msra.mxu1 %v1332_v36  ;;  %v7559_v33 = vcombine.low %v7557_v38, %v7558_v26  ;;  %v1433_v36 = vld [vmem:[#allocation3 + $0x280] sm:$0xff]  ;;  %v1343_v11 = vpack.c.bf16 %v1270_v34, %v1269_v28  ;;  %v6461_v41 = vpop.f32.mrf.mxu1  ;;  %v7564_v28 = vld [vmem:[#allocation11_spill] sm:$0xff] }
 0x184   :  { %3877 = vmatprep.subr.bf16.mxu1 %v7554_v2  ;;  %1790 = vperm.xlu1 %5659, %v1632_v58   ;;  %v5247_v18 = vcombine.high %v1433_v36, %v1437_v30  ;;  %v5246_v58 = vcombine.low %v1433_v36, %v1437_v30  ;;  %v1386_v38 = vld [vmem:[#allocation3 + $0x108] sm:$0xff] }
 0x185   :  { %1805 = vperm.xlu0 %5658, %v1635_v54   ;;  %v6475_v63 = vpop.f32.mrf.mxu1  ;;  %v1262_v54 = vmax.f32 %v6204_v44, 0.0  ;;  %v7563_v44 = vld [vmem:[#allocation9_spill] sm:$0xff]  ;;  %v1390_v26 = vld [vmem:[#allocation3 + $0x128] sm:$0xff] }
 0x186   :  { %3589 = vmatpush2.bf16.msra.mxu0 %v1315_v17  ;;  %v1266_v17 = vmax.f32 %v6262_v35, 0.0  ;;  %v7560_v35 = vld [vmem:[#allocation13_spill] sm:$0xff]  ;;  %v5201_v27 = vcombine.high %v1386_v38, %v1390_v26  ;;  %v1646_v30 = vld [vmem:[%s7536_s3 + $0x128] sm:$0xff] }
 0x187   :  { %3590 = vmatprep.subr.bf16.mxu0 %v7554_v2  ;;  %3878 = vmatpush2.bf16.msra.mxu1 %v1331_v8  ;;  %v5176_v8 = vcombine.low %v1362_v12, %v1366_v7  ;;  %v1261_v12 = vmax.f32 %v7562_v0, 0.0  ;;  %v1469_v0 = vld [vmem:[#allocation3 + $0x3a0] sm:$0xff] }
 0x188   :  { %3879 = vmatprep.subr.bf16.mxu1 %v7554_v2  ;;  %1800 = vperm.xlu1 %5659, %v1634_v56   ;;  %v1341_v31 = vpack.c.bf16 %v1266_v17, %v1265_v1  ;;  %v1449_v56 = vld [vmem:[#allocation3 + $0x300] sm:$0xff] }
 0x189   :  { %3362 = vmatmul.mubr.bf16.gmra.mxu1 %v5222_v21  ;;  %1815 = vperm.xlu0 %5658, %v1637_v6   ;;  %v1641_v21 = vld [vmem:[%s7536_s3 + $0x100] sm:$0xff]  ;;  %v1339_v34 = vpack.c.bf16 %v1262_v54, %v1261_v12  ;;  %v1402_v12 = vld [vmem:[#allocation3 + $0x188] sm:$0xff]  ;;  %v1283_v54 = vmax.f32 %v6453_v15, 0.0 }
 0x18a   :  { %3591 = vmatpush2.bf16.msra.mxu0 %v1314_v3  ;;  %3369 = vmatprep.mubr.bf16.mxu1 %v5231_v57  ;;  %v1263_v57 = vmax.f32 %v7560_v35, 0.0  ;;  %v1382_v3 = vld [vmem:[#allocation3 + $0xe8] sm:$0xff]  ;;  %v1453_v6 = vld [vmem:[#allocation3 + $0x320] sm:$0xff] }
 0x18b   :  { %3592 = vmatprep.subr.bf16.mxu0 %v7554_v2  ;;  %3880 = vmatpush2.bf16.msra.mxu1 %v1330_v59  ;;  %v1264_v59 = vmax.f32 %v7561_v48, 0.0  ;;  %v5193_v25 = vcombine.high %v1378_v16, %v1382_v3  ;;  %v5192_v36 = vcombine.low %v1378_v16, %v1382_v3  ;;  %v5263_v23 = vcombine.high %v1449_v56, %v1453_v6  ;;  %v1461_v17 = vld [vmem:[#allocation3 + $0x360] sm:$0xff] }
 0x18c   :  { %3881 = vmatprep.subr.bf16.mxu1 %v7554_v2  ;;  %1810 = vperm.xlu1 %5659, %v1636_v10   ;;  %v5254_v10 = vcombine.low %v1441_v62, %v1445_v45  ;;  %v5262_v48 = vcombine.low %v1449_v56, %v1453_v6  ;;  %v1650_v3 = vld [vmem:[%s7536_s3 + $0x148] sm:$0xff]  ;;  %v1655_v56 = vld [vmem:[%s7536_s3 + $0x170] sm:$0xff]  ;;  %v1657_v6 = vld [vmem:[%s7536_s3 + $0x180] sm:$0xff] }
 0x18d   :  { %1825 = vperm.xlu0 %5658, %v1639_v20   ;;  %v1340_v7 = vpack.c.bf16 %v1264_v59, %v1263_v57  ;;  %v1651_v57 = vld [vmem:[%s7536_s3 + $0x150] sm:$0xff]  ;;  %v5200_v59 = vcombine.low %v1386_v38, %v1390_v26  ;;  %v1654_v15 = vld [vmem:[%s7536_s3 + $0x168] sm:$0xff]  ;;  %v1656_v38 = vld [vmem:[%s7536_s3 + $0x178] sm:$0xff] }
 0x18e   :  { %3593 = vmatpush2.bf16.msra.mxu0 %v1313_v13  ;;  %v1645_v13 = vld [vmem:[%s7536_s3 + $0x120] sm:$0xff] }
 0x18f   :  { %3882 = vmatpush2.bf16.msra.mxu1 %v1329_v22  ;;  %4140 = vmatprep.subr.bf16.mxu0 %v7554_v2  ;;  %v6483_v22 = vpop.f32.mrf.mxu1  ;;  %v1477_v26 = vld [vmem:[#allocation3 + $0x3e0] sm:$0xff] }
 0x190   :  { %1820 = vperm.xlu1 %5659, %v1638_v37   ;;  %v1457_v37 = vld [vmem:[#allocation3 + $0x340] sm:$0xff] }
 0x191   :  { %3370 = vmatmul.mubr.bf16.gmra.mxu1 %v5230_v42  ;;  %3595 = vmatmul.mubr.bf16.vlgmr.msra.gmra.mxu0 %v7559_v33  ;;  %v1644_v42 = vld [vmem:[%s7536_s3 + $0x118] sm:$0xff]  ;;  %v1647_v33 = vld [vmem:[%s7536_s3 + $0x130] sm:$0xff] }
 0x192   :  { %3377 = vmatprep.mubr.bf16.mxu1 %v5239_v39  ;;  %3602 = vmatprep.mubr.bf16.mxu0 %v5177_v50  ;;  %v5636_v39 = vpop.f32.mrf.mxu1  ;;  %v1259_v50 = vmax.f32 %v7563_v44, 0.0 }
 0x193   :  { %4141 = vmatpush1.bf16.msra.mxu0 %v1344_v4  ;;  %1835 = vperm.xlu0 %5658, %v1641_v21   ;;  %v1260_v4 = vmax.f32 %v7564_v28, 0.0  ;;  %v1394_v21 = vld [vmem:[#allocation3 + $0x148] sm:$0xff]  ;;  %v1287_v62 = vmax.f32 %v5636_v39, 0.0  ;;  %v5270_v39 = vcombine.low %v1457_v37, %v1461_v17 }
 0x194   :  { %4142 = vmatprep.subr.bf16.mxu0 %v7554_v2  ;;  %1830 = vperm.xlu1 %5659, %v1640_v55   ;;  %v1398_v55 = vld [vmem:[#allocation3 + $0x168] sm:$0xff] }
 0x195   :  { %v1338_v20 = vpack.c.bf16 %v1260_v4, %v1259_v50  ;;  %v5209_v45 = vcombine.high %v1394_v21, %v1398_v55  ;;  %v5208_v44 = vcombine.low %v1394_v21, %v1398_v55  ;;  %v1663_v21 = vld [vmem:[%s7536_s3 + $0x1b0] sm:$0xff] }
 0x197   :  { %4143 = vmatpush1.bf16.msra.mxu0 %v1343_v11  ;;  %1845 = vperm.xlu0 %5658, %v1643_v19   ;;  %v1146_v11 = vpop.f32.mrf.mxu1 }
 0x198   :  { %4144 = vmatprep.subr.bf16.mxu0 %v7554_v2  ;;  %1840 = vperm.xlu1 %5659, %v1642_v43   ;;  %v1285_v19 = vmax.f32 %v1146_v11, 0.0  ;;  %v1465_v43 = vld [vmem:[#allocation3 + $0x380] sm:$0xff] }
 0x199   :  { %3378 = vmatmul.mubr.bf16.gmra.mxu1 %v5238_v61  ;;  %3603 = vmatmul.mubr.bf16.gmra.mxu0 %v5176_v8  ;;  %v7566_v61 = vld [vmem:[#allocation12_spill] sm:$0xff]  ;;  %v5637_v1 = vpop.f32.mrf.mxu1  ;;  %v5279_v50 = vcombine.high %v1465_v43, %v1469_v0  ;;  %v5278_v11 = vcombine.low %v1465_v43, %v1469_v0  ;;  %v1666_v0 = vld [vmem:[%s7536_s3 + $0x1c8] sm:$0xff] }
 0x19a   :  { %3385 = vmatprep.mubr.bf16.mxu1 %v5247_v18  ;;  %3610 = vmatprep.mubr.bf16.mxu0 %v5185_v51  ;;  %v1258_v8 = vmax.f32 %v7566_v61, 0.0  ;;  %v1649_v18 = vld [vmem:[%s7536_s3 + $0x140] sm:$0xff]  ;;  %v1648_v51 = vld [vmem:[%s7536_s3 + $0x138] sm:$0xff]  ;;  %v1288_v35 = vmax.f32 %v5637_v1, 0.0  ;;  %v1278_v61 = vmax.f32 %v6439_v60, 0.0  ;;  %v1418_v60 = vld [vmem:[#allocation3 + $0x208] sm:$0xff] }
 0x19b   :  { %4145 = vmatpush1.bf16.msra.mxu0 %v1342_v49  ;;  %1855 = vperm.xlu0 %5658, %v1645_v13   ;;  %v1149_v16 = vpop.f32.mrf.mxu1  ;;  %v1284_v13 = vmax.f32 %v6475_v63, 0.0  ;;  %v1281_v63 = vmax.f32 %v6461_v41, 0.0  ;;  %v1473_v41 = vld [vmem:[#allocation3 + $0x3c0] sm:$0xff]  ;;  %v1275_v1 = vmax.f32 %v6343_v14, 0.0 }
 0x19c   :  { %4146 = vmatprep.subr.bf16.mxu0 %v7554_v2  ;;  %1850 = vperm.xlu1 %5659, %v1644_v42   ;;  %v1337_v49 = vpack.c.bf16 %v1258_v8, %v1257_v32  ;;  %v5287_v9 = vcombine.high %v1473_v41, %v1477_v26  ;;  %v1661_v8 = vld [vmem:[%s7536_s3 + $0x1a0] sm:$0xff]  ;;  %v5286_v55 = vcombine.low %v1473_v41, %v1477_v26  ;;  %v1662_v14 = vld [vmem:[%s7536_s3 + $0x1a8] sm:$0xff]  ;;  %v4495_v26 = vld [vmem:[%s7537_s4 + $0x10] sm:$0xff] }
 0x19d   :  { %v1350_v4 = vpack.c.bf16 %v1284_v13, %v1283_v54  ;;  %v1501_v54 = vld [vmem:[#allocation3 + $0x4a0] sm:$0xff]  ;;  %v1434_v13 = vld [vmem:[#allocation3 + $0x288] sm:$0xff] }
 0x19e   :  { %v1446_v41 = vld [vmem:[#allocation3 + $0x2e8] sm:$0xff] }
 0x19f   :  { %4147 = vmatpush1.bf16.msra.mxu0 %v1341_v31  ;;  %1865 = vperm.xlu0 %5658, %v1647_v33   ;;  %v5271_v31 = vcombine.high %v1457_v37, %v1461_v17  ;;  %v1414_v33 = vld [vmem:[#allocation3 + $0x1e8] sm:$0xff] }
 0x1a0   :  { %4148 = vmatprep.subr.bf16.mxu0 %v7554_v2  ;;  %1860 = vperm.xlu1 %5659, %v1646_v30   ;;  %v1422_v37 = vld [vmem:[#allocation3 + $0x228] sm:$0xff] }
 0x1a1   :  { %3386 = vmatmul.mubr.bf16.gmra.mxu1 %v5246_v58  ;;  %3611 = vmatmul.mubr.bf16.gmra.mxu0 %v5184_v47  ;;  %v1352_v58 = vpack.c.bf16 %v1288_v35, %v1287_v62  ;;  %v1286_v47 = vmax.f32 %v1149_v16, 0.0  ;;  %v1493_v16 = vld [vmem:[#allocation3 + $0x460] sm:$0xff] }
 0x1a2   :  { %3393 = vmatprep.mubr.bf16.mxu1 %v5255_v52  ;;  %3618 = vmatprep.mubr.bf16.mxu0 %v5193_v25  ;;  %v1653_v52 = vld [vmem:[%s7536_s3 + $0x160] sm:$0xff]  ;;  %v1652_v25 = vld [vmem:[%s7536_s3 + $0x158] sm:$0xff] }
 0x1a3   :  { %4149 = vmatpush1.bf16.msra.mxu0 %v1340_v7  ;;  %1875 = vperm.xlu0 %5658, %v1649_v18   ;;  %v1406_v7 = vld [vmem:[#allocation3 + $0x1a8] sm:$0xff]  ;;  %v1351_v42 = vpack.c.bf16 %v1286_v47, %v1285_v19  ;;  %v1660_v18 = vld [vmem:[%s7536_s3 + $0x198] sm:$0xff] }
 0x1a4   :  { %4150 = vmatprep.subr.bf16.mxu0 %v7554_v2  ;;  %1870 = vperm.xlu1 %5659, %v1648_v51   ;;  %v5217_v28 = vcombine.high %v1402_v12, %v1406_v7  ;;  %v5216_v30 = vcombine.low %v1402_v12, %v1406_v7  ;;  %v1485_v51 = vld [vmem:[#allocation3 + $0x420] sm:$0xff]  ;;  %v1668_v12 = vld [vmem:[%s7536_s3 + $0x1d8] sm:$0xff] }
 0x1a5   :  { %v1497_v7 = vld [vmem:[#allocation3 + $0x480] sm:$0xff] }
 0x1a7   :  { %4151 = vmatpush1.bf16.msra.mxu0 %v1339_v34  ;;  %1885 = vperm.xlu0 %5658, %v1651_v57   ;;  %v1282_v34 = vmax.f32 %v6483_v22, 0.0  ;;  %v1410_v22 = vld [vmem:[#allocation3 + $0x1c8] sm:$0xff]  ;;  %v5233_v57 = vcombine.high %v1418_v60, %v1422_v37 }
 0x1a8   :  { %4152 = vmatprep.subr.bf16.mxu0 %v7554_v2  ;;  %1880 = vperm.xlu1 %5659, %v1650_v3   ;;  %v5225_v32 = vcombine.high %v1410_v22, %v1414_v33  ;;  %v5224_v62 = vcombine.low %v1410_v22, %v1414_v33  ;;  %v1430_v3 = vld [vmem:[#allocation3 + $0x268] sm:$0xff]  ;;  %v5310_v22 = vcombine.low %v1497_v7, %v1501_v54 }
 0x1a9   :  { %3394 = vmatmul.mubr.bf16.gmra.mxu1 %v5254_v10  ;;  %3619 = vmatmul.mubr.bf16.gmra.mxu0 %v5192_v36  ;;  %v1279_v10 = vmax.f32 %v6399_v53, 0.0  ;;  %v1280_v36 = vmax.f32 %v6427_v40, 0.0  ;;  %v1658_v53 = vld [vmem:[%s7536_s3 + $0x188] sm:$0xff]  ;;  %v1277_v40 = vmax.f32 %v6413_v24, 0.0 }
 0x1aa   :  { %3401 = vmatprep.mubr.bf16.mxu1 %v5263_v23  ;;  %3626 = vmatprep.mubr.bf16.mxu0 %v5201_v27  ;;  %v1349_v23 = vpack.c.bf16 %v1282_v34, %v1281_v63  ;;  %v1659_v27 = vld [vmem:[%s7536_s3 + $0x190] sm:$0xff]  ;;  %v1481_v24 = vld [vmem:[#allocation3 + $0x400] sm:$0xff] }
 0x1ab   :  { %4153 = vmatpush1.bf16.msra.mxu0 %v1338_v20  ;;  %1895 = vperm.xlu0 %5658, %v1653_v52   ;;  %v1348_v20 = vpack.c.bf16 %v1280_v36, %v1279_v10  ;;  %v1347_v17 = vpack.c.bf16 %v1278_v61, %v1277_v40  ;;  %v5295_v35 = vcombine.high %v1481_v24, %v1485_v51  ;;  %v4493_v63 = vld [vmem:[%s7537_s4] sm:$0xff]  ;;  %v4499_v40 = vld [vmem:[%s7537_s4 + $0x30] sm:$0xff] }
 0x1ac   :  { %4154 = vmatprep.subr.bf16.mxu0 %v7554_v2  ;;  %1890 = vperm.xlu1 %5659, %v1652_v25   ;;  %v5294_v47 = vcombine.low %v1481_v24, %v1485_v51  ;;  %v5232_v52 = vcombine.low %v1418_v60, %v1422_v37  ;;  %v1505_v34 = vld [vmem:[#allocation3 + $0x4c0] sm:$0xff]  ;;  %v4500_v60 = vld [vmem:[%s7537_s4 + $0x38] sm:$0xff] }
 0x1ad   :  { %v4498_v24 = vld [vmem:[%s7537_s4 + $0x28] sm:$0xff]  ;;  %v4501_v51 = vld [vmem:[%s7537_s4 + $0x40] sm:$0xff] }
 0x1ae   :  { %v1521_v37 = vld [vmem:[#allocation3 + $0x540] sm:$0xff] }
 0x1af   :  { %4155 = vmatpush1.bf16.msra.mxu0 %v1337_v49  ;;  %1905 = vperm.xlu0 %5658, %v1655_v56   ;;  %v1276_v49 = vmax.f32 %v6371_v46, 0.0  ;;  %v1273_v46 = vmax.f32 %v6357_v5, 0.0  ;;  %v1489_v5 = vld [vmem:[#allocation3 + $0x440] sm:$0xff]  ;;  %v1671_v56 = vld [vmem:[%s7536_s3 + $0x1f0] sm:$0xff] }
 0x1b0   :  { %4156 = vmatprep.subr.bf16.mxu0 %v7554_v2  ;;  %1900 = vperm.xlu1 %5659, %v1654_v15   ;;  %v5303_v25 = vcombine.high %v1489_v5, %v1493_v16  ;;  %v1670_v15 = vld [vmem:[%s7536_s3 + $0x1e8] sm:$0xff] }
 0x1b1   :  { %3402 = vmatmul.mubr.bf16.gmra.mxu1 %v5262_v48  ;;  %3627 = vmatmul.mubr.bf16.gmra.mxu0 %v5200_v59  ;;  %v1346_v48 = vpack.c.bf16 %v1276_v49, %v1275_v1  ;;  %v1274_v59 = vmax.f32 %v6385_v29, 0.0  ;;  %v1426_v29 = vld [vmem:[#allocation3 + $0x248] sm:$0xff]  ;;  %v1525_v1 = vld [vmem:[#allocation3 + $0x560] sm:$0xff] }
 0x1b2   :  { %3409 = vmatprep.mubr.bf16.mxu1 %v5271_v31  ;;  %3634 = vmatprep.mubr.bf16.mxu0 %v5209_v45  ;;  %v1665_v31 = vld [vmem:[%s7536_s3 + $0x1c0] sm:$0xff]  ;;  %v1664_v45 = vld [vmem:[%s7536_s3 + $0x1b8] sm:$0xff]  ;;  %v5241_v43 = vcombine.high %v1426_v29, %v1430_v3  ;;  %v1458_v49 = vld [vmem:[#allocation3 + $0x348] sm:$0xff] }
 0x1b3   :  { %4157 = vmatpush2.bf16.msra.mxu0 %v1352_v58  ;;  %1915 = vperm.xlu0 %5658, %v1657_v6   ;;  %v1345_v19 = vpack.c.bf16 %v1274_v59, %v1273_v46  ;;  %v1667_v58 = vld [vmem:[%s7536_s3 + $0x1d0] sm:$0xff]  ;;  %v1509_v6 = vld [vmem:[#allocation3 + $0x4e0] sm:$0xff] }
 0x1b4   :  { %4158 = vmatprep.subr.bf16.mxu0 %v7554_v2  ;;  %1910 = vperm.xlu1 %5659, %v1656_v38   ;;  %v1442_v38 = vld [vmem:[#allocation3 + $0x2c8] sm:$0xff]  ;;  %v5319_v10 = vcombine.high %v1505_v34, %v1509_v6  ;;  %v4505_v46 = vld [vmem:[%s7537_s4 + $0x60] sm:$0xff] }
 0x1b5   :  { %v5257_v36 = vcombine.high %v1442_v38, %v1446_v41  ;;  %v5256_v61 = vcombine.low %v1442_v38, %v1446_v41  ;;  %v1529_v59 = vld [vmem:[#allocation3 + $0x580] sm:$0xff] }
 0x1b7   :  { %4159 = vmatpush2.bf16.msra.mxu0 %v1351_v42  ;;  %1925 = vperm.xlu0 %5658, %v1659_v27   ;;  %v1438_v42 = vld [vmem:[#allocation3 + $0x2a8] sm:$0xff]  ;;  %v4497_v27 = vld [vmem:[%s7537_s4 + $0x20] sm:$0xff] }
 0x1b8   :  { %4160 = vmatprep.subr.bf16.mxu0 %v7554_v2  ;;  %1920 = vperm.xlu1 %5659, %v1658_v53   ;;  %v5248_v33 = vcombine.low %v1434_v13, %v1438_v42  ;;  %v1454_v53 = vld [vmem:[#allocation3 + $0x328] sm:$0xff] }
 0x1b9   :  { %3410 = vmatmul.mubr.bf16.gmra.mxu1 %v5270_v39  ;;  %3635 = vmatmul.mubr.bf16.gmra.mxu0 %v5208_v44  ;;  %v5302_v39 = vcombine.low %v1489_v5, %v1493_v16  ;;  %v5240_v44 = vcombine.low %v1426_v29, %v1430_v3  ;;  %v1470_v5 = vld [vmem:[#allocation3 + $0x3a8] sm:$0xff]  ;;  %v5334_v29 = vcombine.low %v1521_v37, %v1525_v1 }
 0x1ba   :  { %3417 = vmatprep.mubr.bf16.mxu1 %v5279_v50  ;;  %3642 = vmatprep.mubr.bf16.mxu0 %v5217_v28  ;;  %v5311_v50 = vcombine.high %v1497_v7, %v1501_v54  ;;  %v5249_v28 = vcombine.high %v1434_v13, %v1438_v42  ;;  %v4507_v16 = vld [vmem:[%s7537_s4 + $0x70] sm:$0xff] }
 0x1bb   :  { %4161 = vmatpush2.bf16.msra.mxu0 %v1350_v4  ;;  %1935 = vperm.xlu0 %5658, %v1661_v8   ;;  %v1672_v4 = vld [vmem:[%s7536_s3 + $0x1f8] sm:$0xff]  ;;  %v4511_v7 = vld [vmem:[%s7537_s4 + $0x90] sm:$0xff] }
 0x1bc   :  { %4162 = vmatprep.subr.bf16.mxu0 %v7554_v2  ;;  %1930 = vperm.xlu1 %5659, %v1660_v18  }
 0x1bf   :  { %4163 = vmatpush2.bf16.msra.mxu0 %v1349_v23  ;;  %1945 = vperm.xlu0 %5658, %v1663_v21   ;;  %v4494_v23 = vld [vmem:[%s7537_s4 + $0x8] sm:$0xff]  ;;  %v4503_v21 = vld [vmem:[%s7537_s4 + $0x50] sm:$0xff] }
 0x1c0   :  { %4164 = vmatprep.subr.bf16.mxu0 %v7554_v2  ;;  %1940 = vperm.xlu1 %5659, %v1662_v14   ;;  %v4502_v14 = vld [vmem:[%s7537_s4 + $0x48] sm:$0xff] }
 0x1c1   :  { %3418 = vmatmul.mubr.bf16.gmra.mxu1 %v5278_v11  ;;  %3643 = vmatmul.mubr.bf16.gmra.mxu0 %v5216_v30  ;;  %v4496_v11 = vld [vmem:[%s7537_s4 + $0x18] sm:$0xff]  ;;  %v1513_v30 = vld [vmem:[#allocation3 + $0x500] sm:$0xff] }
 0x1c2   :  { %3425 = vmatprep.mubr.bf16.mxu1 %v5287_v9  ;;  %3650 = vmatprep.mubr.bf16.mxu0 %v5225_v32  ;;  %v1517_v9 = vld [vmem:[#allocation3 + $0x520] sm:$0xff]  ;;  %v1450_v32 = vld [vmem:[#allocation3 + $0x308] sm:$0xff] }
 0x1c3   :  { %4165 = vmatpush2.bf16.msra.mxu0 %v1348_v20  ;;  %1955 = vperm.xlu0 %5658, %v1665_v31   ;;  %v5318_v20 = vcombine.low %v1505_v34, %v1509_v6  ;;  %v5327_v8 = vcombine.high %v1513_v30, %v1517_v9  ;;  %v5265_v18 = vcombine.high %v1450_v32, %v1454_v53  ;;  %v1533_v31 = vld [vmem:[#allocation3 + $0x5a0] sm:$0xff]  ;;  %v1486_v34 = vld [vmem:[#allocation3 + $0x428] sm:$0xff] }
 0x1c4   :  { %4166 = vmatprep.subr.bf16.mxu0 %v7554_v2  ;;  %1950 = vperm.xlu1 %5659, %v1664_v45   ;;  %v1466_v45 = vld [vmem:[#allocation3 + $0x388] sm:$0xff]  ;;  %v5342_v54 = vcombine.low %v1529_v59, %v1533_v31 }
 0x1c5   :  { %v5280_v13 = vcombine.low %v1466_v45, %v1470_v5  ;;  %v4515_v6 = vld [vmem:[%s7537_s4 + $0xb0] sm:$0xff] }
 0x1c7   :  { %4167 = vmatpush2.bf16.msra.mxu0 %v1347_v17  ;;  %1965 = vperm.xlu0 %5658, %v1667_v58   ;;  %v1462_v17 = vld [vmem:[#allocation3 + $0x368] sm:$0xff]  ;;  %v5281_v58 = vcombine.high %v1466_v45, %v1470_v5 }
 0x1c8   :  { %4168 = vmatprep.subr.bf16.mxu0 %v7554_v2  ;;  %1960 = vperm.xlu1 %5659, %v1666_v0   ;;  %v5272_v3 = vcombine.low %v1458_v49, %v1462_v17  ;;  %v1541_v0 = vld [vmem:[#allocation3 + $0x5e0] sm:$0xff] }
 0x1c9   :  { %3426 = vmatmul.mubr.bf16.gmra.mxu1 %v5286_v55  ;;  %3651 = vmatmul.mubr.bf16.gmra.mxu0 %v5224_v62  ;;  %v5326_v55 = vcombine.low %v1513_v30, %v1517_v9  ;;  %v5264_v62 = vcombine.low %v1450_v32, %v1454_v53  ;;  %v1490_v30 = vld [vmem:[#allocation3 + $0x448] sm:$0xff]  ;;  %v6684_v32 = vpop.permute.xlu1 %1685 }
 0x1ca   :  { %3433 = vmatprep.mubr.bf16.mxu1 %v5295_v35  ;;  %3658 = vmatprep.mubr.bf16.mxu0 %v5233_v57  ;;  %v5335_v35 = vcombine.high %v1521_v37, %v1525_v1  ;;  %v5273_v57 = vcombine.high %v1458_v49, %v1462_v17  ;;  %v1494_v9 = vld [vmem:[#allocation3 + $0x468] sm:$0xff]  ;;  %v4520_v37 = vld [vmem:[%s7537_s4 + $0xd8] sm:$0xff]  ;;  %v1561_v1 = vld [vmem:[#allocation3 + $0x680] sm:$0xff] }
 0x1cb   :  { %4169 = vmatpush2.bf16.msra.mxu0 %v1346_v48  ;;  %v4504_v48 = vld [vmem:[%s7537_s4 + $0x58] sm:$0xff]  ;;  %v4522_v5 = vld [vmem:[%s7537_s4 + $0xe8] sm:$0xff] }
 0x1cc   :  { %4170 = vmatprep.subr.bf16.mxu0 %v7554_v2  ;;  %v1669_v2 = vld [vmem:[%s7536_s3 + $0x1e0] sm:$0xff]  ;;  %1970 = vperm.xlu1 %5659, %v1668_v12   ;;  %v1478_v12 = vld [vmem:[#allocation3 + $0x3e8] sm:$0xff] }
 0x1cd   :  { %1975 = vperm.xlu0 %5658, %v1669_v2   ;;  %v1474_v2 = vld [vmem:[#allocation3 + $0x3c8] sm:$0xff]  ;;  %v6702_v49 = vpop.permute.xlu1 %1690 }
 0x1ce   :  { %v5288_v41 = vcombine.low %v1474_v2, %v1478_v12 }
 0x1cf   :  { %4171 = vmatpush2.bf16.msra.mxu0 %v1345_v19  ;;  %v5343_v19 = vcombine.high %v1529_v59, %v1533_v31 }
 0x1d0   :  { %1980 = vperm.xlu1 %5659, %v1670_v15   ;;  %v6668_v15 = vpop.permute.xlu0 %1675 }
 0x1d1   :  { %3434 = vmatmul.mubr.bf16.gmra.mxu1 %v5294_v47  ;;  %3659 = vmatmul.mubr.bf16.gmra.mxu0 %v5232_v52  ;;  %v4506_v47 = vld [vmem:[%s7537_s4 + $0x68] sm:$0xff]  ;;  %v4509_v52 = vld [vmem:[%s7537_s4 + $0x80] sm:$0xff]  ;;  %v6711_v45 = vpop.permute.xlu1 %1700 }
 0x1d2   :  { %3441 = vmatprep.mubr.bf16.mxu1 %v5303_v25  ;;  %3666 = vmatprep.mubr.bf16.mxu0 %v5241_v43  ;;  %v4508_v25 = vld [vmem:[%s7537_s4 + $0x78] sm:$0xff]  ;;  %v1537_v43 = vld [vmem:[#allocation3 + $0x5c0] sm:$0xff] }
 0x1d3   :  { %1985 = vperm.xlu0 %5658, %v1671_v56   ;;  %v5351_v42 = vcombine.high %v1537_v43, %v1541_v0  ;;  %v5289_v56 = vcombine.high %v1474_v2, %v1478_v12  ;;  %v5350_v38 = vcombine.low %v1537_v43, %v1541_v0  ;;  %v1573_v43 = vld [vmem:[#allocation3 + $0x6e0] sm:$0xff]  ;;  %v1506_v0 = vld [vmem:[#allocation3 + $0x4c8] sm:$0xff] }
 0x1d4   :  { %1990 = vperm.xlu1 %5659, %v1672_v4   ;;  %v1482_v4 = vld [vmem:[#allocation3 + $0x408] sm:$0xff] }
 0x1d5   :  { %v1510_v2 = vld [vmem:[#allocation3 + $0x4e8] sm:$0xff] }
 0x1d6   :  { %v4527_v12 = vld [vmem:[%s7537_s4 + $0x110] sm:$0xff] }
 0x1d7   :  { %4559 = vperm.xlu0 %5658, %v4493_v63   ;;  %v1549_v63 = vld [vmem:[#allocation3 + $0x620] sm:$0xff] }
 0x1d8   :  { %4564 = vperm.xlu1 %5659, %v4494_v23   ;;  %v4516_v23 = vld [vmem:[%s7537_s4 + $0xb8] sm:$0xff] }
 0x1d9   :  { %3442 = vmatmul.mubr.bf16.gmra.mxu1 %v5302_v39  ;;  %3667 = vmatmul.mubr.bf16.gmra.mxu0 %v5240_v44  ;;  %v4510_v39 = vld [vmem:[%s7537_s4 + $0x88] sm:$0xff]  ;;  %v4513_v44 = vld [vmem:[%s7537_s4 + $0xa0] sm:$0xff] }
 0x1da   :  { %3449 = vmatprep.mubr.bf16.mxu1 %v5311_v50  ;;  %3674 = vmatprep.mubr.bf16.mxu0 %v5249_v28  ;;  %v4512_v50 = vld [vmem:[%s7537_s4 + $0x98] sm:$0xff]  ;;  %v1545_v28 = vld [vmem:[#allocation3 + $0x600] sm:$0xff] }
 0x1db   :  { %4569 = vperm.xlu0 %5658, %v4495_v26   ;;  %v5359_v26 = vcombine.high %v1545_v28, %v1549_v63 }
 0x1dc   :  { %4574 = vperm.xlu1 %5659, %v4496_v11   ;;  %v1557_v11 = vld [vmem:[#allocation3 + $0x660] sm:$0xff] }
 0x1df   :  { %4579 = vperm.xlu0 %5658, %v4497_v27   ;;  %v1553_v27 = vld [vmem:[#allocation3 + $0x640] sm:$0xff] }
 0x1e0   :  { %4584 = vperm.xlu1 %5659, %v4498_v24   ;;  %v4518_v24 = vld [vmem:[%s7537_s4 + $0xc8] sm:$0xff] }
 0x1e1   :  { %3450 = vmatmul.mubr.bf16.gmra.mxu1 %v5310_v22  ;;  %3675 = vmatmul.mubr.bf16.gmra.mxu0 %v5248_v33  ;;  %v5297_v22 = vcombine.high %v1482_v4, %v1486_v34  ;;  %v4514_v33 = vld [vmem:[%s7537_s4 + $0xa8] sm:$0xff] }
 0x1e2   :  { %3457 = vmatprep.mubr.bf16.mxu1 %v5319_v10  ;;  %3682 = vmatprep.mubr.bf16.mxu0 %v5257_v36  ;;  %v6676_v10 = vpop.permute.xlu0 %1680  ;;  %v4517_v36 = vld [vmem:[%s7537_s4 + $0xc0] sm:$0xff] }
 0x1e3   :  { %4589 = vperm.xlu0 %5658, %v4499_v40   ;;  %v4519_v40 = vld [vmem:[%s7537_s4 + $0xd0] sm:$0xff] }
 0x1e4   :  { %4594 = vperm.xlu1 %5659, %v4500_v60  }
 0x1e6   :  { %v6686_v53 = vpop.permute.xlu0 %1695 }
 0x1e7   :  { %4599 = vperm.xlu0 %5658, %v4501_v51   ;;  %v4521_v51 = vld [vmem:[%s7537_s4 + $0xe0] sm:$0xff] }
 0x1e8   :  { %4604 = vperm.xlu1 %5659, %v4502_v14  }
 0x1e9   :  { %3458 = vmatmul.mubr.bf16.gmra.mxu1 %v5318_v20  ;;  %3683 = vmatmul.mubr.bf16.gmra.mxu0 %v5256_v61  ;;  %v5358_v20 = vcombine.low %v1545_v28, %v1549_v63  ;;  %v5296_v61 = vcombine.low %v1482_v4, %v1486_v34  ;;  %v4529_v63 = vld [vmem:[%s7537_s4 + $0x120] sm:$0xff]  ;;  %v4528_v34 = vld [vmem:[%s7537_s4 + $0x118] sm:$0xff] }
 0x1ea   :  { %3465 = vmatprep.mubr.bf16.mxu1 %v5327_v8  ;;  %3690 = vmatprep.mubr.bf16.mxu0 %v5265_v18  ;;  %v5367_v8 = vcombine.high %v1553_v27, %v1557_v11  ;;  %v5305_v18 = vcombine.high %v1490_v30, %v1494_v9  ;;  %v6704_v17 = vpop.permute.xlu0 %1705 }
 0x1eb   :  { %4609 = vperm.xlu0 %5658, %v4503_v21  }
 0x1ec   :  { %4614 = vperm.xlu1 %5659, %v4504_v48   ;;  %v5304_v48 = vcombine.low %v1490_v30, %v1494_v9 }
 0x1ef   :  { %4619 = vperm.xlu0 %5658, %v4505_v46   ;;  %v5366_v46 = vcombine.low %v1553_v27, %v1557_v11  ;;  %v5320_v11 = vcombine.low %v1506_v0, %v1510_v2 }
 0x1f0   :  { %4624 = vperm.xlu1 %5659, %v4506_v47   ;;  %v1569_v47 = vld [vmem:[#allocation3 + $0x6c0] sm:$0xff] }
 0x1f1   :  { %3466 = vmatmul.mubr.bf16.gmra.mxu1 %v5326_v55  ;;  %3691 = vmatmul.mubr.bf16.gmra.mxu0 %v5264_v62  ;;  %v1565_v55 = vld [vmem:[#allocation3 + $0x6a0] sm:$0xff]  ;;  %v1498_v62 = vld [vmem:[#allocation3 + $0x488] sm:$0xff]  ;;  %v5382_v27 = vcombine.low %v1569_v47, %v1573_v43 }
 0x1f2   :  { %3473 = vmatprep.mubr.bf16.mxu1 %v5335_v35  ;;  %3698 = vmatprep.mubr.bf16.mxu0 %v5273_v57  ;;  %v1502_v35 = vld [vmem:[#allocation3 + $0x4a8] sm:$0xff]  ;;  %v5375_v59 = vcombine.high %v1561_v1, %v1565_v55 }
 0x1f3   :  { %4629 = vperm.xlu0 %5658, %v4507_v16   ;;  %v4523_v57 = vld [vmem:[%s7537_s4 + $0xf0] sm:$0xff]  ;;  %v5313_v31 = vcombine.high %v1498_v62, %v1502_v35 }
 0x1f4   :  { %4634 = vperm.xlu1 %5659, %v4508_v25  }
 0x1f7   :  { %4639 = vperm.xlu0 %5658, %v4509_v52   ;;  %v6726_v52 = vpop.permute.xlu1 %1710 }
 0x1f8   :  { %4644 = vperm.xlu1 %5659, %v4510_v39  }
 0x1f9   :  { %3474 = vmatmul.mubr.bf16.gmra.mxu1 %v5334_v29  ;;  %3699 = vmatmul.mubr.bf16.gmra.mxu0 %v5272_v3  ;;  %v6716_v29 = vpop.permute.xlu0 %1715  ;;  %v4525_v3 = vld [vmem:[%s7537_s4 + $0x100] sm:$0xff] }
 0x1fa   :  { %3481 = vmatprep.mubr.bf16.mxu1 %v5343_v19  ;;  %3706 = vmatprep.mubr.bf16.mxu0 %v5281_v58  ;;  %v4524_v58 = vld [vmem:[%s7537_s4 + $0xf8] sm:$0xff] }
 0x1fb   :  { %4649 = vperm.xlu0 %5658, %v4511_v7   ;;  %v6738_v28 = vpop.permute.xlu1 %1720 }
 0x1fc   :  { %4654 = vperm.xlu1 %5659, %v4512_v50  }
 0x1fd   :  { %v6733_v39 = vpop.permute.xlu0 %1725 }
 0x1ff   :  { %4659 = vperm.xlu0 %5658, %v4513_v44   ;;  %v4526_v44 = vld [vmem:[%s7537_s4 + $0x108] sm:$0xff] }
 0x200   :  { %4664 = vperm.xlu1 %5659, %v4514_v33  }
 0x201   :  { %3482 = vmatmul.mubr.bf16.gmra.mxu1 %v5342_v54  ;;  %3707 = vmatmul.mubr.bf16.gmra.mxu0 %v5280_v13  ;;  %v5374_v54 = vcombine.low %v1561_v1, %v1565_v55  ;;  %v5312_v13 = vcombine.low %v1498_v62, %v1502_v35  ;;  %v6748_v33 = vpop.permute.xlu0 %1735  ;;  %v1522_v55 = vld [vmem:[#allocation3 + $0x548] sm:$0xff] }
 0x202   :  { %3489 = vmatprep.mubr.bf16.mxu1 %v5351_v42  ;;  %3714 = vmatprep.mubr.bf16.mxu0 %v5289_v56  ;;  %v5383_v42 = vcombine.high %v1569_v47, %v1573_v43  ;;  %v5321_v56 = vcombine.high %v1506_v0, %v1510_v2  ;;  %v1526_v62 = vld [vmem:[#allocation3 + $0x568] sm:$0xff]  ;;  %v4537_v47 = vld [vmem:[%s7537_s4 + $0x160] sm:$0xff]  ;;  %v4536_v43 = vld [vmem:[%s7537_s4 + $0x158] sm:$0xff] }
 0x203   :  { %4669 = vperm.xlu0 %5658, %v4515_v6   ;;  %v1577_v6 = vld [vmem:[#allocation3 + $0x700] sm:$0xff] }
 0x204   :  { %4674 = vperm.xlu1 %5659, %v4516_v23   ;;  %v1593_v0 = vld [vmem:[#allocation3 + $0x780] sm:$0xff] }
 0x207   :  { %4679 = vperm.xlu0 %5658, %v4517_v36   ;;  %v4531_v36 = vld [vmem:[%s7537_s4 + $0x130] sm:$0xff] }
 0x208   :  { %4684 = vperm.xlu1 %5659, %v4518_v24   ;;  %v4532_v24 = vld [vmem:[%s7537_s4 + $0x138] sm:$0xff] }
 0x209   :  { %3490 = vmatmul.mubr.bf16.gmra.mxu1 %v5350_v38  ;;  %3715 = vmatmul.mubr.bf16.gmra.mxu0 %v5288_v41  ;;  %v1581_v41 = vld [vmem:[#allocation3 + $0x720] sm:$0xff] }
 0x20a   :  { %3497 = vmatprep.mubr.bf16.mxu1 %v5359_v26  ;;  %3722 = vmatprep.mubr.bf16.mxu0 %v5297_v22  ;;  %v1514_v26 = vld [vmem:[#allocation3 + $0x508] sm:$0xff]  ;;  %v5391_v30 = vcombine.high %v1577_v6, %v1581_v41 }
 0x20b   :  { %4689 = vperm.xlu0 %5658, %v4519_v40   ;;  %v1518_v22 = vld [vmem:[#allocation3 + $0x528] sm:$0xff]  ;;  %v6755_v40 = vpop.permute.xlu1 %1730 }
 0x20c   :  { %4694 = vperm.xlu1 %5659, %v4520_v37   ;;  %v5329_v9 = vcombine.high %v1514_v26, %v1518_v22  ;;  %v6768_v37 = vpop.permute.xlu0 %1745 }
 0x20f   :  { %4699 = vperm.xlu0 %5658, %v4521_v51   ;;  %v1585_v51 = vld [vmem:[#allocation3 + $0x740] sm:$0xff]  ;;  %v6770_v35 = vpop.permute.xlu1 %1740 }
 0x210   :  { %4704 = vperm.xlu1 %5659, %v4522_v5   ;;  %v5337_v5 = vcombine.high %v1522_v55, %v1526_v62 }
 0x211   :  { %v6697_v60 = vpop.f32.mrf.mxu1  ;;  %3498 = vmatmul.mubr.bf16.gmra.mxu1 %v5358_v20  ;;  %3723 = vmatmul.mubr.bf16.gmra.mxu0 %v5296_v61  ;;  %v4530_v20 = vld [vmem:[%s7537_s4 + $0x128] sm:$0xff] }
 0x212   :  { %3505 = vmatprep.mubr.bf16.mxu1 %v5367_v8  ;;  %3730 = vmatprep.mubr.bf16.mxu0 %v5305_v18  ;;  %v4533_v8 = vld [vmem:[%s7537_s4 + $0x140] sm:$0xff] }
 0x213   :  { %v3309_v21 = vpop.f32.mrf.mxu1  ;;  %4709 = vperm.xlu0 %5658, %v4523_v57   ;;  %v4535_v57 = vld [vmem:[%s7537_s4 + $0x150] sm:$0xff]  ;;  %v6790_v2 = vpop.permute.xlu1 %1750 }
 0x214   :  { %4714 = vperm.xlu1 %5659, %v4524_v58   ;;  %v1589_v21 = vld [vmem:[#allocation3 + $0x760] sm:$0xff]  ;;  %v6780_v58 = vpop.permute.xlu0 %1755 }
 0x215   :  { %v6709_v14 = vpop.f32.mrf.mxu1 }
 0x217   :  { %v3312_v16 = vpop.f32.mrf.mxu1  ;;  %4719 = vperm.xlu0 %5658, %v4525_v3  }
 0x218   :  { %4724 = vperm.xlu1 %5659, %v4526_v44   ;;  %v4534_v16 = vld [vmem:[%s7537_s4 + $0x148] sm:$0xff] }
 0x219   :  { %v6721_v19 = vpop.f32.mrf.mxu1  ;;  %3506 = vmatmul.mubr.bf16.gmra.mxu1 %v5366_v46  ;;  %3731 = vmatmul.mubr.bf16.gmra.mxu0 %v5304_v48  ;;  %v5390_v48 = vcombine.low %v1577_v6, %v1581_v41  ;;  %v4538_v41 = vld [vmem:[%s7537_s4 + $0x168] sm:$0xff] }
 0x21a   :  { %3513 = vmatprep.mubr.bf16.mxu1 %v5375_v59  ;;  %3738 = vmatprep.mubr.bf16.mxu0 %v5313_v31  ;;  %v5328_v59 = vcombine.low %v1514_v26, %v1518_v22  ;;  %v5399_v31 = vcombine.high %v1585_v51, %v1589_v21  ;;  %v6802_v22 = vpop.permute.xlu1 %1760 }
 0x21b   :  { %v3317_v25 = vpop.f32.mrf.mxu1  ;;  %4729 = vperm.xlu0 %5658, %v4527_v12  }
 0x21c   :  { %4734 = vperm.xlu1 %5659, %v4528_v34  }
 0x21d   :  { %v6731_v7 = vpop.f32.mrf.mxu1 }
 0x21f   :  { %v3320_v50 = vpop.f32.mrf.mxu1  ;;  %4739 = vperm.xlu0 %5658, %v4529_v63   ;;  %v5336_v63 = vcombine.low %v1522_v55, %v1526_v62 }
 0x220   :  { %4744 = vperm.xlu1 %5659, %v4530_v20   ;;  %v5398_v50 = vcombine.low %v1585_v51, %v1589_v21  ;;  %v1605_v20 = vld [vmem:[#allocation3 + $0x7e0] sm:$0xff]  ;;  %v4543_v51 = vld [vmem:[%s7537_s4 + $0x190] sm:$0xff] }
 0x221   :  { %v6743_v4 = vpop.f32.mrf.mxu1  ;;  %3514 = vmatmul.mubr.bf16.gmra.mxu1 %v5374_v54  ;;  %3739 = vmatmul.mubr.bf16.gmra.mxu0 %v5312_v13  ;;  %v1597_v54 = vld [vmem:[#allocation3 + $0x7a0] sm:$0xff]  ;;  %v1530_v13 = vld [vmem:[#allocation3 + $0x588] sm:$0xff] }
 0x222   :  { %3521 = vmatprep.mubr.bf16.mxu1 %v5383_v42  ;;  %3746 = vmatprep.mubr.bf16.mxu0 %v5321_v56  ;;  %v1534_v42 = vld [vmem:[#allocation3 + $0x5a8] sm:$0xff]  ;;  %v5407_v34 = vcombine.high %v1593_v0, %v1597_v54  ;;  %v5406_v21 = vcombine.low %v1593_v0, %v1597_v54  ;;  %v1355_v54 = vld [vmem:[#allocation3 + $0x10] sm:$0xff] }
 0x223   :  { %v3325_v38 = vpop.f32.mrf.mxu1  ;;  %4749 = vperm.xlu0 %5658, %v4531_v36   ;;  %v4539_v56 = vld [vmem:[%s7537_s4 + $0x170] sm:$0xff]  ;;  %v5345_v6 = vcombine.high %v1530_v13, %v1534_v42  ;;  %v4541_v36 = vld [vmem:[%s7537_s4 + $0x180] sm:$0xff]  ;;  %v5344_v55 = vcombine.low %v1530_v13, %v1534_v42 }
 0x224   :  { %4754 = vperm.xlu1 %5659, %v4532_v24   ;;  %v6797_v38 = vpop.permute.xlu0 %1765  ;;  %v1359_v13 = vld [vmem:[#allocation3 + $0x30] sm:$0xff] }
 0x225   :  { %v6753_v23 = vpop.f32.mrf.mxu1 }
 0x227   :  { %v3328_v61 = vpop.f32.mrf.mxu1  ;;  %4759 = vperm.xlu0 %5658, %v4533_v8   ;;  %v1542_v8 = vld [vmem:[#allocation3 + $0x5e8] sm:$0xff] }
 0x228   :  { %4764 = vperm.xlu1 %5659, %v4534_v16   ;;  %v1538_v61 = vld [vmem:[#allocation3 + $0x5c8] sm:$0xff]  ;;  %v6812_v24 = vpop.permute.xlu0 %1775 }
 0x229   :  { %v6763_v18 = vpop.f32.mrf.mxu1  ;;  %3522 = vmatmul.mubr.bf16.gmra.mxu1 %v5382_v27  ;;  %3747 = vmatmul.mubr.bf16.gmra.mxu0 %v5320_v11  ;;  %v4540_v11 = vld [vmem:[%s7537_s4 + $0x178] sm:$0xff] }
 0x22a   :  { %3529 = vmatprep.mubr.bf16.mxu1 %v5391_v30  ;;  %3754 = vmatprep.mubr.bf16.mxu0 %v5329_v9  ;;  %v1601_v30 = vld [vmem:[#allocation3 + $0x7c0] sm:$0xff] }
 0x22b   :  { %v3333_v1 = vpop.f32.mrf.mxu1  ;;  %4769 = vperm.xlu0 %5658, %v4535_v57   ;;  %v5415_v62 = vcombine.high %v1601_v30, %v1605_v20  ;;  %v5353_v57 = vcombine.high %v1538_v61, %v1542_v8 }
 0x22c   :  { %4774 = vperm.xlu1 %5659, %v4536_v43   ;;  %v6832_v43 = vpop.permute.xlu0 %1785 }
 0x22d   :  { %v6775_v46 = vpop.f32.mrf.mxu1 }
 0x22f   :  { %v3336_v3 = vpop.f32.mrf.mxu1  ;;  %4779 = vperm.xlu0 %5658, %v4537_v47   ;;  %v1546_v47 = vld [vmem:[#allocation3 + $0x608] sm:$0xff] }
 0x230   :  { %4784 = vperm.xlu1 %5659, %v4538_v41   ;;  %v4544_v3 = vld [vmem:[%s7537_s4 + $0x198] sm:$0xff]  ;;  %v5171_v41 = vcombine.high %v1355_v54, %v1359_v13 }
 0x231   :  { %v6785_v25 = vpop.f32.mrf.mxu1  ;;  %3530 = vmatmul.mubr.bf16.gmra.mxu1 %v5390_v48  ;;  %3755 = vmatmul.mubr.bf16.gmra.mxu0 %v5328_v59  ;;  %v6819_v48 = vpop.permute.xlu1 %1770  ;;  %v4542_v59 = vld [vmem:[%s7537_s4 + $0x188] sm:$0xff] }
 0x232   :  { %3537 = vmatprep.mubr.bf16.mxu1 %v5399_v31  ;;  %3762 = vmatprep.mubr.bf16.mxu0 %v5337_v5  ;;  %v4545_v5 = vld [vmem:[%s7537_s4 + $0x1a0] sm:$0xff] }
 0x233   :  { %v3341_v12 = vpop.f32.mrf.mxu1  ;;  %4789 = vperm.xlu0 %5658, %v4539_v56   ;;  %v4547_v56 = vld [vmem:[%s7537_s4 + $0x1b0] sm:$0xff] }
 0x234   :  { %4794 = vperm.xlu1 %5659, %v4540_v11   ;;  %v1550_v12 = vld [vmem:[#allocation3 + $0x628] sm:$0xff]  ;;  %v6844_v11 = vpop.permute.xlu0 %1795 }
 0x235   :  { %v6795_v44 = vpop.f32.mrf.mxu1  ;;  %v6834_v42 = vpop.permute.xlu1 %1780 }
 0x237   :  { %v3344_v26 = vpop.f32.mrf.mxu1  ;;  %4799 = vperm.xlu0 %5658, %v4541_v36  }
 0x238   :  { %4804 = vperm.xlu1 %5659, %v4542_v59   ;;  %v4546_v26 = vld [vmem:[%s7537_s4 + $0x1a8] sm:$0xff] }
 0x239   :  { %v6807_v27 = vpop.f32.mrf.mxu1  ;;  %3538 = vmatmul.mubr.bf16.gmra.mxu1 %v5398_v50  ;;  %3763 = vmatmul.mubr.bf16.gmra.mxu0 %v5336_v63  ;;  %v5414_v63 = vcombine.low %v1601_v30, %v1605_v20  ;;  %v4548_v30 = vld [vmem:[%s7537_s4 + $0x1b8] sm:$0xff]  ;;  %v1554_v20 = vld [vmem:[#allocation3 + $0x648] sm:$0xff] }
 0x23a   :  { %3545 = vmatprep.mubr.bf16.mxu1 %v5407_v34  ;;  %3770 = vmatprep.mubr.bf16.mxu0 %v5345_v6  ;;  %v5352_v34 = vcombine.low %v1538_v61, %v1542_v8  ;;  %v5361_v6 = vcombine.high %v1546_v47, %v1550_v12  ;;  %v6854_v61 = vpop.permute.xlu1 %1790 }
 0x23b   :  { %v3349_v9 = vpop.f32.mrf.mxu1  ;;  %4809 = vperm.xlu0 %5658, %v4543_v51  }
 0x23c   :  { %4814 = vperm.xlu1 %5659, %v4544_v3   ;;  %v4549_v9 = vld [vmem:[%s7537_s4 + $0x1c0] sm:$0xff] }
 0x23d   :  { %v6817_v1 = vpop.f32.mrf.mxu1 }
 0x23f   :  { %v3352_v31 = vpop.f32.mrf.mxu1  ;;  %4819 = vperm.xlu0 %5658, %v4545_v5   ;;  %v5170_v5 = vcombine.low %v1355_v54, %v1359_v13 }
 0x240   :  { %4824 = vperm.xlu1 %5659, %v4546_v26   ;;  %v5360_v31 = vcombine.low %v1546_v47, %v1550_v12  ;;  %v4553_v47 = vld [vmem:[%s7537_s4 + $0x1e0] sm:$0xff] }
 0x241   :  { %v6827_v16 = vpop.f32.mrf.mxu1  ;;  %3546 = vmatmul.mubr.bf16.gmra.mxu1 %v5406_v21  ;;  %3771 = vmatmul.mubr.bf16.gmra.mxu0 %v5344_v55  ;;  %v1558_v21 = vld [vmem:[#allocation3 + $0x668] sm:$0xff]  ;;  %v1363_v55 = vld [vmem:[#allocation3 + $0x50] sm:$0xff] }
 0x242   :  { %3553 = vmatprep.mubr.bf16.mxu1 %v5415_v62  ;;  %3778 = vmatprep.mubr.bf16.mxu0 %v5353_v57  ;;  %v1367_v62 = vld [vmem:[#allocation3 + $0x70] sm:$0xff]  ;;  %v5369_v3 = vcombine.high %v1554_v20, %v1558_v21 }
 0x243   :  { %v3357_v0 = vpop.f32.mrf.mxu1  ;;  %4829 = vperm.xlu0 %5658, %v4547_v56   ;;  %v4551_v57 = vld [vmem:[%s7537_s4 + $0x1d0] sm:$0xff]  ;;  %v3308_v56 = vadd.f32 %v6697_v60, %v6668_v15  ;;  %v4552_v15 = vld [vmem:[%s7537_s4 + $0x1d8] sm:$0xff] }
 0x244   :  { %4834 = vperm.xlu1 %5659, %v4548_v30   ;;  %v5179_v0 = vcombine.high %v1363_v55, %v1367_v62  ;;  %v1562_v60 = vld [vmem:[#allocation3 + $0x688] sm:$0xff]  ;;  %v1371_v30 = vld [vmem:[#allocation3 + $0x90] sm:$0xff] }
 0x245   :  { %v6839_v50 = vpop.f32.mrf.mxu1 }
 0x247   :  { %v3360_v36 = vpop.f32.mrf.mxu1  ;;  %4839 = vperm.xlu0 %5658, %v4549_v9   ;;  %v1566_v9 = vld [vmem:[#allocation3 + $0x6a8] sm:$0xff] }
 0x249   :  { %v6849_v51 = vpop.f32.mrf.mxu1  ;;  %3554 = vmatmul.mubr.bf16.gmra.mxu1 %v5414_v63  ;;  %3779 = vmatmul.mubr.bf16.gmra.mxu0 %v5352_v34  ;;  %v6863_v63 = vpop.permute.xlu0 %1805  ;;  %v4550_v34 = vld [vmem:[%s7537_s4 + $0x1c8] sm:$0xff] }
 0x24a   :  { %3786 = vmatprep.mubr.bf16.mxu0 %v5361_v6  ;;  %3883 = vmatprep.mubr.bf16.mxu1 %v5171_v41  ;;  %v6868_v41 = vpop.permute.xlu1 %1800 }
 0x24b   :  { %v3365_v8 = vpop.f32.mrf.mxu1  ;;  %4849 = vperm.xlu0 %5658, %v4551_v57   ;;  %4844 = vperm.xlu1 %5659, %v4550_v34   ;;  %v3311_v57 = vadd.f32 %v6709_v14, %v6676_v10  ;;  %v5178_v34 = vcombine.low %v1363_v55, %v1367_v62  ;;  %v4554_v14 = vld [vmem:[%s7537_s4 + $0x1e8] sm:$0xff] }
 0x24c   :  { %v1375_v8 = vld [vmem:[#allocation3 + $0xb0] sm:$0xff] }
 0x24d   :  { %v6859_v59 = vpop.f32.mrf.mxu1 }
 0x24f   :  { %v3368_v6 = vpop.f32.mrf.mxu1  ;;  %4859 = vperm.xlu0 %5658, %v4553_v47   ;;  %4854 = vperm.xlu1 %5659, %v4552_v15   ;;  %v3316_v47 = vadd.f32 %v6721_v19, %v6684_v32  ;;  %v4556_v32 = vld [vmem:[%s7537_s4 + $0x1f8] sm:$0xff]  ;;  %v1570_v19 = vld [vmem:[#allocation3 + $0x6c8] sm:$0xff] }
 0x250   :  { %v5377_v6 = vcombine.high %v1562_v60, %v1566_v9 }
 0x251   :  { %v6873_v12 = vpop.f32.mrf.mxu1  ;;  %v3596_v54 = vpop.f32.mrf.mxu0  ;;  %3787 = vmatmul.mubr.bf16.gmra.mxu0 %v5360_v31  ;;  %3884 = vmatmul.mubr.bf16.vlgmr.msra.gmra.mxu1 %v5170_v5  ;;  %v4555_v5 = vld [vmem:[%s7537_s4 + $0x1f0] sm:$0xff] }
 0x252   :  { %3794 = vmatprep.mubr.bf16.mxu0 %v5369_v3  ;;  %3891 = vmatprep.mubr.bf16.mxu1 %v5179_v0  ;;  %v6878_v13 = vadd.f32 %v3596_v54, %v3308_v56  ;;  %v6882_v31 = vpop.permute.xlu0 %1815  ;;  %v5368_v56 = vcombine.low %v1554_v20, %v1558_v21  ;;  %v5187_v54 = vcombine.high %v1371_v30, %v1375_v8 }
 0x253   :  { %v3373_v26 = vpop.f32.mrf.mxu1  ;;  %v3598_v36 = vpop.f32.mrf.mxu0  ;;  %4869 = vperm.xlu0 %5658, %v4555_v5  }
 0x254   :  { %7567 = vst [vmem:[#allocation8_spill] sm:$0xff] %v6878_v13  ;;  %v6891_v26 = vpop.permute.xlu1 %1810  ;;  %4864 = vperm.xlu1 %5659, %v4554_v14   ;;  %v5075_v13 = vld [vmem:[#allocation2] sm:$0x1]  ;;  %v1379_v14 = vld [vmem:[#allocation3 + $0xd0] sm:$0xff] }
 0x255   :  { %v6887_v3 = vpop.f32.mrf.mxu1  ;;  %v3599_v0 = vpop.f32.mrf.mxu0 }
 0x256   :  { %v6893_v10 = vadd.f32 %v3599_v0, %v3311_v57  ;;  %v6903_v55 = vpop.permute.xlu0 %1825  ;;  %v1574_v0 = vld [vmem:[#allocation3 + $0x6e8] sm:$0xff] }
 0x257   :  { %v3376_v15 = vpop.f32.mrf.mxu1  ;;  %v3601_v36 = vpop.f32.mrf.mxu0  ;;  %7569 = vst [vmem:[#allocation7_spill] sm:$0xff] %v6903_v55  ;;  %5078 = vperm.xlu0 %5658, %v5075_v13   ;;  %v5385_v55 = vcombine.high %v1570_v19, %v1574_v0 }
 0x258   :  { %7568 = vst [vmem:[#allocation6_spill] sm:$0xff] %v6893_v10  ;;  %v1383_v15 = vld [vmem:[#allocation3 + $0xf0] sm:$0xff]  ;;  %v5186_v10 = vcombine.low %v1371_v30, %v1375_v8  ;;  %v1582_v30 = vld [vmem:[#allocation3 + $0x728] sm:$0xff] }
 0x259   :  { %v6898_v20 = vpop.f32.mrf.mxu1  ;;  %v3604_v21 = vpop.f32.mrf.mxu0  ;;  %3795 = vmatmul.mubr.bf16.gmra.mxu0 %v5368_v56  ;;  %3892 = vmatmul.mubr.bf16.gmra.mxu1 %v5178_v34  ;;  %v3319_v56 = vadd.f32 %v6731_v7, %v6702_v49  ;;  %v1578_v7 = vld [vmem:[#allocation3 + $0x708] sm:$0xff]  ;;  %v1387_v8 = vld [vmem:[#allocation3 + $0x110] sm:$0xff] }
 0x25a   :  { %3802 = vmatprep.mubr.bf16.mxu0 %v5377_v6  ;;  %3899 = vmatprep.mubr.bf16.mxu1 %v5187_v54  ;;  %v6905_v62 = vadd.f32 %v3604_v21, %v3316_v47  ;;  %v6909_v34 = vpop.permute.xlu1 %1820  ;;  %v5376_v54 = vcombine.low %v1562_v60, %v1566_v9  ;;  %v5195_v47 = vcombine.high %v1379_v14, %v1383_v15 }
 0x25b   :  { %v3381_v57 = vpop.f32.mrf.mxu1  ;;  %v3606_v5 = vpop.f32.mrf.mxu0  ;;  %7571 = vst [vmem:[#allocation15_spill] sm:$0xff] %v6909_v34  ;;  %4874 = vperm.xlu1 %5659, %v4556_v32   ;;  %v3324_v21 = vadd.f32 %v6743_v4, %v6686_v53  ;;  %v1391_v34 = vld [vmem:[#allocation3 + $0x130] sm:$0xff]  ;;  %v3327_v53 = vadd.f32 %v6753_v23, %v6711_v45  ;;  %v1586_v45 = vld [vmem:[#allocation3 + $0x748] sm:$0xff] }
 0x25c   :  { %7570 = vst [vmem:[#allocation13_spill] sm:$0xff] %v6905_v62 }
 0x25d   :  { %v6911_v36 = vpop.f32.mrf.mxu1  ;;  %v3607_v6 = vpop.f32.mrf.mxu0 }
 0x25e   :  { %v6915_v57 = vadd.f32 %v3607_v6, %v3319_v56  ;;  %v5384_v6 = vcombine.low %v1570_v19, %v1574_v0 }
 0x25f   :  { %v3384_v5 = vpop.f32.mrf.mxu1  ;;  %v3609_v13 = vpop.f32.mrf.mxu0 }
 0x260   :  { %v5194_v5 = vcombine.low %v1379_v14, %v1383_v15  ;;  %v1590_v14 = vld [vmem:[#allocation3 + $0x768] sm:$0xff]  ;;  %v1395_v15 = vld [vmem:[#allocation3 + $0x150] sm:$0xff] }
 0x261   :  { %v6917_v62 = vpop.f32.mrf.mxu1  ;;  %v3612_v49 = vpop.f32.mrf.mxu0  ;;  %3803 = vmatmul.mubr.bf16.gmra.mxu0 %v5376_v54  ;;  %3900 = vmatmul.mubr.bf16.gmra.mxu1 %v5186_v10  ;;  %v5393_v54 = vcombine.high %v1578_v7, %v1582_v30  ;;  %v5203_v10 = vcombine.high %v1387_v8, %v1391_v34 }
 0x262   :  { %3810 = vmatprep.mubr.bf16.mxu0 %v5385_v55  ;;  %3907 = vmatprep.mubr.bf16.mxu1 %v5195_v47  ;;  %v6919_v32 = vadd.f32 %v3612_v49, %v3324_v21  ;;  %v3332_v55 = vadd.f32 %v6763_v18, %v6704_v17  ;;  %v3335_v17 = vadd.f32 %v6775_v46, %v6726_v52  ;;  %v1594_v52 = vld [vmem:[#allocation3 + $0x788] sm:$0xff] }
 0x263   :  { %v3389_v60 = vpop.f32.mrf.mxu1  ;;  %v3614_v9 = vpop.f32.mrf.mxu0 }
 0x264   :  { %v1399_v9 = vld [vmem:[#allocation3 + $0x170] sm:$0xff] }
 0x265   :  { %v6923_v4 = vpop.f32.mrf.mxu1  ;;  %v3615_v56 = vpop.f32.mrf.mxu0 }
 0x266   :  { %v6927_v47 = vadd.f32 %v3615_v56, %v3327_v53  ;;  %v5392_v56 = vcombine.low %v1578_v7, %v1582_v30  ;;  %v1598_v30 = vld [vmem:[#allocation3 + $0x7a8] sm:$0xff] }
 0x267   :  { %v3392_v21 = vpop.f32.mrf.mxu1  ;;  %v3617_v13 = vpop.f32.mrf.mxu0 }
 0x268   :  { %v5202_v21 = vcombine.low %v1387_v8, %v1391_v34  ;;  %v1403_v8 = vld [vmem:[#allocation3 + $0x190] sm:$0xff] }
 0x269   :  { %v6929_v49 = vpop.f32.mrf.mxu1  ;;  %v3620_v60 = vpop.f32.mrf.mxu0  ;;  %3811 = vmatmul.mubr.bf16.gmra.mxu0 %v5384_v6  ;;  %3908 = vmatmul.mubr.bf16.gmra.mxu1 %v5194_v5  ;;  %v5401_v6 = vcombine.high %v1586_v45, %v1590_v14  ;;  %v5211_v5 = vcombine.high %v1395_v15, %v1399_v9 }
 0x26a   :  { %3818 = vmatprep.mubr.bf16.mxu0 %v5393_v54  ;;  %3915 = vmatprep.mubr.bf16.mxu1 %v5203_v10  ;;  %v6931_v23 = vadd.f32 %v3620_v60, %v3332_v55  ;;  %v3340_v54 = vadd.f32 %v6785_v25, %v6716_v29  ;;  %v3343_v29 = vadd.f32 %v6795_v44, %v6738_v28  ;;  %v1602_v28 = vld [vmem:[#allocation3 + $0x7c8] sm:$0xff] }
 0x26b   :  { %v3397_v19 = vpop.f32.mrf.mxu1  ;;  %v3622_v0 = vpop.f32.mrf.mxu0 }
 0x26c   :  { %v1407_v0 = vld [vmem:[#allocation3 + $0x1b0] sm:$0xff] }
 0x26d   :  { %v6935_v18 = vpop.f32.mrf.mxu1  ;;  %v3623_v53 = vpop.f32.mrf.mxu0 }
 0x26e   :  { %v6939_v10 = vadd.f32 %v3623_v53, %v3335_v17  ;;  %v5400_v53 = vcombine.low %v1586_v45, %v1590_v14 }
 0x26f   :  { %v3400_v55 = vpop.f32.mrf.mxu1  ;;  %v3625_v13 = vpop.f32.mrf.mxu0 }
 0x270   :  { %v5210_v55 = vcombine.low %v1395_v15, %v1399_v9  ;;  %v1606_v15 = vld [vmem:[#allocation3 + $0x7e8] sm:$0xff]  ;;  %v1411_v9 = vld [vmem:[#allocation3 + $0x1d0] sm:$0xff] }
 0x271   :  { %v6941_v60 = vpop.f32.mrf.mxu1  ;;  %v3628_v19 = vpop.f32.mrf.mxu0  ;;  %3819 = vmatmul.mubr.bf16.gmra.mxu0 %v5392_v56  ;;  %3916 = vmatmul.mubr.bf16.gmra.mxu1 %v5202_v21  ;;  %v5409_v56 = vcombine.high %v1594_v52, %v1598_v30  ;;  %v5219_v21 = vcombine.high %v1403_v8, %v1407_v0 }
 0x272   :  { %3826 = vmatprep.mubr.bf16.mxu0 %v5401_v6  ;;  %3923 = vmatprep.mubr.bf16.mxu1 %v5211_v5  ;;  %v6943_v46 = vadd.f32 %v3628_v19, %v3340_v54  ;;  %v3348_v6 = vadd.f32 %v6807_v27, %v6733_v39  ;;  %v3351_v39 = vadd.f32 %v6817_v1, %v6755_v40  ;;  %v1419_v40 = vld [vmem:[#allocation3 + $0x210] sm:$0xff] }
 0x273   :  { %v3405_v34 = vpop.f32.mrf.mxu1  ;;  %v3630_v7 = vpop.f32.mrf.mxu0 }
 0x274   :  { %v1415_v7 = vld [vmem:[#allocation3 + $0x1f0] sm:$0xff] }
 0x275   :  { %v6947_v25 = vpop.f32.mrf.mxu1  ;;  %v3631_v17 = vpop.f32.mrf.mxu0 }
 0x276   :  { %v6951_v5 = vadd.f32 %v3631_v17, %v3343_v29  ;;  %v5408_v17 = vcombine.low %v1594_v52, %v1598_v30 }
 0x277   :  { %v3408_v54 = vpop.f32.mrf.mxu1  ;;  %v3633_v13 = vpop.f32.mrf.mxu0 }
 0x278   :  { %v5218_v54 = vcombine.low %v1403_v8, %v1407_v0  ;;  %v1423_v8 = vld [vmem:[#allocation3 + $0x230] sm:$0xff]  ;;  %v1356_v0 = vld [vmem:[#allocation3 + $0x18] sm:$0xff] }
 0x279   :  { %v6953_v19 = vpop.f32.mrf.mxu1  ;;  %v3636_v34 = vpop.f32.mrf.mxu0  ;;  %3827 = vmatmul.mubr.bf16.gmra.mxu0 %v5400_v53  ;;  %3924 = vmatmul.mubr.bf16.gmra.mxu1 %v5210_v55  ;;  %v5417_v53 = vcombine.high %v1602_v28, %v1606_v15  ;;  %v5227_v55 = vcombine.high %v1411_v9, %v1415_v7 }
 0x27a   :  { %3834 = vmatprep.mubr.bf16.mxu0 %v5409_v56  ;;  %3931 = vmatprep.mubr.bf16.mxu1 %v5219_v21  ;;  %v6955_v44 = vadd.f32 %v3636_v34, %v3348_v6  ;;  %v3356_v56 = vadd.f32 %v6827_v16, %v6748_v33  ;;  %v3359_v33 = vadd.f32 %v6839_v50, %v6770_v35  ;;  %v1427_v35 = vld [vmem:[#allocation3 + $0x250] sm:$0xff] }
 0x27b   :  { %v3413_v45 = vpop.f32.mrf.mxu1  ;;  %v3638_v14 = vpop.f32.mrf.mxu0 }
 0x27c   :  { %v1360_v14 = vld [vmem:[#allocation3 + $0x38] sm:$0xff] }
 0x27d   :  { %v6959_v27 = vpop.f32.mrf.mxu1  ;;  %v3639_v29 = vpop.f32.mrf.mxu0 }
 0x27e   :  { %v6963_v21 = vadd.f32 %v3639_v29, %v3351_v39  ;;  %v5416_v29 = vcombine.low %v1602_v28, %v1606_v15 }
 0x27f   :  { %v3416_v6 = vpop.f32.mrf.mxu1  ;;  %v3641_v13 = vpop.f32.mrf.mxu0 }
 0x280   :  { %v5226_v6 = vcombine.low %v1411_v9, %v1415_v7  ;;  %v1431_v9 = vld [vmem:[#allocation3 + $0x270] sm:$0xff]  ;;  %v1364_v7 = vld [vmem:[#allocation3 + $0x58] sm:$0xff] }
 0x281   :  { %v6965_v34 = vpop.f32.mrf.mxu1  ;;  %v3644_v45 = vpop.f32.mrf.mxu0  ;;  %3835 = vmatmul.mubr.bf16.gmra.mxu0 %v5408_v17  ;;  %3932 = vmatmul.mubr.bf16.gmra.mxu1 %v5218_v54  ;;  %v5235_v17 = vcombine.high %v1419_v40, %v1423_v8  ;;  %v5173_v54 = vcombine.high %v1356_v0, %v1360_v14 }
 0x282   :  { %3842 = vmatprep.mubr.bf16.mxu0 %v5417_v53  ;;  %3939 = vmatprep.mubr.bf16.mxu1 %v5227_v55  ;;  %v6967_v1 = vadd.f32 %v3644_v45, %v3356_v56  ;;  %v3364_v53 = vadd.f32 %v6849_v51, %v6768_v37  ;;  %v3367_v37 = vadd.f32 %v6859_v59, %v6790_v2  ;;  %v1435_v2 = vld [vmem:[#allocation3 + $0x290] sm:$0xff] }
 0x283   :  { %v3421_v52 = vpop.f32.mrf.mxu1  ;;  %v3646_v30 = vpop.f32.mrf.mxu0 }
 0x284   :  { %v1368_v30 = vld [vmem:[#allocation3 + $0x78] sm:$0xff] }
 0x285   :  { %v6971_v16 = vpop.f32.mrf.mxu1  ;;  %v3647_v39 = vpop.f32.mrf.mxu0 }
 0x286   :  { %v6975_v55 = vadd.f32 %v3647_v39, %v3359_v33  ;;  %v5234_v39 = vcombine.low %v1419_v40, %v1423_v8 }
 0x287   :  { %v3424_v56 = vpop.f32.mrf.mxu1  ;;  %v3649_v13 = vpop.f32.mrf.mxu0 }
 0x288   :  { %v5172_v56 = vcombine.low %v1356_v0, %v1360_v14  ;;  %v1439_v0 = vld [vmem:[#allocation3 + $0x2b0] sm:$0xff]  ;;  %v1372_v14 = vld [vmem:[#allocation3 + $0x98] sm:$0xff] }
 0x289   :  { %v6977_v45 = vpop.f32.mrf.mxu1  ;;  %v3652_v52 = vpop.f32.mrf.mxu0  ;;  %3843 = vmatmul.mubr.bf16.gmra.mxu0 %v5416_v29  ;;  %3940 = vmatmul.mubr.bf16.gmra.mxu1 %v5226_v6  ;;  %v5243_v29 = vcombine.high %v1427_v35, %v1431_v9  ;;  %v5181_v6 = vcombine.high %v1364_v7, %v1368_v30 }
 0x28a   :  { %3947 = vmatprep.mubr.bf16.mxu1 %v5235_v17  ;;  %4172 = vmatprep.mubr.bf16.mxu0 %v5173_v54  ;;  %v6979_v50 = vadd.f32 %v3652_v52, %v3364_v53  ;;  %v3372_v17 = vadd.f32 %v6873_v12, %v6780_v58  ;;  %v3375_v58 = vadd.f32 %v6887_v3, %v6802_v22  ;;  %v1443_v22 = vld [vmem:[#allocation3 + $0x2d0] sm:$0xff] }
 0x28b   :  { %v3429_v28 = vpop.f32.mrf.mxu1  ;;  %v3654_v15 = vpop.f32.mrf.mxu0 }
 0x28c   :  { %v1376_v15 = vld [vmem:[#allocation3 + $0xb8] sm:$0xff] }
 0x28d   :  { %v6983_v51 = vpop.f32.mrf.mxu1  ;;  %v3655_v33 = vpop.f32.mrf.mxu0 }
 0x28e   :  { %v6987_v54 = vadd.f32 %v3655_v33, %v3367_v37  ;;  %v5242_v33 = vcombine.low %v1427_v35, %v1431_v9 }
 0x28f   :  { %v3432_v53 = vpop.f32.mrf.mxu1  ;;  %v3657_v13 = vpop.f32.mrf.mxu0 }
 0x290   :  { %v5180_v53 = vcombine.low %v1364_v7, %v1368_v30  ;;  %v1447_v7 = vld [vmem:[#allocation3 + $0x2f0] sm:$0xff]  ;;  %v1380_v30 = vld [vmem:[#allocation3 + $0xd8] sm:$0xff] }
 0x291   :  { %v6989_v52 = vpop.f32.mrf.mxu1  ;;  %v3660_v28 = vpop.f32.mrf.mxu0  ;;  %3948 = vmatmul.mubr.bf16.gmra.mxu1 %v5234_v39  ;;  %4173 = vmatmul.mubr.bf16.vlgmr.msra.gmra.mxu0 %v5172_v56  ;;  %v5251_v39 = vcombine.high %v1435_v2, %v1439_v0  ;;  %v5189_v56 = vcombine.high %v1372_v14, %v1376_v15 }
 0x292   :  { %3955 = vmatprep.mubr.bf16.mxu1 %v5243_v29  ;;  %4180 = vmatprep.mubr.bf16.mxu0 %v5181_v6  ;;  %v6991_v59 = vadd.f32 %v3660_v28, %v3372_v17  ;;  %v3380_v29 = vadd.f32 %v6898_v20, %v6797_v38  ;;  %v3383_v38 = vadd.f32 %v6911_v36, %v6819_v48  ;;  %v1451_v48 = vld [vmem:[#allocation3 + $0x310] sm:$0xff] }
 0x293   :  { %v3437_v40 = vpop.f32.mrf.mxu1  ;;  %v3662_v8 = vpop.f32.mrf.mxu0 }
 0x294   :  { %v1384_v8 = vld [vmem:[#allocation3 + $0xf8] sm:$0xff] }
 0x295   :  { %v6995_v12 = vpop.f32.mrf.mxu1  ;;  %v3663_v37 = vpop.f32.mrf.mxu0 }
 0x296   :  { %v6999_v6 = vadd.f32 %v3663_v37, %v3375_v58  ;;  %v5250_v37 = vcombine.low %v1435_v2, %v1439_v0 }
 0x297   :  { %v3440_v17 = vpop.f32.mrf.mxu1  ;;  %v3665_v13 = vpop.f32.mrf.mxu0 }
 0x298   :  { %v5188_v17 = vcombine.low %v1372_v14, %v1376_v15  ;;  %v1455_v14 = vld [vmem:[#allocation3 + $0x330] sm:$0xff]  ;;  %v1388_v15 = vld [vmem:[#allocation3 + $0x118] sm:$0xff] }
 0x299   :  { %v7001_v28 = vpop.f32.mrf.mxu1  ;;  %v3668_v40 = vpop.f32.mrf.mxu0  ;;  %3956 = vmatmul.mubr.bf16.gmra.mxu1 %v5242_v33  ;;  %4181 = vmatmul.mubr.bf16.gmra.mxu0 %v5180_v53  ;;  %v5259_v33 = vcombine.high %v1443_v22, %v1447_v7  ;;  %v5197_v53 = vcombine.high %v1380_v30, %v1384_v8 }
 0x29a   :  { %3963 = vmatprep.mubr.bf16.mxu1 %v5251_v39  ;;  %4188 = vmatprep.mubr.bf16.mxu0 %v5189_v56  ;;  %v7003_v3 = vadd.f32 %v3668_v40, %v3380_v29  ;;  %v3388_v39 = vadd.f32 %v6917_v62, %v6812_v24  ;;  %v3391_v24 = vadd.f32 %v6923_v4, %v6834_v42  ;;  %v1459_v42 = vld [vmem:[#allocation3 + $0x350] sm:$0xff] }
 0x29b   :  { %v3445_v35 = vpop.f32.mrf.mxu1  ;;  %v3670_v9 = vpop.f32.mrf.mxu0 }
 0x29c   :  { %v1392_v9 = vld [vmem:[#allocation3 + $0x138] sm:$0xff] }
 0x29d   :  { %v7007_v20 = vpop.f32.mrf.mxu1  ;;  %v3671_v58 = vpop.f32.mrf.mxu0 }
 0x29e   :  { %v7011_v56 = vadd.f32 %v3671_v58, %v3383_v38  ;;  %v5258_v58 = vcombine.low %v1443_v22, %v1447_v7 }
 0x29f   :  { %v3448_v29 = vpop.f32.mrf.mxu1  ;;  %v3673_v13 = vpop.f32.mrf.mxu0 }
 0x2a0   :  { %v5196_v29 = vcombine.low %v1380_v30, %v1384_v8  ;;  %v1463_v30 = vld [vmem:[#allocation3 + $0x370] sm:$0xff]  ;;  %v1396_v8 = vld [vmem:[#allocation3 + $0x158] sm:$0xff] }
 0x2a1   :  { %v7013_v40 = vpop.f32.mrf.mxu1  ;;  %v3676_v35 = vpop.f32.mrf.mxu0  ;;  %3964 = vmatmul.mubr.bf16.gmra.mxu1 %v5250_v37  ;;  %4189 = vmatmul.mubr.bf16.gmra.mxu0 %v5188_v17  ;;  %v5267_v37 = vcombine.high %v1451_v48, %v1455_v14  ;;  %v5205_v17 = vcombine.high %v1388_v15, %v1392_v9 }
 0x2a2   :  { %3971 = vmatprep.mubr.bf16.mxu1 %v5259_v33  ;;  %4196 = vmatprep.mubr.bf16.mxu0 %v5197_v53  ;;  %v7015_v36 = vadd.f32 %v3676_v35, %v3388_v39  ;;  %v3396_v33 = vadd.f32 %v6929_v49, %v6832_v43  ;;  %v3399_v43 = vadd.f32 %v6935_v18, %v6854_v61  ;;  %v1467_v61 = vld [vmem:[#allocation3 + $0x390] sm:$0xff] }
 0x2a3   :  { %v3453_v2 = vpop.f32.mrf.mxu1  ;;  %v3678_v0 = vpop.f32.mrf.mxu0 }
 0x2a4   :  { %v1400_v0 = vld [vmem:[#allocation3 + $0x178] sm:$0xff] }
 0x2a5   :  { %v7019_v62 = vpop.f32.mrf.mxu1  ;;  %v3679_v38 = vpop.f32.mrf.mxu0 }
 0x2a6   :  { %v7023_v53 = vadd.f32 %v3679_v38, %v3391_v24  ;;  %v5266_v38 = vcombine.low %v1451_v48, %v1455_v14 }
 0x2a7   :  { %v3456_v39 = vpop.f32.mrf.mxu1  ;;  %v3681_v13 = vpop.f32.mrf.mxu0 }
 0x2a8   :  { %v5204_v39 = vcombine.low %v1388_v15, %v1392_v9  ;;  %v1471_v15 = vld [vmem:[#allocation3 + $0x3b0] sm:$0xff]  ;;  %v1404_v9 = vld [vmem:[#allocation3 + $0x198] sm:$0xff] }
 0x2a9   :  { %v7025_v35 = vpop.f32.mrf.mxu1  ;;  %v3684_v2 = vpop.f32.mrf.mxu0  ;;  %3972 = vmatmul.mubr.bf16.gmra.mxu1 %v5258_v58  ;;  %4197 = vmatmul.mubr.bf16.gmra.mxu0 %v5196_v29  ;;  %v5275_v58 = vcombine.high %v1459_v42, %v1463_v30  ;;  %v5213_v29 = vcombine.high %v1396_v8, %v1400_v0 }
 0x2aa   :  { %3979 = vmatprep.mubr.bf16.mxu1 %v5267_v37  ;;  %4204 = vmatprep.mubr.bf16.mxu0 %v5205_v17  ;;  %v7027_v4 = vadd.f32 %v3684_v2, %v3396_v33  ;;  %v3404_v37 = vadd.f32 %v6941_v60, %v6844_v11  ;;  %v3407_v11 = vadd.f32 %v6947_v25, %v6868_v41  ;;  %v1475_v41 = vld [vmem:[#allocation3 + $0x3d0] sm:$0xff] }
 0x2ab   :  { %v3461_v22 = vpop.f32.mrf.mxu1  ;;  %v3686_v7 = vpop.f32.mrf.mxu0 }
 0x2ac   :  { %v1408_v7 = vld [vmem:[#allocation3 + $0x1b8] sm:$0xff] }
 0x2ad   :  { %v7031_v49 = vpop.f32.mrf.mxu1  ;;  %v3687_v24 = vpop.f32.mrf.mxu0 }
 0x2ae   :  { %v7035_v17 = vadd.f32 %v3687_v24, %v3399_v43  ;;  %v5274_v24 = vcombine.low %v1459_v42, %v1463_v30 }
 0x2af   :  { %v3464_v33 = vpop.f32.mrf.mxu1  ;;  %v3689_v13 = vpop.f32.mrf.mxu0 }
 0x2b0   :  { %v5212_v33 = vcombine.low %v1396_v8, %v1400_v0  ;;  %v1479_v8 = vld [vmem:[#allocation3 + $0x3f0] sm:$0xff]  ;;  %v1412_v0 = vld [vmem:[#allocation3 + $0x1d8] sm:$0xff] }
 0x2b1   :  { %v7037_v2 = vpop.f32.mrf.mxu1  ;;  %v3692_v22 = vpop.f32.mrf.mxu0  ;;  %3980 = vmatmul.mubr.bf16.gmra.mxu1 %v5266_v38  ;;  %4205 = vmatmul.mubr.bf16.gmra.mxu0 %v5204_v39  ;;  %v5283_v38 = vcombine.high %v1467_v61, %v1471_v15  ;;  %v5221_v39 = vcombine.high %v1404_v9, %v1408_v7 }
 0x2b2   :  { %3987 = vmatprep.mubr.bf16.mxu1 %v5275_v58  ;;  %4212 = vmatprep.mubr.bf16.mxu0 %v5213_v29  ;;  %v7039_v18 = vadd.f32 %v3692_v22, %v3404_v37  ;;  %v3412_v58 = vadd.f32 %v6953_v19, %v6863_v63  ;;  %v3415_v63 = vadd.f32 %v6959_v27, %v6891_v26  ;;  %v1483_v26 = vld [vmem:[#allocation3 + $0x410] sm:$0xff] }
 0x2b3   :  { %v3469_v48 = vpop.f32.mrf.mxu1  ;;  %v3694_v14 = vpop.f32.mrf.mxu0 }
 0x2b4   :  { %v1416_v14 = vld [vmem:[#allocation3 + $0x1f8] sm:$0xff] }
 0x2b5   :  { %v7043_v60 = vpop.f32.mrf.mxu1  ;;  %v3695_v43 = vpop.f32.mrf.mxu0 }
 0x2b6   :  { %v7047_v29 = vadd.f32 %v3695_v43, %v3407_v11  ;;  %v5282_v43 = vcombine.low %v1467_v61, %v1471_v15 }
 0x2b7   :  { %v3472_v37 = vpop.f32.mrf.mxu1  ;;  %v3697_v13 = vpop.f32.mrf.mxu0 }
 0x2b8   :  { %v5220_v37 = vcombine.low %v1404_v9, %v1408_v7  ;;  %v1487_v9 = vld [vmem:[#allocation3 + $0x430] sm:$0xff]  ;;  %v1420_v7 = vld [vmem:[#allocation3 + $0x218] sm:$0xff] }
 0x2b9   :  { %v7049_v22 = vpop.f32.mrf.mxu1  ;;  %v3700_v48 = vpop.f32.mrf.mxu0  ;;  %3988 = vmatmul.mubr.bf16.gmra.mxu1 %v5274_v24  ;;  %4213 = vmatmul.mubr.bf16.gmra.mxu0 %v5212_v33  ;;  %v5291_v24 = vcombine.high %v1475_v41, %v1479_v8  ;;  %v5229_v33 = vcombine.high %v1412_v0, %v1416_v14 }
 0x2ba   :  { %3995 = vmatprep.mubr.bf16.mxu1 %v5283_v38  ;;  %4220 = vmatprep.mubr.bf16.mxu0 %v5221_v39  ;;  %v7051_v25 = vadd.f32 %v3700_v48, %v3412_v58  ;;  %v3420_v38 = vadd.f32 %v6965_v34, %v6882_v31  ;;  %v7575_v31 = vld [vmem:[#allocation15_spill] sm:$0xff] }
 0x2bb   :  { %v3477_v42 = vpop.f32.mrf.mxu1  ;;  %v3702_v30 = vpop.f32.mrf.mxu0  ;;  %v3423_v34 = vadd.f32 %v6971_v16, %v7575_v31  ;;  %v1491_v31 = vld [vmem:[#allocation3 + $0x450] sm:$0xff] }
 0x2bc   :  { %7572 = vst [vmem:[#allocation14_spill] sm:$0xff] %v7051_v25  ;;  %v1424_v30 = vld [vmem:[#allocation3 + $0x238] sm:$0xff]  ;;  %v1831_v16 = vpop.permute.xlu1 %1830 }
 0x2bd   :  { %v7055_v19 = vpop.f32.mrf.mxu1  ;;  %v3703_v11 = vpop.f32.mrf.mxu0 }
 0x2be   :  { %v7059_v39 = vadd.f32 %v3703_v11, %v3415_v63 }
 0x2bf   :  { %v3480_v58 = vpop.f32.mrf.mxu1  ;;  %v3705_v13 = vpop.f32.mrf.mxu0 }
 0x2c0   :  { %7573 = vst [vmem:[#allocation9_spill] sm:$0xff] %v7059_v39  ;;  %v5290_v58 = vcombine.low %v1475_v41, %v1479_v8  ;;  %v5228_v13 = vcombine.low %v1412_v0, %v1416_v14  ;;  %v1428_v14 = vld [vmem:[#allocation3 + $0x258] sm:$0xff] }
 0x2c1   :  { %v7061_v48 = vpop.f32.mrf.mxu1  ;;  %v3708_v42 = vpop.f32.mrf.mxu0  ;;  %3996 = vmatmul.mubr.bf16.gmra.mxu1 %v5282_v43  ;;  %4221 = vmatmul.mubr.bf16.gmra.mxu0 %v5220_v37  ;;  %v7576_v43 = vld [vmem:[#allocation7_spill] sm:$0xff] }
 0x2c2   :  { %4003 = vmatprep.mubr.bf16.mxu1 %v5291_v24  ;;  %4228 = vmatprep.mubr.bf16.mxu0 %v5229_v33  ;;  %v7063_v27 = vadd.f32 %v3708_v42, %v3420_v38  ;;  %v3428_v37 = vadd.f32 %v6977_v45, %v7576_v43  ;;  %v5299_v24 = vcombine.high %v1483_v26, %v1487_v9  ;;  %v1495_v45 = vld [vmem:[#allocation3 + $0x470] sm:$0xff]  ;;  %v1432_v43 = vld [vmem:[#allocation3 + $0x278] sm:$0xff] }
 0x2c3   :  { %v3485_v61 = vpop.f32.mrf.mxu1  ;;  %v3710_v15 = vpop.f32.mrf.mxu0  ;;  %v5237_v33 = vcombine.high %v1420_v7, %v1424_v30 }
 0x2c4   :  { %7574 = vst [vmem:[#allocation11_spill] sm:$0xff] %v7063_v27 }
 0x2c5   :  { %v7067_v63 = vpop.f32.mrf.mxu1  ;;  %v3711_v11 = vpop.f32.mrf.mxu0 }
 0x2c6   :  { %v7071_v38 = vadd.f32 %v3711_v11, %v3423_v34  ;;  %v1836_v34 = vpop.permute.xlu0 %1835  ;;  %v3431_v11 = vadd.f32 %v6983_v51, %v1831_v16  ;;  %v1841_v51 = vpop.permute.xlu1 %1840  ;;  %v1499_v16 = vld [vmem:[#allocation3 + $0x490] sm:$0xff] }
 0x2c7   :  { %v3488_v42 = vpop.f32.mrf.mxu1  ;;  %v3713_v61 = vpop.f32.mrf.mxu0 }
 0x2c8   :  { %7577 = vst [vmem:[#allocation10_spill] sm:$0xff] %v7071_v38  ;;  %v5298_v38 = vcombine.low %v1483_v26, %v1487_v9 }
 0x2c9   :  { %v7073_v15 = vpop.f32.mrf.mxu1  ;;  %v3716_v27 = vpop.f32.mrf.mxu0  ;;  %4004 = vmatmul.mubr.bf16.gmra.mxu1 %v5290_v58  ;;  %4229 = vmatmul.mubr.bf16.gmra.mxu0 %v5228_v13  ;;  %v5236_v58 = vcombine.low %v1420_v7, %v1424_v30  ;;  %v3436_v13 = vadd.f32 %v6989_v52, %v1836_v34  ;;  %v1503_v52 = vld [vmem:[#allocation3 + $0x4b0] sm:$0xff]  ;;  %v1436_v7 = vld [vmem:[#allocation3 + $0x298] sm:$0xff] }
 0x2ca   :  { %4011 = vmatprep.mubr.bf16.mxu1 %v5299_v24  ;;  %4236 = vmatprep.mubr.bf16.mxu0 %v5237_v33  ;;  %v7075_v41 = vadd.f32 %v3716_v27, %v3428_v37  ;;  %v5307_v24 = vcombine.high %v1491_v31, %v1495_v45  ;;  %v5245_v33 = vcombine.high %v1428_v14, %v1432_v43  ;;  %v1440_v30 = vld [vmem:[#allocation3 + $0x2b8] sm:$0xff]  ;;  %v1846_v34 = vpop.permute.xlu0 %1845 }
 0x2cb   :  { %v3493_v8 = vpop.f32.mrf.mxu1  ;;  %v3718_v0 = vpop.f32.mrf.mxu0 }
 0x2cc   :  { %7578 = vst [vmem:[#allocation12_spill] sm:$0xff] %v7075_v41 }
 0x2cd   :  { %v7078_v42 = vpop.f32.mrf.mxu1  ;;  %v3719_v61 = vpop.f32.mrf.mxu0 }
 0x2ce   :  { %v7081_v39 = vadd.f32 %v3719_v61, %v3431_v11  ;;  %v3439_v11 = vadd.f32 %v6995_v12, %v1841_v51  ;;  %v1851_v12 = vpop.permute.xlu1 %1850  ;;  %v1448_v51 = vld [vmem:[#allocation3 + $0x2f8] sm:$0xff] }
 0x2cf   :  { %v3496_v27 = vpop.f32.mrf.mxu1  ;;  %v3721_v37 = vpop.f32.mrf.mxu0 }
 0x2d0   :  { %7579 = vst [vmem:[#allocation15_spill] sm:$0xff] %v7081_v39  ;;  %v5306_v37 = vcombine.low %v1491_v31, %v1495_v45  ;;  %v1507_v31 = vld [vmem:[#allocation3 + $0x4d0] sm:$0xff] }
 0x2d1   :  { %v7083_v8 = vpop.f32.mrf.mxu1  ;;  %v3724_v0 = vpop.f32.mrf.mxu0  ;;  %4012 = vmatmul.mubr.bf16.gmra.mxu1 %v5298_v38  ;;  %4237 = vmatmul.mubr.bf16.gmra.mxu0 %v5236_v58  ;;  %v5244_v38 = vcombine.low %v1428_v14, %v1432_v43  ;;  %v3444_v58 = vadd.f32 %v7001_v28, %v1846_v34  ;;  %v1511_v28 = vld [vmem:[#allocation3 + $0x4f0] sm:$0xff]  ;;  %v1444_v43 = vld [vmem:[#allocation3 + $0x2d8] sm:$0xff] }
 0x2d2   :  { %4019 = vmatprep.mubr.bf16.mxu1 %v5307_v24  ;;  %4244 = vmatprep.mubr.bf16.mxu0 %v5245_v33  ;;  %v7085_v41 = vadd.f32 %v3724_v0, %v3436_v13  ;;  %v5315_v24 = vcombine.high %v1499_v16, %v1503_v52  ;;  %v5253_v33 = vcombine.high %v1436_v7, %v1440_v30  ;;  %v1856_v34 = vpop.permute.xlu0 %1855 }
 0x2d3   :  { %v3501_v26 = vpop.f32.mrf.mxu1  ;;  %v3726_v9 = vpop.f32.mrf.mxu0 }
 0x2d4   :  { %7580 = vst [vmem:[#allocation7_spill] sm:$0xff] %v7085_v41 }
 0x2d5   :  { %v7088_v61 = vpop.f32.mrf.mxu1  ;;  %v3727_v27 = vpop.f32.mrf.mxu0 }
 0x2d6   :  { %v7091_v39 = vadd.f32 %v3727_v27, %v3439_v11  ;;  %v3447_v11 = vadd.f32 %v7007_v20, %v1851_v12  ;;  %v1861_v20 = vpop.permute.xlu1 %1860  ;;  %v1456_v12 = vld [vmem:[#allocation3 + $0x338] sm:$0xff] }
 0x2d7   :  { %v3504_v13 = vpop.f32.mrf.mxu1  ;;  %v3729_v0 = vpop.f32.mrf.mxu0 }
 0x2d8   :  { %7581 = vst [vmem:[#allocation16_spill] sm:$0xff] %v7091_v39  ;;  %v5314_v0 = vcombine.low %v1499_v16, %v1503_v52  ;;  %v1515_v16 = vld [vmem:[#allocation3 + $0x510] sm:$0xff] }
 0x2d9   :  { %v7093_v26 = vpop.f32.mrf.mxu1  ;;  %v3732_v9 = vpop.f32.mrf.mxu0  ;;  %4020 = vmatmul.mubr.bf16.gmra.mxu1 %v5306_v37  ;;  %4245 = vmatmul.mubr.bf16.gmra.mxu0 %v5244_v38  ;;  %v5252_v37 = vcombine.low %v1436_v7, %v1440_v30  ;;  %v3452_v38 = vadd.f32 %v7013_v40, %v1856_v34  ;;  %v1519_v40 = vld [vmem:[#allocation3 + $0x530] sm:$0xff]  ;;  %v1452_v30 = vld [vmem:[#allocation3 + $0x318] sm:$0xff] }
 0x2da   :  { %v7095_v41 = vadd.f32 %v3732_v9, %v3444_v58  ;;  %4027 = vmatprep.mubr.bf16.mxu1 %v5315_v24  ;;  %4252 = vmatprep.mubr.bf16.mxu0 %v5253_v33  ;;  %v5323_v58 = vcombine.high %v1507_v31, %v1511_v28  ;;  %v5261_v9 = vcombine.high %v1444_v43, %v1448_v51  ;;  %v1866_v34 = vpop.permute.xlu0 %1865 }
 0x2db   :  { %v3509_v45 = vpop.f32.mrf.mxu1  ;;  %v3734_v14 = vpop.f32.mrf.mxu0 }
 0x2dc   :  { %7582 = vst [vmem:[#allocation17_spill] sm:$0xff] %v7095_v41 }
 0x2dd   :  { %v7098_v27 = vpop.f32.mrf.mxu1  ;;  %v3735_v13 = vpop.f32.mrf.mxu0 }
 0x2de   :  { %v7101_v24 = vadd.f32 %v3735_v13, %v3447_v11  ;;  %v3455_v11 = vadd.f32 %v7019_v62, %v1861_v20  ;;  %v1464_v20 = vld [vmem:[#allocation3 + $0x378] sm:$0xff] }
 0x2df   :  { %v3512_v33 = vpop.f32.mrf.mxu1  ;;  %v3737_v45 = vpop.f32.mrf.mxu0 }
 0x2e0   :  { %7583 = vst [vmem:[#allocation18_spill] sm:$0xff] %v7101_v24  ;;  %v5322_v45 = vcombine.low %v1507_v31, %v1511_v28  ;;  %v1871_v24 = vpop.permute.xlu1 %1870  ;;  %v1523_v31 = vld [vmem:[#allocation3 + $0x550] sm:$0xff] }
 0x2e1   :  { %v7103_v14 = vpop.f32.mrf.mxu1  ;;  %v3740_v41 = vpop.f32.mrf.mxu0  ;;  %4028 = vmatmul.mubr.bf16.gmra.mxu1 %v5314_v0  ;;  %4253 = vmatmul.mubr.bf16.gmra.mxu0 %v5252_v37  ;;  %v5260_v0 = vcombine.low %v1444_v43, %v1448_v51  ;;  %v1460_v51 = vld [vmem:[#allocation3 + $0x358] sm:$0xff] }
 0x2e2   :  { %v7105_v39 = vadd.f32 %v3740_v41, %v3452_v38  ;;  %4035 = vmatprep.mubr.bf16.mxu1 %v5323_v58  ;;  %4260 = vmatprep.mubr.bf16.mxu0 %v5261_v9  ;;  %v3460_v41 = vadd.f32 %v7025_v35, %v1866_v34  ;;  %v5331_v38 = vcombine.high %v1515_v16, %v1519_v40  ;;  %v1527_v35 = vld [vmem:[#allocation3 + $0x570] sm:$0xff]  ;;  %v1876_v34 = vpop.permute.xlu0 %1875 }
 0x2e3   :  { %v3517_v52 = vpop.f32.mrf.mxu1  ;;  %v3742_v7 = vpop.f32.mrf.mxu0  ;;  %v5269_v58 = vcombine.high %v1452_v30, %v1456_v12 }
 0x2e4   :  { %7584 = vst [vmem:[#allocation19_spill] sm:$0xff] %v7105_v39 }
 0x2e5   :  { %v7108_v13 = vpop.f32.mrf.mxu1  ;;  %v3743_v33 = vpop.f32.mrf.mxu0 }
 0x2e6   :  { %v7111_v37 = vadd.f32 %v3743_v33, %v3455_v11  ;;  %v3463_v11 = vadd.f32 %v7031_v49, %v1871_v24  ;;  %v1531_v24 = vld [vmem:[#allocation3 + $0x590] sm:$0xff] }
 0x2e7   :  { %v3520_v9 = vpop.f32.mrf.mxu1  ;;  %v3745_v52 = vpop.f32.mrf.mxu0 }
 0x2e8   :  { %7585 = vst [vmem:[#allocation20_spill] sm:$0xff] %v7111_v37  ;;  %v5330_v52 = vcombine.low %v1515_v16, %v1519_v40  ;;  %v1881_v37 = vpop.permute.xlu1 %1880 }
 0x2e9   :  { %v7113_v7 = vpop.f32.mrf.mxu1  ;;  %v3748_v39 = vpop.f32.mrf.mxu0  ;;  %4036 = vmatmul.mubr.bf16.gmra.mxu1 %v5322_v45  ;;  %4261 = vmatmul.mubr.bf16.gmra.mxu0 %v5260_v0  ;;  %v5268_v45 = vcombine.low %v1452_v30, %v1456_v12  ;;  %v3468_v0 = vadd.f32 %v7037_v2, %v1876_v34  ;;  %v1535_v2 = vld [vmem:[#allocation3 + $0x5b0] sm:$0xff]  ;;  %v1468_v30 = vld [vmem:[#allocation3 + $0x398] sm:$0xff] }
 0x2ea   :  { %v7115_v62 = vadd.f32 %v3748_v39, %v3460_v41  ;;  %4043 = vmatprep.mubr.bf16.mxu1 %v5331_v38  ;;  %4268 = vmatprep.mubr.bf16.mxu0 %v5269_v58  ;;  %v5339_v41 = vcombine.high %v1523_v31, %v1527_v35  ;;  %v5277_v38 = vcombine.high %v1460_v51, %v1464_v20  ;;  %v1472_v12 = vld [vmem:[#allocation3 + $0x3b8] sm:$0xff]  ;;  %v1886_v34 = vpop.permute.xlu0 %1885 }
 0x2eb   :  { %v3525_v28 = vpop.f32.mrf.mxu1  ;;  %v3750_v43 = vpop.f32.mrf.mxu0 }
 0x2ec   :  { %7586 = vst [vmem:[#allocation21_spill] sm:$0xff] %v7115_v62 }
 0x2ed   :  { %v7118_v33 = vpop.f32.mrf.mxu1  ;;  %v3751_v9 = vpop.f32.mrf.mxu0 }
 0x2ee   :  { %v7121_v39 = vadd.f32 %v3751_v9, %v3463_v11  ;;  %v3471_v11 = vadd.f32 %v7043_v60, %v1881_v37  ;;  %v1539_v37 = vld [vmem:[#allocation3 + $0x5d0] sm:$0xff] }
 0x2ef   :  { %v3528_v58 = vpop.f32.mrf.mxu1  ;;  %v3753_v28 = vpop.f32.mrf.mxu0 }
 0x2f0   :  { %7587 = vst [vmem:[#allocation22_spill] sm:$0xff] %v7121_v39  ;;  %v5338_v28 = vcombine.low %v1523_v31, %v1527_v35  ;;  %v1891_v39 = vpop.permute.xlu1 %1890 }
 0x2f1   :  { %v7123_v43 = vpop.f32.mrf.mxu1  ;;  %v3756_v62 = vpop.f32.mrf.mxu0  ;;  %4044 = vmatmul.mubr.bf16.gmra.mxu1 %v5330_v52  ;;  %4269 = vmatmul.mubr.bf16.gmra.mxu0 %v5268_v45  ;;  %v5276_v52 = vcombine.low %v1460_v51, %v1464_v20  ;;  %v3476_v45 = vadd.f32 %v7049_v22, %v1886_v34  ;;  %v1543_v22 = vld [vmem:[#allocation3 + $0x5f0] sm:$0xff]  ;;  %v1476_v51 = vld [vmem:[#allocation3 + $0x3d8] sm:$0xff] }
 0x2f2   :  { %v7125_v49 = vadd.f32 %v3756_v62, %v3468_v0  ;;  %4051 = vmatprep.mubr.bf16.mxu1 %v5339_v41  ;;  %4276 = vmatprep.mubr.bf16.mxu0 %v5277_v38  ;;  %v5347_v0 = vcombine.high %v1531_v24, %v1535_v2  ;;  %v5285_v41 = vcombine.high %v1468_v30, %v1472_v12  ;;  %v1480_v20 = vld [vmem:[#allocation3 + $0x3f8] sm:$0xff]  ;;  %v1896_v34 = vpop.permute.xlu0 %1895 }
 0x2f3   :  { %v3533_v16 = vpop.f32.mrf.mxu1  ;;  %v3758_v40 = vpop.f32.mrf.mxu0 }
 0x2f4   :  { %7588 = vst [vmem:[#allocation23_spill] sm:$0xff] %v7125_v49 }
 0x2f5   :  { %v7128_v9 = vpop.f32.mrf.mxu1  ;;  %v3759_v58 = vpop.f32.mrf.mxu0 }
 0x2f6   :  { %v7131_v62 = vadd.f32 %v3759_v58, %v3471_v11  ;;  %v3479_v11 = vadd.f32 %v7055_v19, %v1891_v39  ;;  %v1547_v39 = vld [vmem:[#allocation3 + $0x610] sm:$0xff] }
 0x2f7   :  { %v3536_v38 = vpop.f32.mrf.mxu1  ;;  %v3761_v16 = vpop.f32.mrf.mxu0 }
 0x2f8   :  { %7589 = vst [vmem:[#allocation24_spill] sm:$0xff] %v7131_v62  ;;  %v5346_v16 = vcombine.low %v1531_v24, %v1535_v2  ;;  %v1901_v62 = vpop.permute.xlu1 %1900 }
 0x2f9   :  { %v7133_v40 = vpop.f32.mrf.mxu1  ;;  %v3764_v49 = vpop.f32.mrf.mxu0  ;;  %4052 = vmatmul.mubr.bf16.gmra.mxu1 %v5338_v28  ;;  %4277 = vmatmul.mubr.bf16.gmra.mxu0 %v5276_v52  ;;  %v5284_v28 = vcombine.low %v1468_v30, %v1472_v12  ;;  %v3484_v52 = vadd.f32 %v7061_v48, %v1896_v34  ;;  %v1551_v48 = vld [vmem:[#allocation3 + $0x630] sm:$0xff]  ;;  %v1484_v30 = vld [vmem:[#allocation3 + $0x418] sm:$0xff] }
 0x2fa   :  { %v7135_v60 = vadd.f32 %v3764_v49, %v3476_v45  ;;  %4059 = vmatprep.mubr.bf16.mxu1 %v5347_v0  ;;  %4284 = vmatprep.mubr.bf16.mxu0 %v5285_v41  ;;  %v5355_v45 = vcombine.high %v1539_v37, %v1543_v22  ;;  %v5293_v0 = vcombine.high %v1476_v51, %v1480_v20  ;;  %v1488_v12 = vld [vmem:[#allocation3 + $0x438] sm:$0xff]  ;;  %v1906_v34 = vpop.permute.xlu0 %1905 }
 0x2fb   :  { %v3541_v31 = vpop.f32.mrf.mxu1  ;;  %v3766_v35 = vpop.f32.mrf.mxu0 }
 0x2fc   :  { %7590 = vst [vmem:[#allocation25_spill] sm:$0xff] %v7135_v60 }
 0x2fd   :  { %v7138_v58 = vpop.f32.mrf.mxu1  ;;  %v3767_v38 = vpop.f32.mrf.mxu0 }
 0x2fe   :  { %v7141_v49 = vadd.f32 %v3767_v38, %v3479_v11  ;;  %v3487_v11 = vadd.f32 %v7067_v63, %v1901_v62  ;;  %v1555_v62 = vld [vmem:[#allocation3 + $0x650] sm:$0xff] }
 0x2ff   :  { %v3544_v41 = vpop.f32.mrf.mxu1  ;;  %v3769_v31 = vpop.f32.mrf.mxu0 }
 0x300   :  { %7591 = vst [vmem:[#allocation26_spill] sm:$0xff] %v7141_v49  ;;  %v5354_v31 = vcombine.low %v1539_v37, %v1543_v22  ;;  %v1911_v49 = vpop.permute.xlu1 %1910 }
 0x301   :  { %v7143_v35 = vpop.f32.mrf.mxu1  ;;  %v3772_v60 = vpop.f32.mrf.mxu0  ;;  %4060 = vmatmul.mubr.bf16.gmra.mxu1 %v5346_v16  ;;  %4285 = vmatmul.mubr.bf16.gmra.mxu0 %v5284_v28  ;;  %v5292_v16 = vcombine.low %v1476_v51, %v1480_v20  ;;  %v3492_v28 = vadd.f32 %v7073_v15, %v1906_v34  ;;  %v1559_v15 = vld [vmem:[#allocation3 + $0x670] sm:$0xff]  ;;  %v1492_v51 = vld [vmem:[#allocation3 + $0x458] sm:$0xff] }
 0x302   :  { %v7145_v19 = vadd.f32 %v3772_v60, %v3484_v52  ;;  %4067 = vmatprep.mubr.bf16.mxu1 %v5355_v45  ;;  %4292 = vmatprep.mubr.bf16.mxu0 %v5293_v0  ;;  %v5363_v52 = vcombine.high %v1547_v39, %v1551_v48  ;;  %v5301_v45 = vcombine.high %v1484_v30, %v1488_v12  ;;  %v1496_v20 = vld [vmem:[#allocation3 + $0x478] sm:$0xff]  ;;  %v1916_v34 = vpop.permute.xlu0 %1915 }
 0x303   :  { %v3549_v24 = vpop.f32.mrf.mxu1  ;;  %v3774_v2 = vpop.f32.mrf.mxu0 }
 0x304   :  { %7592 = vst [vmem:[#allocation27_spill] sm:$0xff] %v7145_v19 }
 0x305   :  { %v7148_v38 = vpop.f32.mrf.mxu1  ;;  %v3775_v41 = vpop.f32.mrf.mxu0 }
 0x306   :  { %v7151_v60 = vadd.f32 %v3775_v41, %v3487_v11  ;;  %v3495_v11 = vadd.f32 %v7078_v42, %v1911_v49  ;;  %v7597_v42 = vld [vmem:[#allocation8_spill] sm:$0xff] }
 0x307   :  { %v3552_v0 = vpop.f32.mrf.mxu1  ;;  %v3777_v24 = vpop.f32.mrf.mxu0 }
 0x308   :  { %7593 = vst [vmem:[#allocation28_spill] sm:$0xff] %v7151_v60  ;;  %v5362_v24 = vcombine.low %v1547_v39, %v1551_v48  ;;  %v1921_v60 = vpop.permute.xlu1 %1920  ;;  %v1563_v39 = vld [vmem:[#allocation3 + $0x690] sm:$0xff] }
 0x309   :  { %v7153_v2 = vpop.f32.mrf.mxu1  ;;  %v3780_v19 = vpop.f32.mrf.mxu0  ;;  %4068 = vmatmul.mubr.bf16.gmra.mxu1 %v5354_v31  ;;  %4293 = vmatmul.mubr.bf16.gmra.mxu0 %v5292_v16  ;;  %v5300_v31 = vcombine.low %v1484_v30, %v1488_v12  ;;  %v3500_v16 = vadd.f32 %v7083_v8, %v1916_v34  ;;  %v1567_v8 = vld [vmem:[#allocation3 + $0x6b0] sm:$0xff]  ;;  %v1500_v12 = vld [vmem:[#allocation3 + $0x498] sm:$0xff] }
 0x30a   :  { %v7155_v63 = vadd.f32 %v3780_v19, %v3492_v28  ;;  %4075 = vmatprep.mubr.bf16.mxu1 %v5363_v52  ;;  %4300 = vmatprep.mubr.bf16.mxu0 %v5301_v45  ;;  %v5371_v28 = vcombine.high %v1555_v62, %v1559_v15  ;;  %v5309_v52 = vcombine.high %v1492_v51, %v1496_v20  ;;  %v1504_v34 = vld [vmem:[#allocation3 + $0x4b8] sm:$0xff] }
 0x30b   :  { %v3557_v37 = vpop.f32.mrf.mxu1  ;;  %v3782_v22 = vpop.f32.mrf.mxu0 }
 0x30c   :  { %7594 = vst [vmem:[#allocation29_spill] sm:$0xff] %v7155_v63 }
 0x30d   :  { %v7158_v41 = vpop.f32.mrf.mxu1  ;;  %v3783_v0 = vpop.f32.mrf.mxu0 }
 0x30e   :  { %v7161_v19 = vadd.f32 %v3783_v0, %v3495_v11  ;;  %v1926_v11 = vpop.permute.xlu0 %1925  ;;  %v3503_v0 = vadd.f32 %v7088_v61, %v1921_v60  ;;  %v1931_v61 = vpop.permute.xlu1 %1930 }
 0x30f   :  { %v3560_v45 = vpop.f32.mrf.mxu1  ;;  %v3785_v37 = vpop.f32.mrf.mxu0 }
 0x310   :  { %7595 = vst [vmem:[#allocation30_spill] sm:$0xff] %v7161_v19  ;;  %v5308_v37 = vcombine.low %v1492_v51, %v1496_v20  ;;  %v1575_v51 = vld [vmem:[#allocation3 + $0x6f0] sm:$0xff] }
 0x311   :  { %v3788_v22 = vpop.f32.mrf.mxu0  ;;  %v3885_v63 = vpop.f32.mrf.mxu1  ;;  %4076 = vmatmul.mubr.bf16.gmra.mxu1 %v5362_v24  ;;  %4301 = vmatmul.mubr.bf16.gmra.mxu0 %v5300_v31  ;;  %v5370_v31 = vcombine.low %v1555_v62, %v1559_v15  ;;  %v7600_v62 = vld [vmem:[#allocation13_spill] sm:$0xff] }
 0x312   :  { %v7163_v25 = vadd.f32 %v3788_v22, %v3500_v16  ;;  %v7166_v49 = vadd.f32 %v3885_v63, %v7597_v42  ;;  %4083 = vmatprep.mubr.bf16.mxu1 %v5371_v28  ;;  %4308 = vmatprep.mubr.bf16.mxu0 %v5309_v52  ;;  %v5379_v16 = vcombine.high %v1563_v39, %v1567_v8  ;;  %v7598_v28 = vld [vmem:[#allocation6_spill] sm:$0xff] }
 0x313   :  { %v3790_v48 = vpop.f32.mrf.mxu0  ;;  %v3887_v30 = vpop.f32.mrf.mxu1  ;;  %v3508_v22 = vadd.f32 %v7093_v26, %v1926_v11  ;;  %v5317_v42 = vcombine.high %v1500_v12, %v1504_v34  ;;  %v1571_v26 = vld [vmem:[#allocation3 + $0x6d0] sm:$0xff] }
 0x314   :  { %7596 = vst [vmem:[#allocation31_spill] sm:$0xff] %v7163_v25 }
 0x315   :  { %v3791_v45 = vpop.f32.mrf.mxu0  ;;  %v3888_v24 = vpop.f32.mrf.mxu1 }
 0x316   :  { %v7170_v63 = vadd.f32 %v3791_v45, %v3503_v0  ;;  %v7173_v52 = vadd.f32 %v3888_v24, %v7598_v28  ;;  %v1508_v0 = vld [vmem:[#allocation3 + $0x4d8] sm:$0xff]  ;;  %v1936_v24 = vpop.permute.xlu0 %1935  ;;  %v3511_v28 = vadd.f32 %v7098_v27, %v1931_v61  ;;  %v1941_v27 = vpop.permute.xlu1 %1940 }
 0x317   :  { %v3793_v48 = vpop.f32.mrf.mxu0  ;;  %v3890_v30 = vpop.f32.mrf.mxu1  ;;  %v1512_v45 = vld [vmem:[#allocation3 + $0x4f8] sm:$0xff] }
 0x318   :  { %v5316_v30 = vcombine.low %v1500_v12, %v1504_v34  ;;  %v1516_v34 = vld [vmem:[#allocation3 + $0x518] sm:$0xff] }
 0x319   :  { %v3796_v25 = vpop.f32.mrf.mxu0  ;;  %v3893_v19 = vpop.f32.mrf.mxu1  ;;  %4084 = vmatmul.mubr.bf16.gmra.mxu1 %v5370_v31  ;;  %4309 = vmatmul.mubr.bf16.gmra.mxu0 %v5308_v37  ;;  %v5378_v37 = vcombine.low %v1563_v39, %v1567_v8  ;;  %v1583_v8 = vld [vmem:[#allocation3 + $0x730] sm:$0xff] }
 0x31a   :  { %v7175_v60 = vadd.f32 %v3796_v25, %v3508_v22  ;;  %v7178_v15 = vadd.f32 %v3893_v19, %v7600_v62  ;;  %4091 = vmatprep.mubr.bf16.mxu1 %v5379_v16  ;;  %4316 = vmatprep.mubr.bf16.mxu0 %v5317_v42  ;;  %v5387_v25 = vcombine.high %v1571_v26, %v1575_v51 }
 0x31b   :  { %v3798_v20 = vpop.f32.mrf.mxu0  ;;  %v3895_v11 = vpop.f32.mrf.mxu1  ;;  %v3516_v22 = vadd.f32 %v7103_v14, %v1936_v24  ;;  %v5325_v42 = vcombine.high %v1508_v0, %v1512_v45  ;;  %v1579_v14 = vld [vmem:[#allocation3 + $0x710] sm:$0xff]  ;;  %v1520_v24 = vld [vmem:[#allocation3 + $0x538] sm:$0xff] }
 0x31c   :  { %7599 = vst [vmem:[#allocation8_spill] sm:$0xff] %v7175_v60 }
 0x31d   :  { %v3799_v48 = vpop.f32.mrf.mxu0  ;;  %v3896_v31 = vpop.f32.mrf.mxu1 }
 0x31e   :  { %v7182_v19 = vadd.f32 %v3799_v48, %v3511_v28  ;;  %v7185_v16 = vadd.f32 %v3896_v31, %v6915_v57  ;;  %v1946_v28 = vpop.permute.xlu0 %1945  ;;  %v3519_v48 = vadd.f32 %v7108_v13, %v1941_v27  ;;  %v1951_v13 = vpop.permute.xlu1 %1950 }
 0x31f   :  { %v3801_v62 = vpop.f32.mrf.mxu0  ;;  %v3898_v20 = vpop.f32.mrf.mxu1 }
 0x320   :  { %v5324_v62 = vcombine.low %v1508_v0, %v1512_v45  ;;  %v3524_v20 = vadd.f32 %v7113_v7, %v1946_v28  ;;  %v1587_v7 = vld [vmem:[#allocation3 + $0x750] sm:$0xff]  ;;  %v1524_v45 = vld [vmem:[#allocation3 + $0x558] sm:$0xff] }
 0x321   :  { %v3804_v11 = vpop.f32.mrf.mxu0  ;;  %v3901_v60 = vpop.f32.mrf.mxu1  ;;  %4092 = vmatmul.mubr.bf16.gmra.mxu1 %v5378_v37  ;;  %4317 = vmatmul.mubr.bf16.gmra.mxu0 %v5316_v30  ;;  %v5386_v30 = vcombine.low %v1571_v26, %v1575_v51  ;;  %v1591_v51 = vld [vmem:[#allocation3 + $0x770] sm:$0xff]  ;;  %v1528_v28 = vld [vmem:[#allocation3 + $0x578] sm:$0xff] }
 0x322   :  { %v7187_v61 = vadd.f32 %v3804_v11, %v3516_v22  ;;  %v7190_v39 = vadd.f32 %v3901_v60, %v6919_v32  ;;  %4099 = vmatprep.mubr.bf16.mxu1 %v5387_v25  ;;  %4324 = vmatprep.mubr.bf16.mxu0 %v5325_v42  ;;  %v5395_v22 = vcombine.high %v1579_v14, %v1583_v8 }
 0x323   :  { %v3806_v12 = vpop.f32.mrf.mxu0  ;;  %v3903_v57 = vpop.f32.mrf.mxu1  ;;  %v5333_v25 = vcombine.high %v1516_v34, %v1520_v24 }
 0x325   :  { %v3807_v31 = vpop.f32.mrf.mxu0  ;;  %v3904_v37 = vpop.f32.mrf.mxu1 }
 0x326   :  { %v7194_v32 = vadd.f32 %v3807_v31, %v3519_v48  ;;  %v7197_v60 = vadd.f32 %v3904_v37, %v6927_v47  ;;  %v1956_v48 = vpop.permute.xlu0 %1955  ;;  %v3527_v31 = vadd.f32 %v7118_v33, %v1951_v13  ;;  %v1961_v33 = vpop.permute.xlu1 %1960 }
 0x327   :  { %v3809_v42 = vpop.f32.mrf.mxu0  ;;  %v3906_v11 = vpop.f32.mrf.mxu1 }
 0x328   :  { %v5332_v42 = vcombine.low %v1516_v34, %v1520_v24  ;;  %v3532_v11 = vadd.f32 %v7123_v43, %v1956_v48  ;;  %v1595_v43 = vld [vmem:[#allocation3 + $0x790] sm:$0xff]  ;;  %v1532_v24 = vld [vmem:[#allocation3 + $0x598] sm:$0xff] }
 0x329   :  { %v3812_v12 = vpop.f32.mrf.mxu0  ;;  %v3909_v57 = vpop.f32.mrf.mxu1  ;;  %4100 = vmatmul.mubr.bf16.gmra.mxu1 %v5386_v30  ;;  %4325 = vmatmul.mubr.bf16.gmra.mxu0 %v5324_v62  ;;  %v5394_v62 = vcombine.low %v1579_v14, %v1583_v8  ;;  %v1599_v8 = vld [vmem:[#allocation3 + $0x7b0] sm:$0xff]  ;;  %v1536_v48 = vld [vmem:[#allocation3 + $0x5b8] sm:$0xff] }
 0x32a   :  { %v7199_v27 = vadd.f32 %v3812_v12, %v3524_v20  ;;  %v7202_v26 = vadd.f32 %v3909_v57, %v6931_v23  ;;  %4107 = vmatprep.mubr.bf16.mxu1 %v5395_v22  ;;  %4332 = vmatprep.mubr.bf16.mxu0 %v5333_v25  ;;  %v5403_v20 = vcombine.high %v1587_v7, %v1591_v51 }
 0x32b   :  { %v3814_v0 = vpop.f32.mrf.mxu0  ;;  %v3911_v47 = vpop.f32.mrf.mxu1  ;;  %v5341_v25 = vcombine.high %v1524_v45, %v1528_v28 }
 0x32d   :  { %v3815_v37 = vpop.f32.mrf.mxu0  ;;  %v3912_v30 = vpop.f32.mrf.mxu1 }
 0x32e   :  { %v7206_v23 = vadd.f32 %v3815_v37, %v3527_v31  ;;  %v7209_v22 = vadd.f32 %v3912_v30, %v6939_v10  ;;  %v1966_v31 = vpop.permute.xlu0 %1965  ;;  %v3535_v37 = vadd.f32 %v7128_v9, %v1961_v33  ;;  %v1971_v9 = vpop.permute.xlu1 %1970 }
 0x32f   :  { %v3817_v12 = vpop.f32.mrf.mxu0  ;;  %v3914_v57 = vpop.f32.mrf.mxu1 }
 0x330   :  { %v5340_v12 = vcombine.low %v1524_v45, %v1528_v28  ;;  %v3540_v57 = vadd.f32 %v7133_v40, %v1966_v31  ;;  %v1603_v40 = vld [vmem:[#allocation3 + $0x7d0] sm:$0xff]  ;;  %v1540_v28 = vld [vmem:[#allocation3 + $0x5d8] sm:$0xff] }
 0x331   :  { %v3820_v0 = vpop.f32.mrf.mxu0  ;;  %v3917_v47 = vpop.f32.mrf.mxu1  ;;  %4108 = vmatmul.mubr.bf16.gmra.mxu1 %v5394_v62  ;;  %4333 = vmatmul.mubr.bf16.gmra.mxu0 %v5332_v42  ;;  %v5402_v42 = vcombine.low %v1587_v7, %v1591_v51  ;;  %v1607_v51 = vld [vmem:[#allocation3 + $0x7f0] sm:$0xff]  ;;  %v1544_v31 = vld [vmem:[#allocation3 + $0x5f8] sm:$0xff] }
 0x332   :  { %v7211_v13 = vadd.f32 %v3820_v0, %v3532_v11  ;;  %v7214_v14 = vadd.f32 %v3917_v47, %v6943_v46  ;;  %4115 = vmatprep.mubr.bf16.mxu1 %v5403_v20  ;;  %4340 = vmatprep.mubr.bf16.mxu0 %v5341_v25  ;;  %v5411_v11 = vcombine.high %v1595_v43, %v1599_v8 }
 0x333   :  { %v3822_v34 = vpop.f32.mrf.mxu0  ;;  %v3919_v10 = vpop.f32.mrf.mxu1  ;;  %v5349_v25 = vcombine.high %v1532_v24, %v1536_v48 }
 0x335   :  { %v3823_v30 = vpop.f32.mrf.mxu0  ;;  %v3920_v62 = vpop.f32.mrf.mxu1 }
 0x336   :  { %v7218_v46 = vadd.f32 %v3823_v30, %v3535_v37  ;;  %v7221_v20 = vadd.f32 %v3920_v62, %v6951_v5  ;;  %v1976_v37 = vpop.permute.xlu0 %1975  ;;  %v3543_v30 = vadd.f32 %v7138_v58, %v1971_v9  ;;  %v1981_v58 = vpop.permute.xlu1 %1980 }
 0x337   :  { %v3825_v0 = vpop.f32.mrf.mxu0  ;;  %v3922_v47 = vpop.f32.mrf.mxu1 }
 0x338   :  { %v5348_v0 = vcombine.low %v1532_v24, %v1536_v48  ;;  %v3548_v47 = vadd.f32 %v7143_v35, %v1976_v37  ;;  %v1548_v24 = vld [vmem:[#allocation3 + $0x618] sm:$0xff]  ;;  %v3551_v37 = vadd.f32 %v7148_v38, %v1981_v58 }
 0x339   :  { %v3828_v34 = vpop.f32.mrf.mxu0  ;;  %v3925_v10 = vpop.f32.mrf.mxu1  ;;  %4116 = vmatmul.mubr.bf16.gmra.mxu1 %v5402_v42  ;;  %4341 = vmatmul.mubr.bf16.gmra.mxu0 %v5340_v12  ;;  %v5410_v12 = vcombine.low %v1595_v43, %v1599_v8 }
 0x33a   :  { %v7223_v33 = vadd.f32 %v3828_v34, %v3540_v57  ;;  %v7226_v7 = vadd.f32 %v3925_v10, %v6955_v44  ;;  %4123 = vmatprep.mubr.bf16.mxu1 %v5411_v11  ;;  %4348 = vmatprep.mubr.bf16.mxu0 %v5349_v25  ;;  %v5419_v57 = vcombine.high %v1603_v40, %v1607_v51  ;;  %v1986_v48 = vpop.permute.xlu0 %1985 }
 0x33b   :  { %v3830_v45 = vpop.f32.mrf.mxu0  ;;  %v3927_v5 = vpop.f32.mrf.mxu1  ;;  %v5357_v25 = vcombine.high %v1540_v28, %v1544_v31 }
 0x33d   :  { %v3831_v62 = vpop.f32.mrf.mxu0  ;;  %v3928_v42 = vpop.f32.mrf.mxu1 }
 0x33e   :  { %v7230_v44 = vadd.f32 %v3831_v62, %v3543_v30  ;;  %v7233_v11 = vadd.f32 %v3928_v42, %v6963_v21  ;;  %v1552_v21 = vld [vmem:[#allocation3 + $0x638] sm:$0xff]  ;;  %v5418_v42 = vcombine.low %v1603_v40, %v1607_v51 }
 0x33f   :  { %v3833_v34 = vpop.f32.mrf.mxu0  ;;  %v3930_v10 = vpop.f32.mrf.mxu1 }
 0x341   :  { %v3836_v45 = vpop.f32.mrf.mxu0  ;;  %v3933_v5 = vpop.f32.mrf.mxu1  ;;  %4124 = vmatmul.mubr.bf16.gmra.mxu1 %v5410_v12  ;;  %4349 = vmatmul.mubr.bf16.gmra.mxu0 %v5348_v0  ;;  %v5356_v12 = vcombine.low %v1540_v28, %v1544_v31  ;;  %v3556_v0 = vadd.f32 %v7153_v2, %v1986_v48  ;;  %v1556_v28 = vld [vmem:[#allocation3 + $0x658] sm:$0xff] }
 0x342   :  { %v7235_v9 = vadd.f32 %v3836_v45, %v3548_v47  ;;  %v7238_v43 = vadd.f32 %v3933_v5, %v6967_v1  ;;  %4131 = vmatprep.mubr.bf16.mxu1 %v5419_v57  ;;  %4356 = vmatprep.mubr.bf16.mxu0 %v5357_v25  ;;  %v5365_v57 = vcombine.high %v1548_v24, %v1552_v21  ;;  %v1991_v5 = vpop.permute.xlu1 %1990  ;;  %v1560_v31 = vld [vmem:[#allocation3 + $0x678] sm:$0xff] }
 0x343   :  { %v3838_v35 = vpop.f32.mrf.mxu0  ;;  %v3935_v8 = vpop.f32.mrf.mxu1 }
 0x344   :  { %v5364_v8 = vcombine.low %v1548_v24, %v1552_v21  ;;  %v1564_v24 = vld [vmem:[#allocation3 + $0x698] sm:$0xff] }
 0x345   :  { %v3839_v30 = vpop.f32.mrf.mxu0  ;;  %v3936_v62 = vpop.f32.mrf.mxu1  ;;  %v1568_v21 = vld [vmem:[#allocation3 + $0x6b8] sm:$0xff] }
 0x346   :  { %v7242_v47 = vadd.f32 %v3839_v30, %v3551_v37  ;;  %v7245_v1 = vadd.f32 %v3936_v62, %v6975_v55  ;;  %v3559_v55 = vadd.f32 %v7158_v41, %v1991_v5  ;;  %v5373_v30 = vcombine.high %v1556_v28, %v1560_v31  ;;  %v4560_v5 = vpop.permute.xlu0 %4559 }
 0x347   :  { %v3841_v25 = vpop.f32.mrf.mxu0  ;;  %v3938_v34 = vpop.f32.mrf.mxu1 }
 0x349   :  { %v3844_v10 = vpop.f32.mrf.mxu0  ;;  %v3941_v45 = vpop.f32.mrf.mxu1  ;;  %4132 = vmatmul.mubr.bf16.gmra.mxu1 %v5418_v42  ;;  %4357 = vmatmul.mubr.bf16.gmra.mxu0 %v5356_v12 }
 0x34a   :  { %v7247_v38 = vadd.f32 %v3844_v10, %v3556_v0  ;;  %v7250_v40 = vadd.f32 %v3941_v45, %v6979_v50  ;;  %4364 = vmatprep.mubr.bf16.mxu0 %v5365_v57  ;;  %v5372_v45 = vcombine.low %v1556_v28, %v1560_v31 }
 0x34b   :  { %v3846_v2 = vpop.f32.mrf.mxu0  ;;  %v3943_v51 = vpop.f32.mrf.mxu1 }
 0x34d   :  { %v3847_v58 = vpop.f32.mrf.mxu0  ;;  %v3944_v35 = vpop.f32.mrf.mxu1 }
 0x34e   :  { %v7253_v48 = vadd.f32 %v3847_v58, %v3559_v55  ;;  %v7256_v37 = vadd.f32 %v3944_v35, %v6987_v54  ;;  %v5381_v55 = vcombine.high %v1564_v24, %v1568_v21  ;;  %v4565_v35 = vpop.permute.xlu1 %4564 }
 0x34f   :  { %v3849_v62 = vpop.f32.mrf.mxu0  ;;  %v3946_v42 = vpop.f32.mrf.mxu1 }
 0x351   :  { %v3949_v50 = vpop.f32.mrf.mxu1  ;;  %v4174_v12 = vpop.f32.mrf.mxu0  ;;  %4365 = vmatmul.mubr.bf16.gmra.mxu0 %v5364_v8 }
 0x352   :  { %v7259_v0 = vadd.f32 %v3949_v50, %v6991_v59  ;;  %v4175_v57 = vadd.f32 %v4174_v12, %v7166_v49  ;;  %4372 = vmatprep.mubr.bf16.mxu0 %v5373_v30  ;;  %v1576_v12 = vld [vmem:[#allocation3 + $0x6f8] sm:$0xff] }
 0x353   :  { %v3951_v41 = vpop.f32.mrf.mxu1  ;;  %v4176_v25 = vpop.f32.mrf.mxu0 }
 0x354   :  { %v4429_v34 = vmax.f32 %v4175_v57, 0.0  ;;  %v4570_v57 = vpop.permute.xlu0 %4569 }
 0x355   :  { %v3952_v10 = vpop.f32.mrf.mxu1  ;;  %v4177_v54 = vpop.f32.mrf.mxu0 }
 0x356   :  { %v7263_v2 = vadd.f32 %v3952_v10, %v6999_v6  ;;  %v4178_v51 = vadd.f32 %v4177_v54, %v7173_v52  ;;  %v4877_v49 = vmul.f32 %v4560_v5, %v4429_v34  ;;  %v1572_v52 = vld [vmem:[#allocation3 + $0x6d8] sm:$0xff]  ;;  %v5380_v5 = vcombine.low %v1564_v24, %v1568_v21 }
 0x357   :  { %v3954_v59 = vpop.f32.mrf.mxu1  ;;  %v4179_v58 = vpop.f32.mrf.mxu0 }
 0x358   :  { %v4430_v8 = vmax.f32 %v4178_v51, 0.0  ;;  %v4942_v41 = vsel %vm4941_vm0, %v4877_v49, 0.0 }
 0x359   :  { %v3957_v30 = vpop.f32.mrf.mxu1  ;;  %v4182_v62 = vpop.f32.mrf.mxu0  ;;  %4373 = vmatmul.mubr.bf16.gmra.mxu0 %v5372_v45 }
 0x35a   :  { %v4878_v42 = vmul.f32 %v4565_v35, %v4430_v8  ;;  %v7267_v50 = vadd.f32 %v3957_v30, %v7003_v3  ;;  %v4183_v28 = vadd.f32 %v4182_v62, %v7178_v15  ;;  %4380 = vmatprep.mubr.bf16.mxu0 %v5381_v55  ;;  %v5389_v55 = vcombine.high %v1572_v52, %v1576_v12  ;;  %v4575_v35 = vpop.permute.xlu1 %4574 }
 0x35b   :  { %v3959_v6 = vpop.f32.mrf.mxu1  ;;  %v4184_v31 = vpop.f32.mrf.mxu0 }
 0x35c   :  { %v4943_v25 = vsel %vm4941_vm0, %v4878_v42, 0.0  ;;  %v4431_v34 = vmax.f32 %v4183_v28, 0.0  ;;  %v1580_v6 = vld [vmem:[#allocation3 + $0x718] sm:$0xff] }
 0x35d   :  { %v4944_v10 = vadd.f32 %v4943_v25, %v4942_v41  ;;  %v3960_v54 = vpop.f32.mrf.mxu1  ;;  %v4185_v45 = vpop.f32.mrf.mxu0  ;;  %v1584_v31 = vld [vmem:[#allocation3 + $0x738] sm:$0xff] }
 0x35e   :  { %v4879_v51 = vmul.f32 %v4570_v57, %v4431_v34  ;;  %v7273_v3 = vadd.f32 %v3960_v54, %v7011_v56  ;;  %v4186_v15 = vadd.f32 %v4185_v45, %v7185_v16  ;;  %v4580_v57 = vpop.permute.xlu0 %4579  ;;  %v5388_v45 = vcombine.low %v1572_v52, %v1576_v12 }
 0x35f   :  { %v3962_v59 = vpop.f32.mrf.mxu1  ;;  %v4187_v58 = vpop.f32.mrf.mxu0 }
 0x360   :  { %v4945_v8 = vsel %vm4941_vm0, %v4879_v51, 0.0  ;;  %v4432_v49 = vmax.f32 %v4186_v15, 0.0  ;;  %v4585_v59 = vpop.permute.xlu1 %4584 }
 0x361   :  { %v4946_v30 = vadd.f32 %v4945_v8, %v4944_v10  ;;  %v3965_v62 = vpop.f32.mrf.mxu1  ;;  %v4190_v42 = vpop.f32.mrf.mxu0  ;;  %4381 = vmatmul.mubr.bf16.gmra.mxu0 %v5380_v5 }
 0x362   :  { %v4880_v28 = vmul.f32 %v4575_v35, %v4432_v49  ;;  %v7278_v24 = vadd.f32 %v3965_v62, %v7015_v36  ;;  %v4191_v56 = vadd.f32 %v4190_v42, %v7190_v39  ;;  %4388 = vmatprep.mubr.bf16.mxu0 %v5389_v55  ;;  %v5397_v39 = vcombine.high %v1580_v6, %v1584_v31  ;;  %v1588_v42 = vld [vmem:[#allocation3 + $0x758] sm:$0xff] }
 0x363   :  { %v3967_v21 = vpop.f32.mrf.mxu1  ;;  %v4192_v16 = vpop.f32.mrf.mxu0 }
 0x364   :  { %v4947_v41 = vsel %vm4941_vm0, %v4880_v28, 0.0  ;;  %v4433_v25 = vmax.f32 %v4191_v56, 0.0  ;;  %v1592_v28 = vld [vmem:[#allocation3 + $0x778] sm:$0xff]  ;;  %v4590_v56 = vpop.permute.xlu0 %4589 }
 0x365   :  { %v4948_v34 = vadd.f32 %v4947_v41, %v4946_v30  ;;  %v3968_v10 = vpop.f32.mrf.mxu1  ;;  %v4193_v54 = vpop.f32.mrf.mxu0 }
 0x366   :  { %v4881_v5 = vmul.f32 %v4580_v57, %v4433_v25  ;;  %v7283_v51 = vadd.f32 %v3968_v10, %v7023_v53  ;;  %v4194_v36 = vadd.f32 %v4193_v54, %v7197_v60 }
 0x367   :  { %v3970_v15 = vpop.f32.mrf.mxu1  ;;  %v4195_v55 = vpop.f32.mrf.mxu0 }
 0x368   :  { %v4949_v58 = vsel %vm4941_vm0, %v4881_v5, 0.0  ;;  %v4434_v35 = vmax.f32 %v4194_v36, 0.0  ;;  %v4595_v36 = vpop.permute.xlu1 %4594 }
 0x369   :  { %v4950_v8 = vadd.f32 %v4949_v58, %v4948_v34  ;;  %v3973_v49 = vpop.f32.mrf.mxu1  ;;  %v4198_v62 = vpop.f32.mrf.mxu0  ;;  %4389 = vmatmul.mubr.bf16.gmra.mxu0 %v5388_v45  ;;  %v5396_v34 = vcombine.low %v1580_v6, %v1584_v31 }
 0x36a   :  { %v4882_v30 = vmul.f32 %v4585_v59, %v4434_v35  ;;  %v7288_v52 = vadd.f32 %v3973_v49, %v7027_v4  ;;  %v4199_v53 = vadd.f32 %v4198_v62, %v7202_v26  ;;  %4396 = vmatprep.mubr.bf16.mxu0 %v5397_v39  ;;  %v5405_v26 = vcombine.high %v1588_v42, %v1592_v28  ;;  %v1600_v49 = vld [vmem:[#allocation3 + $0x7b8] sm:$0xff]  ;;  %v4600_v62 = vpop.permute.xlu0 %4599 }
 0x36b   :  { %v3975_v12 = vpop.f32.mrf.mxu1  ;;  %v4200_v60 = vpop.f32.mrf.mxu0 }
 0x36c   :  { %v4951_v21 = vsel %vm4941_vm0, %v4882_v30, 0.0  ;;  %v4435_v16 = vmax.f32 %v4199_v53, 0.0 }
 0x36d   :  { %v4952_v57 = vadd.f32 %v4951_v21, %v4950_v8  ;;  %v3976_v41 = vpop.f32.mrf.mxu1  ;;  %v4201_v25 = vpop.f32.mrf.mxu0  ;;  %v1596_v8 = vld [vmem:[#allocation3 + $0x798] sm:$0xff]  ;;  %v5404_v21 = vcombine.low %v1588_v42, %v1592_v28 }
 0x36e   :  { %v4883_v10 = vmul.f32 %v4590_v56, %v4435_v16  ;;  %v7293_v54 = vadd.f32 %v3976_v41, %v7035_v17  ;;  %v4202_v4 = vadd.f32 %v4201_v25, %v7209_v22 }
 0x36f   :  { %v3978_v45 = vpop.f32.mrf.mxu1  ;;  %v4203_v5 = vpop.f32.mrf.mxu0 }
 0x370   :  { %v4953_v39 = vsel %vm4941_vm0, %v4883_v10, 0.0  ;;  %v4436_v15 = vmax.f32 %v4202_v4, 0.0 }
 0x371   :  { %v4954_v55 = vadd.f32 %v4953_v39, %v4952_v57  ;;  %v3981_v59 = vpop.f32.mrf.mxu1  ;;  %v4206_v58 = vpop.f32.mrf.mxu0  ;;  %4397 = vmatmul.mubr.bf16.gmra.mxu0 %v5396_v34  ;;  %v7601_v39 = vld [vmem:[#allocation14_spill] sm:$0xff] }
 0x372   :  { %v4884_v35 = vmul.f32 %v4595_v36, %v4436_v15  ;;  %v7298_v6 = vadd.f32 %v3981_v59, %v7039_v18  ;;  %v4207_v17 = vadd.f32 %v4206_v58, %v7214_v14  ;;  %4404 = vmatprep.mubr.bf16.mxu0 %v5405_v26  ;;  %v5413_v14 = vcombine.high %v1596_v8, %v1600_v49  ;;  %v4605_v34 = vpop.permute.xlu1 %4604  ;;  %v1604_v15 = vld [vmem:[#allocation3 + $0x7d8] sm:$0xff]  ;;  %v4610_v59 = vpop.permute.xlu0 %4609 }
 0x373   :  { %v3983_v31 = vpop.f32.mrf.mxu1  ;;  %v4208_v22 = vpop.f32.mrf.mxu0 }
 0x374   :  { %v4955_v30 = vsel %vm4941_vm0, %v4884_v35, 0.0  ;;  %v4437_v53 = vmax.f32 %v4207_v17, 0.0 }
 0x375   :  { %v4956_v12 = vadd.f32 %v4955_v30, %v4954_v55  ;;  %v3984_v60 = vpop.f32.mrf.mxu1  ;;  %v4209_v56 = vpop.f32.mrf.mxu0  ;;  %v1608_v55 = vld [vmem:[#allocation3 + $0x7f8] sm:$0xff] }
 0x376   :  { %v4885_v16 = vmul.f32 %v4600_v62, %v4437_v53  ;;  %v7303_v57 = vadd.f32 %v3984_v60, %v7047_v29  ;;  %v4210_v18 = vadd.f32 %v4209_v56, %v7221_v20  ;;  %v5412_v62 = vcombine.low %v1596_v8, %v1600_v49  ;;  %v7602_v53 = vld [vmem:[#allocation9_spill] sm:$0xff] }
 0x377   :  { %v3986_v41 = vpop.f32.mrf.mxu1  ;;  %v4211_v25 = vpop.f32.mrf.mxu0 }
 0x378   :  { %v4957_v10 = vsel %vm4941_vm0, %v4885_v16, 0.0  ;;  %v4438_v4 = vmax.f32 %v4210_v18, 0.0  ;;  %v4615_v16 = vpop.permute.xlu1 %4614 }
 0x379   :  { %v4958_v26 = vadd.f32 %v4957_v10, %v4956_v12  ;;  %v3989_v45 = vpop.f32.mrf.mxu1  ;;  %v4214_v5 = vpop.f32.mrf.mxu0  ;;  %4405 = vmatmul.mubr.bf16.gmra.mxu0 %v5404_v21 }
 0x37a   :  { %v4886_v36 = vmul.f32 %v4605_v34, %v4438_v4  ;;  %v7308_v42 = vadd.f32 %v3989_v45, %v7601_v39  ;;  %v4215_v29 = vadd.f32 %v4214_v5, %v7226_v7  ;;  %4412 = vmatprep.mubr.bf16.mxu0 %v5413_v14  ;;  %v5421_v7 = vcombine.high %v1604_v15, %v1608_v55  ;;  %v7603_v4 = vld [vmem:[#allocation11_spill] sm:$0xff]  ;;  %v4620_v45 = vpop.permute.xlu0 %4619 }
 0x37b   :  { %v3991_v28 = vpop.f32.mrf.mxu1  ;;  %v4216_v20 = vpop.f32.mrf.mxu0 }
 0x37c   :  { %v4959_v58 = vsel %vm4941_vm0, %v4886_v36, 0.0  ;;  %v4439_v35 = vmax.f32 %v4215_v29, 0.0  ;;  %v5420_v20 = vcombine.low %v1604_v15, %v1608_v55 }
 0x37d   :  { %v4960_v17 = vadd.f32 %v4959_v58, %v4958_v26  ;;  %v3992_v31 = vpop.f32.mrf.mxu1  ;;  %v4217_v22 = vpop.f32.mrf.mxu0  ;;  %v7604_v58 = vld [vmem:[#allocation10_spill] sm:$0xff] }
 0x37e   :  { %v4887_v30 = vmul.f32 %v4610_v59, %v4439_v35  ;;  %v7313_v12 = vadd.f32 %v3992_v31, %v7602_v53  ;;  %v4218_v60 = vadd.f32 %v4217_v22, %v7233_v11 }
 0x37f   :  { %v3994_v56 = vpop.f32.mrf.mxu1  ;;  %v4219_v21 = vpop.f32.mrf.mxu0 }
 0x380   :  { %v4961_v18 = vsel %vm4941_vm0, %v4887_v30, 0.0  ;;  %v4440_v14 = vmax.f32 %v4218_v60, 0.0  ;;  %v7605_v21 = vld [vmem:[#allocation12_spill] sm:$0xff] }
 0x381   :  { %v4962_v41 = vadd.f32 %v4961_v18, %v4960_v17  ;;  %v3997_v25 = vpop.f32.mrf.mxu1  ;;  %v4222_v34 = vpop.f32.mrf.mxu0  ;;  %4413 = vmatmul.mubr.bf16.gmra.mxu0 %v5412_v62 }
 0x382   :  { %v4888_v10 = vmul.f32 %v4615_v16, %v4440_v14  ;;  %v7318_v8 = vadd.f32 %v3997_v25, %v7603_v4  ;;  %v4223_v49 = vadd.f32 %v4222_v34, %v7238_v43  ;;  %4420 = vmatprep.mubr.bf16.mxu0 %v5421_v7  ;;  %v4625_v43 = vpop.permute.xlu1 %4624  ;;  %v4630_v14 = vpop.permute.xlu0 %4629 }
 0x383   :  { %v3999_v26 = vpop.f32.mrf.mxu1  ;;  %v4224_v11 = vpop.f32.mrf.mxu0 }
 0x384   :  { %v4963_v5 = vsel %vm4941_vm0, %v4888_v10, 0.0  ;;  %v4441_v36 = vmax.f32 %v4223_v49, 0.0  ;;  %v7606_v49 = vld [vmem:[#allocation15_spill] sm:$0xff] }
 0x385   :  { %v4964_v39 = vadd.f32 %v4963_v5, %v4962_v41  ;;  %v4000_v29 = vpop.f32.mrf.mxu1  ;;  %v4225_v28 = vpop.f32.mrf.mxu0 }
 0x386   :  { %v4889_v59 = vmul.f32 %v4620_v45, %v4441_v36  ;;  %v7323_v35 = vadd.f32 %v4000_v29, %v7604_v58  ;;  %v4226_v17 = vadd.f32 %v4225_v28, %v7245_v1  ;;  %v4635_v36 = vpop.permute.xlu1 %4634  ;;  %v7607_v58 = vld [vmem:[#allocation7_spill] sm:$0xff] }
 0x387   :  { %v4002_v31 = vpop.f32.mrf.mxu1  ;;  %v4227_v22 = vpop.f32.mrf.mxu0 }
 0x388   :  { %v4965_v62 = vsel %vm4941_vm0, %v4889_v59, 0.0  ;;  %v4442_v30 = vmax.f32 %v4226_v17, 0.0 }
 0x389   :  { %v4966_v53 = vadd.f32 %v4965_v62, %v4964_v39  ;;  %v4005_v60 = vpop.f32.mrf.mxu1  ;;  %v4230_v7 = vpop.f32.mrf.mxu0  ;;  %4421 = vmatmul.mubr.bf16.gmra.mxu0 %v5420_v20 }
 0x38a   :  { %v4890_v56 = vmul.f32 %v4625_v43, %v4442_v30  ;;  %v7328_v16 = vadd.f32 %v4005_v60, %v7605_v21  ;;  %v4231_v15 = vadd.f32 %v4230_v7, %v7250_v40  ;;  %v4640_v62 = vpop.permute.xlu0 %4639  ;;  %v7608_v21 = vld [vmem:[#allocation16_spill] sm:$0xff] }
 0x38b   :  { %v4007_v55 = vpop.f32.mrf.mxu1  ;;  %v4232_v18 = vpop.f32.mrf.mxu0 }
 0x38c   :  { %v4967_v1 = vsel %vm4941_vm0, %v4890_v56, 0.0  ;;  %v4443_v41 = vmax.f32 %v4231_v15, 0.0 }
 0x38d   :  { %v4968_v25 = vadd.f32 %v4967_v1, %v4966_v53  ;;  %v4008_v34 = vpop.f32.mrf.mxu1  ;;  %v4233_v10 = vpop.f32.mrf.mxu0 }
 0x38e   :  { %v4891_v4 = vmul.f32 %v4630_v14, %v4443_v41  ;;  %v7333_v26 = vadd.f32 %v4008_v34, %v7606_v49  ;;  %v4234_v11 = vadd.f32 %v4233_v10, %v7256_v37  ;;  %v4645_v1 = vpop.permute.xlu1 %4644  ;;  %v7609_v49 = vld [vmem:[#allocation17_spill] sm:$0xff] }
 0x38f   :  { %v4010_v45 = vpop.f32.mrf.mxu1  ;;  %v4235_v5 = vpop.f32.mrf.mxu0 }
 0x390   :  { %v4969_v40 = vsel %vm4941_vm0, %v4891_v4, 0.0  ;;  %v4444_v39 = vmax.f32 %v4234_v11, 0.0 }
 0x391   :  { %v4970_v29 = vadd.f32 %v4969_v40, %v4968_v25  ;;  %v4013_v28 = vpop.f32.mrf.mxu1  ;;  %v4238_v20 = vpop.f32.mrf.mxu0 }
 0x392   :  { %v4892_v59 = vmul.f32 %v4635_v36, %v4444_v39  ;;  %v7338_v17 = vadd.f32 %v4013_v28, %v7607_v58  ;;  %v4239_v31 = vadd.f32 %v4238_v20, %v7259_v0  ;;  %v4650_v40 = vpop.permute.xlu0 %4649  ;;  %v7610_v58 = vld [vmem:[#allocation18_spill] sm:$0xff] }
 0x393   :  { %v4015_v22 = vpop.f32.mrf.mxu1  ;;  %v4240_v43 = vpop.f32.mrf.mxu0 }
 0x394   :  { %v4971_v37 = vsel %vm4941_vm0, %v4892_v59, 0.0  ;;  %v4445_v30 = vmax.f32 %v4239_v31, 0.0 }
 0x395   :  { %v4972_v53 = vadd.f32 %v4971_v37, %v4970_v29  ;;  %v4016_v60 = vpop.f32.mrf.mxu1  ;;  %v4241_v7 = vpop.f32.mrf.mxu0 }
 0x396   :  { %v4893_v56 = vmul.f32 %v4640_v62, %v4445_v30  ;;  %v7343_v15 = vadd.f32 %v4016_v60, %v7608_v21  ;;  %v4242_v55 = vadd.f32 %v4241_v7, %v7263_v2  ;;  %v4655_v37 = vpop.permute.xlu1 %4654  ;;  %v7611_v21 = vld [vmem:[#allocation19_spill] sm:$0xff] }
 0x397   :  { %v4018_v18 = vpop.f32.mrf.mxu1  ;;  %v4243_v14 = vpop.f32.mrf.mxu0 }
 0x398   :  { %v4973_v0 = vsel %vm4941_vm0, %v4893_v56, 0.0  ;;  %v4446_v41 = vmax.f32 %v4242_v55, 0.0 }
 0x399   :  { %v4974_v25 = vadd.f32 %v4973_v0, %v4972_v53  ;;  %v4021_v34 = vpop.f32.mrf.mxu1  ;;  %v4246_v10 = vpop.f32.mrf.mxu0 }
 0x39a   :  { %v4894_v4 = vmul.f32 %v4645_v1, %v4446_v41  ;;  %v7348_v11 = vadd.f32 %v4021_v34, %v7609_v49  ;;  %v4247_v45 = vadd.f32 %v4246_v10, %v7267_v50  ;;  %v4660_v0 = vpop.permute.xlu0 %4659  ;;  %v7612_v49 = vld [vmem:[#allocation20_spill] sm:$0xff] }
 0x39b   :  { %v4023_v5 = vpop.f32.mrf.mxu1  ;;  %v4248_v36 = vpop.f32.mrf.mxu0 }
 0x39c   :  { %v4975_v2 = vsel %vm4941_vm0, %v4894_v4, 0.0  ;;  %v4447_v39 = vmax.f32 %v4247_v45, 0.0 }
 0x39d   :  { %v4976_v29 = vadd.f32 %v4975_v2, %v4974_v25  ;;  %v4024_v28 = vpop.f32.mrf.mxu1  ;;  %v4249_v20 = vpop.f32.mrf.mxu0 }
 0x39e   :  { %v4895_v59 = vmul.f32 %v4650_v40, %v4447_v39  ;;  %v7353_v31 = vadd.f32 %v4024_v28, %v7610_v58  ;;  %v4250_v22 = vadd.f32 %v4249_v20, %v7273_v3  ;;  %v4665_v2 = vpop.permute.xlu1 %4664  ;;  %v7613_v58 = vld [vmem:[#allocation21_spill] sm:$0xff] }
 0x39f   :  { %v4026_v43 = vpop.f32.mrf.mxu1  ;;  %v4251_v62 = vpop.f32.mrf.mxu0 }
 0x3a0   :  { %v4977_v50 = vsel %vm4941_vm0, %v4895_v59, 0.0  ;;  %v4448_v30 = vmax.f32 %v4250_v22, 0.0 }
 0x3a1   :  { %v4978_v53 = vadd.f32 %v4977_v50, %v4976_v29  ;;  %v4029_v60 = vpop.f32.mrf.mxu1  ;;  %v4254_v7 = vpop.f32.mrf.mxu0 }
 0x3a2   :  { %v4896_v56 = vmul.f32 %v4655_v37, %v4448_v30  ;;  %v7358_v55 = vadd.f32 %v4029_v60, %v7611_v21  ;;  %v4255_v18 = vadd.f32 %v4254_v7, %v7278_v24  ;;  %v4670_v50 = vpop.permute.xlu0 %4669  ;;  %v7614_v21 = vld [vmem:[#allocation22_spill] sm:$0xff] }
 0x3a3   :  { %v4031_v14 = vpop.f32.mrf.mxu1  ;;  %v4256_v1 = vpop.f32.mrf.mxu0 }
 0x3a4   :  { %v4979_v3 = vsel %vm4941_vm0, %v4896_v56, 0.0  ;;  %v4449_v41 = vmax.f32 %v4255_v18, 0.0 }
 0x3a5   :  { %v4980_v25 = vadd.f32 %v4979_v3, %v4978_v53  ;;  %v4032_v34 = vpop.f32.mrf.mxu1  ;;  %v4257_v10 = vpop.f32.mrf.mxu0 }
 0x3a6   :  { %v4897_v4 = vmul.f32 %v4660_v0, %v4449_v41  ;;  %v7363_v45 = vadd.f32 %v4032_v34, %v7612_v49  ;;  %v4258_v5 = vadd.f32 %v4257_v10, %v7283_v51  ;;  %v4675_v3 = vpop.permute.xlu1 %4674  ;;  %v7615_v49 = vld [vmem:[#allocation23_spill] sm:$0xff] }
 0x3a7   :  { %v4034_v36 = vpop.f32.mrf.mxu1  ;;  %v4259_v40 = vpop.f32.mrf.mxu0 }
 0x3a8   :  { %v4981_v24 = vsel %vm4941_vm0, %v4897_v4, 0.0  ;;  %v4450_v39 = vmax.f32 %v4258_v5, 0.0 }
 0x3a9   :  { %v4982_v29 = vadd.f32 %v4981_v24, %v4980_v25  ;;  %v4037_v28 = vpop.f32.mrf.mxu1  ;;  %v4262_v20 = vpop.f32.mrf.mxu0 }
 0x3aa   :  { %v4898_v59 = vmul.f32 %v4665_v2, %v4450_v39  ;;  %v7368_v22 = vadd.f32 %v4037_v28, %v7613_v58  ;;  %v4263_v43 = vadd.f32 %v4262_v20, %v7288_v52  ;;  %v4680_v24 = vpop.permute.xlu0 %4679  ;;  %v7616_v58 = vld [vmem:[#allocation24_spill] sm:$0xff] }
 0x3ab   :  { %v4039_v62 = vpop.f32.mrf.mxu1  ;;  %v4264_v37 = vpop.f32.mrf.mxu0 }
 0x3ac   :  { %v4983_v51 = vsel %vm4941_vm0, %v4898_v59, 0.0  ;;  %v4451_v30 = vmax.f32 %v4263_v43, 0.0 }
 0x3ad   :  { %v4984_v53 = vadd.f32 %v4983_v51, %v4982_v29  ;;  %v4040_v60 = vpop.f32.mrf.mxu1  ;;  %v4265_v7 = vpop.f32.mrf.mxu0 }
 0x3ae   :  { %v4899_v56 = vmul.f32 %v4670_v50, %v4451_v30  ;;  %v7373_v18 = vadd.f32 %v4040_v60, %v7614_v21  ;;  %v4266_v14 = vadd.f32 %v4265_v7, %v7293_v54  ;;  %v4685_v51 = vpop.permute.xlu1 %4684  ;;  %v7617_v21 = vld [vmem:[#allocation25_spill] sm:$0xff] }
 0x3af   :  { %v4042_v1 = vpop.f32.mrf.mxu1  ;;  %v4267_v0 = vpop.f32.mrf.mxu0 }
 0x3b0   :  { %v4985_v52 = vsel %vm4941_vm0, %v4899_v56, 0.0  ;;  %v4452_v41 = vmax.f32 %v4266_v14, 0.0 }
 0x3b1   :  { %v4986_v25 = vadd.f32 %v4985_v52, %v4984_v53  ;;  %v4045_v34 = vpop.f32.mrf.mxu1  ;;  %v4270_v10 = vpop.f32.mrf.mxu0 }
 0x3b2   :  { %v4900_v4 = vmul.f32 %v4675_v3, %v4452_v41  ;;  %v7378_v5 = vadd.f32 %v4045_v34, %v7615_v49  ;;  %v4271_v36 = vadd.f32 %v4270_v10, %v7298_v6  ;;  %v4690_v52 = vpop.permute.xlu0 %4689  ;;  %v7618_v49 = vld [vmem:[#allocation26_spill] sm:$0xff] }
 0x3b3   :  { %v4047_v40 = vpop.f32.mrf.mxu1  ;;  %v4272_v2 = vpop.f32.mrf.mxu0 }
 0x3b4   :  { %v4987_v54 = vsel %vm4941_vm0, %v4900_v4, 0.0  ;;  %v4453_v39 = vmax.f32 %v4271_v36, 0.0 }
 0x3b5   :  { %v4988_v29 = vadd.f32 %v4987_v54, %v4986_v25  ;;  %v4048_v28 = vpop.f32.mrf.mxu1  ;;  %v4273_v20 = vpop.f32.mrf.mxu0 }
 0x3b6   :  { %v4901_v59 = vmul.f32 %v4680_v24, %v4453_v39  ;;  %v7383_v43 = vadd.f32 %v4048_v28, %v7616_v58  ;;  %v4274_v62 = vadd.f32 %v4273_v20, %v7303_v57  ;;  %v4695_v54 = vpop.permute.xlu1 %4694  ;;  %v7619_v58 = vld [vmem:[#allocation27_spill] sm:$0xff] }
 0x3b7   :  { %v4050_v37 = vpop.f32.mrf.mxu1  ;;  %v4275_v50 = vpop.f32.mrf.mxu0 }
 0x3b8   :  { %v4989_v6 = vsel %vm4941_vm0, %v4901_v59, 0.0  ;;  %v4454_v30 = vmax.f32 %v4274_v62, 0.0 }
 0x3b9   :  { %v4990_v53 = vadd.f32 %v4989_v6, %v4988_v29  ;;  %v4053_v60 = vpop.f32.mrf.mxu1  ;;  %v4278_v7 = vpop.f32.mrf.mxu0 }
 0x3ba   :  { %v4902_v56 = vmul.f32 %v4685_v51, %v4454_v30  ;;  %v7388_v14 = vadd.f32 %v4053_v60, %v7617_v21  ;;  %v4279_v1 = vadd.f32 %v4278_v7, %v7308_v42  ;;  %v4700_v6 = vpop.permute.xlu0 %4699  ;;  %v7620_v21 = vld [vmem:[#allocation28_spill] sm:$0xff] }
 0x3bb   :  { %v4055_v0 = vpop.f32.mrf.mxu1  ;;  %v4280_v3 = vpop.f32.mrf.mxu0 }
 0x3bc   :  { %v4991_v57 = vsel %vm4941_vm0, %v4902_v56, 0.0  ;;  %v4455_v41 = vmax.f32 %v4279_v1, 0.0 }
 0x3bd   :  { %v4992_v25 = vadd.f32 %v4991_v57, %v4990_v53  ;;  %v4056_v34 = vpop.f32.mrf.mxu1  ;;  %v4281_v10 = vpop.f32.mrf.mxu0 }
 0x3be   :  { %v4903_v4 = vmul.f32 %v4690_v52, %v4455_v41  ;;  %v7393_v36 = vadd.f32 %v4056_v34, %v7618_v49  ;;  %v4282_v40 = vadd.f32 %v4281_v10, %v7313_v12  ;;  %v4705_v57 = vpop.permute.xlu1 %4704  ;;  %v7621_v49 = vld [vmem:[#allocation29_spill] sm:$0xff] }
 0x3bf   :  { %v4058_v2 = vpop.f32.mrf.mxu1  ;;  %v4283_v24 = vpop.f32.mrf.mxu0 }
 0x3c0   :  { %v4993_v42 = vsel %vm4941_vm0, %v4903_v4, 0.0  ;;  %v4456_v39 = vmax.f32 %v4282_v40, 0.0 }
 0x3c1   :  { %v4994_v29 = vadd.f32 %v4993_v42, %v4992_v25  ;;  %v4061_v28 = vpop.f32.mrf.mxu1  ;;  %v4286_v20 = vpop.f32.mrf.mxu0 }
 0x3c2   :  { %v4904_v59 = vmul.f32 %v4695_v54, %v4456_v39  ;;  %v7398_v62 = vadd.f32 %v4061_v28, %v7619_v58  ;;  %v4287_v37 = vadd.f32 %v4286_v20, %v7318_v8  ;;  %v4710_v42 = vpop.permute.xlu0 %4709  ;;  %v7622_v58 = vld [vmem:[#allocation30_spill] sm:$0xff] }
 0x3c3   :  { %v4063_v50 = vpop.f32.mrf.mxu1  ;;  %v4288_v51 = vpop.f32.mrf.mxu0 }
 0x3c4   :  { %v4995_v12 = vsel %vm4941_vm0, %v4904_v59, 0.0  ;;  %v4457_v30 = vmax.f32 %v4287_v37, 0.0 }
 0x3c5   :  { %v4996_v53 = vadd.f32 %v4995_v12, %v4994_v29  ;;  %v4064_v60 = vpop.f32.mrf.mxu1  ;;  %v4289_v7 = vpop.f32.mrf.mxu0 }
 0x3c6   :  { %v4905_v56 = vmul.f32 %v4700_v6, %v4457_v30  ;;  %v7403_v1 = vadd.f32 %v4064_v60, %v7620_v21  ;;  %v4290_v0 = vadd.f32 %v4289_v7, %v7323_v35  ;;  %v4715_v12 = vpop.permute.xlu1 %4714  ;;  %v7623_v21 = vld [vmem:[#allocation31_spill] sm:$0xff] }
 0x3c7   :  { %v4066_v3 = vpop.f32.mrf.mxu1  ;;  %v4291_v52 = vpop.f32.mrf.mxu0 }
 0x3c8   :  { %v4997_v8 = vsel %vm4941_vm0, %v4905_v56, 0.0  ;;  %v4458_v41 = vmax.f32 %v4290_v0, 0.0 }
 0x3c9   :  { %v4998_v25 = vadd.f32 %v4997_v8, %v4996_v53  ;;  %v4069_v34 = vpop.f32.mrf.mxu1  ;;  %v4294_v10 = vpop.f32.mrf.mxu0 }
 0x3ca   :  { %v4906_v4 = vmul.f32 %v4705_v57, %v4458_v41  ;;  %v7408_v40 = vadd.f32 %v4069_v34, %v7621_v49  ;;  %v4295_v2 = vadd.f32 %v4294_v10, %v7328_v16  ;;  %v4720_v8 = vpop.permute.xlu0 %4719 }
 0x3cb   :  { %v4071_v24 = vpop.f32.mrf.mxu1  ;;  %v4296_v54 = vpop.f32.mrf.mxu0 }
 0x3cc   :  { %v4999_v35 = vsel %vm4941_vm0, %v4906_v4, 0.0  ;;  %v4459_v39 = vmax.f32 %v4295_v2, 0.0 }
 0x3cd   :  { %v5000_v29 = vadd.f32 %v4999_v35, %v4998_v25  ;;  %v4072_v28 = vpop.f32.mrf.mxu1  ;;  %v4297_v20 = vpop.f32.mrf.mxu0 }
 0x3ce   :  { %v4907_v59 = vmul.f32 %v4710_v42, %v4459_v39  ;;  %v7413_v37 = vadd.f32 %v4072_v28, %v7622_v58  ;;  %v4298_v50 = vadd.f32 %v4297_v20, %v7333_v26  ;;  %v4725_v42 = vpop.permute.xlu1 %4724 }
 0x3cf   :  { %v4074_v51 = vpop.f32.mrf.mxu1  ;;  %v4299_v6 = vpop.f32.mrf.mxu0 }
 0x3d0   :  { %v5001_v16 = vsel %vm4941_vm0, %v4907_v59, 0.0  ;;  %v4460_v30 = vmax.f32 %v4298_v50, 0.0  ;;  %v7624_v59 = vld [vmem:[#allocation8_spill] sm:$0xff]  ;;  %v4730_v6 = vpop.permute.xlu0 %4729 }
 0x3d1   :  { %v5002_v53 = vadd.f32 %v5001_v16, %v5000_v29  ;;  %v4077_v60 = vpop.f32.mrf.mxu1  ;;  %v4302_v7 = vpop.f32.mrf.mxu0 }
 0x3d2   :  { %v4908_v56 = vmul.f32 %v4715_v12, %v4460_v30  ;;  %v7418_v0 = vadd.f32 %v4077_v60, %v7623_v21  ;;  %v4303_v3 = vadd.f32 %v4302_v7, %v7338_v17 }
 0x3d3   :  { %v4079_v52 = vpop.f32.mrf.mxu1  ;;  %v4304_v57 = vpop.f32.mrf.mxu0 }
 0x3d4   :  { %v5003_v26 = vsel %vm4941_vm0, %v4908_v56, 0.0  ;;  %v4461_v41 = vmax.f32 %v4303_v3, 0.0  ;;  %v4735_v52 = vpop.permute.xlu1 %4734 }
 0x3d5   :  { %v5004_v25 = vadd.f32 %v5003_v26, %v5002_v53  ;;  %v4080_v34 = vpop.f32.mrf.mxu1  ;;  %v4305_v10 = vpop.f32.mrf.mxu0 }
 0x3d6   :  { %v4909_v4 = vmul.f32 %v4720_v8, %v4461_v41  ;;  %v7423_v49 = vadd.f32 %v4080_v34, %v7170_v63  ;;  %v4306_v2 = vadd.f32 %v4305_v10, %v7343_v15 }
 0x3d7   :  { %v4082_v24 = vpop.f32.mrf.mxu1  ;;  %v4307_v54 = vpop.f32.mrf.mxu0 }
 0x3d8   :  { %v5005_v17 = vsel %vm4941_vm0, %v4909_v4, 0.0  ;;  %v4462_v35 = vmax.f32 %v4306_v2, 0.0  ;;  %v4740_v2 = vpop.permute.xlu0 %4739 }
 0x3d9   :  { %v5006_v39 = vadd.f32 %v5005_v17, %v5004_v25  ;;  %v4085_v29 = vpop.f32.mrf.mxu1  ;;  %v4310_v28 = vpop.f32.mrf.mxu0 }
 0x3da   :  { %v4910_v20 = vmul.f32 %v4725_v42, %v4462_v35  ;;  %v7428_v58 = vadd.f32 %v4085_v29, %v7624_v59  ;;  %v4311_v50 = vadd.f32 %v4310_v28, %v7348_v11 }
 0x3db   :  { %v4087_v51 = vpop.f32.mrf.mxu1  ;;  %v4312_v63 = vpop.f32.mrf.mxu0 }
 0x3dc   :  { %v5007_v15 = vsel %vm4941_vm0, %v4910_v20, 0.0  ;;  %v4463_v12 = vmax.f32 %v4311_v50, 0.0  ;;  %v4745_v20 = vpop.permute.xlu1 %4744 }
 0x3dd   :  { %v5008_v16 = vadd.f32 %v5007_v15, %v5006_v39  ;;  %v4088_v30 = vpop.f32.mrf.mxu1  ;;  %v4313_v53 = vpop.f32.mrf.mxu0 }
 0x3de   :  { %v4911_v60 = vmul.f32 %v4730_v6, %v4463_v12  ;;  %v7433_v7 = vadd.f32 %v4088_v30, %v7182_v19  ;;  %v4314_v56 = vadd.f32 %v4313_v53, %v7353_v31  ;;  %v4750_v30 = vpop.permute.xlu0 %4749 }
 0x3df   :  { %v4090_v21 = vpop.f32.mrf.mxu1  ;;  %v4315_v3 = vpop.f32.mrf.mxu0 }
 0x3e0   :  { %v5009_v11 = vsel %vm4941_vm0, %v4911_v60, 0.0  ;;  %v4464_v57 = vmax.f32 %v4314_v56, 0.0 }
 0x3e1   :  { %v5010_v8 = vadd.f32 %v5009_v11, %v5008_v16  ;;  %v4093_v26 = vpop.f32.mrf.mxu1  ;;  %v4318_v41 = vpop.f32.mrf.mxu0 }
 0x3e2   :  { %v4912_v25 = vmul.f32 %v4735_v52, %v4464_v57  ;;  %v7438_v34 = vadd.f32 %v4093_v26, %v7187_v61  ;;  %v4319_v10 = vadd.f32 %v4318_v41, %v7358_v55 }
 0x3e3   :  { %v4095_v4 = vpop.f32.mrf.mxu1  ;;  %v4320_v19 = vpop.f32.mrf.mxu0 }
 0x3e4   :  { %v5011_v31 = vsel %vm4941_vm0, %v4912_v25, 0.0  ;;  %v4465_v24 = vmax.f32 %v4319_v10, 0.0 }
 0x3e5   :  { %v5012_v54 = vadd.f32 %v5011_v31, %v5010_v8  ;;  %v4096_v42 = vpop.f32.mrf.mxu1  ;;  %v4321_v17 = vpop.f32.mrf.mxu0 }
 0x3e6   :  { %v4913_v35 = vmul.f32 %v4740_v2, %v4465_v24  ;;  %v7443_v39 = vadd.f32 %v4096_v42, %v7194_v32  ;;  %v4322_v29 = vadd.f32 %v4321_v17, %v7363_v45  ;;  %v4755_v8 = vpop.permute.xlu1 %4754  ;;  %v4760_v24 = vpop.permute.xlu0 %4759 }
 0x3e7   :  { %v4098_v28 = vpop.f32.mrf.mxu1  ;;  %v4323_v61 = vpop.f32.mrf.mxu0 }
 0x3e8   :  { %v5013_v55 = vsel %vm4941_vm0, %v4913_v35, 0.0  ;;  %v4466_v59 = vmax.f32 %v4322_v29, 0.0 }
 0x3e9   :  { %v5014_v50 = vadd.f32 %v5013_v55, %v5012_v54  ;;  %v4101_v51 = vpop.f32.mrf.mxu1  ;;  %v4326_v63 = vpop.f32.mrf.mxu0 }
 0x3ea   :  { %v4914_v6 = vmul.f32 %v4745_v20, %v4466_v59  ;;  %v7448_v15 = vadd.f32 %v4101_v51, %v7199_v27  ;;  %v4327_v12 = vadd.f32 %v4326_v63, %v7368_v22  ;;  %v4765_v55 = vpop.permute.xlu1 %4764 }
 0x3eb   :  { %v4103_v16 = vpop.f32.mrf.mxu1  ;;  %v4328_v32 = vpop.f32.mrf.mxu0 }
 0x3ec   :  { %v5015_v45 = vsel %vm4941_vm0, %v4914_v6, 0.0  ;;  %v4467_v53 = vmax.f32 %v4327_v12, 0.0 }
 0x3ed   :  { %v5016_v60 = vadd.f32 %v5015_v45, %v5014_v50  ;;  %v4104_v56 = vpop.f32.mrf.mxu1  ;;  %v4329_v21 = vpop.f32.mrf.mxu0 }
 0x3ee   :  { %v4915_v3 = vmul.f32 %v4750_v30, %v4467_v53  ;;  %v7453_v52 = vadd.f32 %v4104_v56, %v7206_v23  ;;  %v4330_v11 = vadd.f32 %v4329_v21, %v7373_v18  ;;  %v4770_v30 = vpop.permute.xlu0 %4769 }
 0x3ef   :  { %v4106_v57 = vpop.f32.mrf.mxu1  ;;  %v4331_v27 = vpop.f32.mrf.mxu0 }
 0x3f0   :  { %v5017_v22 = vsel %vm4941_vm0, %v4915_v3, 0.0  ;;  %v4468_v26 = vmax.f32 %v4330_v11, 0.0  ;;  %v4775_v27 = vpop.permute.xlu1 %4774 }
 0x3f1   :  { %v5018_v41 = vadd.f32 %v5017_v22, %v5016_v60  ;;  %v4109_v25 = vpop.f32.mrf.mxu1  ;;  %v4334_v10 = vpop.f32.mrf.mxu0 }
 0x3f2   :  { %v4916_v4 = vmul.f32 %v4755_v8, %v4468_v26  ;;  %v7458_v19 = vadd.f32 %v4109_v25, %v7211_v13  ;;  %v4335_v2 = vadd.f32 %v4334_v10, %v7378_v5 }
 0x3f3   :  { %v4111_v31 = vpop.f32.mrf.mxu1  ;;  %v4336_v23 = vpop.f32.mrf.mxu0 }
 0x3f4   :  { %v5019_v18 = vsel %vm4941_vm0, %v4916_v4, 0.0  ;;  %v4469_v54 = vmax.f32 %v4335_v2, 0.0  ;;  %v4780_v31 = vpop.permute.xlu0 %4779 }
 0x3f5   :  { %v5020_v42 = vadd.f32 %v5019_v18, %v5018_v41  ;;  %v4112_v17 = vpop.f32.mrf.mxu1  ;;  %v4337_v35 = vpop.f32.mrf.mxu0 }
 0x3f6   :  { %v4917_v29 = vmul.f32 %v4760_v24, %v4469_v54  ;;  %v7463_v28 = vadd.f32 %v4112_v17, %v7218_v46  ;;  %v4338_v61 = vadd.f32 %v4337_v35, %v7383_v43 }
 0x3f7   :  { %v4114_v20 = vpop.f32.mrf.mxu1  ;;  %v4339_v13 = vpop.f32.mrf.mxu0 }
 0x3f8   :  { %v5021_v5 = vsel %vm4941_vm0, %v4917_v29, 0.0  ;;  %v4470_v59 = vmax.f32 %v4338_v61, 0.0  ;;  %v4785_v61 = vpop.permute.xlu1 %4784 }
 0x3f9   :  { %v5022_v50 = vadd.f32 %v5021_v5, %v5020_v42  ;;  %v4117_v51 = vpop.f32.mrf.mxu1  ;;  %v4342_v63 = vpop.f32.mrf.mxu0 }
 0x3fa   :  { %v4918_v6 = vmul.f32 %v4765_v55, %v4470_v59  ;;  %v7468_v12 = vadd.f32 %v4117_v51, %v7223_v33  ;;  %v4343_v16 = vadd.f32 %v4342_v63, %v7388_v14 }
 0x3fb   :  { %v4119_v32 = vpop.f32.mrf.mxu1  ;;  %v4344_v46 = vpop.f32.mrf.mxu0 }
 0x3fc   :  { %v5023_v43 = vsel %vm4941_vm0, %v4918_v6, 0.0  ;;  %v4471_v45 = vmax.f32 %v4343_v16, 0.0  ;;  %v4790_v6 = vpop.permute.xlu0 %4789 }
 0x3fd   :  { %v5024_v53 = vadd.f32 %v5023_v43, %v5022_v50  ;;  %v4120_v60 = vpop.f32.mrf.mxu1  ;;  %v4345_v56 = vpop.f32.mrf.mxu0 }
 0x3fe   :  { %v4919_v21 = vmul.f32 %v4770_v30, %v4471_v45  ;;  %v7473_v3 = vadd.f32 %v4120_v60, %v7230_v44  ;;  %v4346_v11 = vadd.f32 %v4345_v56, %v7393_v36 }
 0x3ff   :  { %v4122_v57 = vpop.f32.mrf.mxu1  ;;  %v4347_v33 = vpop.f32.mrf.mxu0 }
 0x400   :  { %v5025_v14 = vsel %vm4941_vm0, %v4919_v21, 0.0  ;;  %v4472_v8 = vmax.f32 %v4346_v11, 0.0  ;;  %v4795_v21 = vpop.permute.xlu1 %4794 }
 0x401   :  { %v5026_v22 = vadd.f32 %v5025_v14, %v5024_v53  ;;  %v4125_v26 = vpop.f32.mrf.mxu1  ;;  %v4350_v41 = vpop.f32.mrf.mxu0 }
 0x402   :  { %v4920_v25 = vmul.f32 %v4775_v27, %v4472_v8  ;;  %v7478_v10 = vadd.f32 %v4125_v26, %v7235_v9  ;;  %v4351_v4 = vadd.f32 %v4350_v41, %v7398_v62 }
 0x403   :  { %v4127_v2 = vpop.f32.mrf.mxu1  ;;  %v4352_v44 = vpop.f32.mrf.mxu0 }
 0x404   :  { %v5027_v36 = vsel %vm4941_vm0, %v4920_v25, 0.0  ;;  %v4473_v23 = vmax.f32 %v4351_v4, 0.0 }
 0x405   :  { %v5028_v24 = vadd.f32 %v5027_v36, %v5026_v22  ;;  %v4128_v18 = vpop.f32.mrf.mxu1  ;;  %v4353_v54 = vpop.f32.mrf.mxu0 }
 0x406   :  { %v4921_v42 = vmul.f32 %v4780_v31, %v4473_v23  ;;  %v7483_v17 = vadd.f32 %v4128_v18, %v7242_v47  ;;  %v4354_v35 = vadd.f32 %v4353_v54, %v7403_v1  ;;  %v4800_v22 = vpop.permute.xlu0 %4799  ;;  %v4805_v31 = vpop.permute.xlu1 %4804 }
 0x407   :  { %v4130_v29 = vpop.f32.mrf.mxu1  ;;  %v4355_v9 = vpop.f32.mrf.mxu0 }
 0x408   :  { %v5029_v62 = vsel %vm4941_vm0, %v4921_v42, 0.0  ;;  %v4474_v20 = vmax.f32 %v4354_v35, 0.0 }
 0x409   :  { %v5030_v13 = vadd.f32 %v5029_v62, %v5028_v24  ;;  %v4133_v55 = vpop.f32.mrf.mxu1  ;;  %v4358_v5 = vpop.f32.mrf.mxu0 }
 0x40a   :  { %v4922_v59 = vmul.f32 %v4785_v61, %v4474_v20  ;;  %v7488_v50 = vadd.f32 %v4133_v55, %v7247_v38  ;;  %v4359_v51 = vadd.f32 %v4358_v5, %v7408_v40  ;;  %v4810_v35 = vpop.permute.xlu0 %4809  ;;  %v4815_v55 = vpop.permute.xlu1 %4814 }
 0x40b   :  { %v4135_v63 = vpop.f32.mrf.mxu1  ;;  %v4360_v47 = vpop.f32.mrf.mxu0 }
 0x40c   :  { %v5031_v1 = vsel %vm4941_vm0, %v4922_v59, 0.0  ;;  %v4475_v16 = vmax.f32 %v4359_v51, 0.0 }
 0x40d   :  { %v5032_v32 = vadd.f32 %v5031_v1, %v5030_v13  ;;  %v7492_v46 = vpop.f32.mrf.mxu1  ;;  %v4361_v30 = vpop.f32.mrf.mxu0 }
 0x40e   :  { %v4923_v43 = vmul.f32 %v4790_v6, %v4475_v16  ;;  %v4362_v45 = vadd.f32 %v4361_v30, %v7413_v37  ;;  %v4820_v1 = vpop.permute.xlu0 %4819 }
 0x40f   :  { %v4363_v53 = vpop.f32.mrf.mxu0  ;;  %v4138_v60 = vpop.f32.mrf.mxu1 }
 0x410   :  { %v5033_v38 = vsel %vm4941_vm0, %v4923_v43, 0.0  ;;  %v4476_v56 = vmax.f32 %v4362_v45, 0.0  ;;  %v4825_v60 = vpop.permute.xlu1 %4824 }
 0x411   :  { %v5034_v40 = vadd.f32 %v5033_v38, %v5032_v32  ;;  %v4366_v11 = vpop.f32.mrf.mxu0 }
 0x412   :  { %v4924_v57 = vmul.f32 %v4795_v21, %v4476_v56  ;;  %v4367_v33 = vadd.f32 %v4366_v11, %v7418_v0 }
 0x413   :  { %v4368_v27 = vpop.f32.mrf.mxu0 }
 0x414   :  { %v5035_v14 = vsel %vm4941_vm0, %v4924_v57, 0.0  ;;  %v4477_v8 = vmax.f32 %v4367_v33, 0.0  ;;  %v4830_v33 = vpop.permute.xlu0 %4829 }
 0x415   :  { %v5036_v26 = vadd.f32 %v5035_v14, %v5034_v40  ;;  %v4369_v41 = vpop.f32.mrf.mxu0 }
 0x416   :  { %v4925_v25 = vmul.f32 %v4800_v22, %v4477_v8  ;;  %v4370_v37 = vadd.f32 %v4369_v41, %v7423_v49 }
 0x417   :  { %v4371_v4 = vpop.f32.mrf.mxu0 }
 0x418   :  { %v5037_v2 = vsel %vm4941_vm0, %v4925_v25, 0.0  ;;  %v4478_v44 = vmax.f32 %v4370_v37, 0.0  ;;  %v4835_v25 = vpop.permute.xlu1 %4834 }
 0x419   :  { %v5038_v36 = vadd.f32 %v5037_v2, %v5036_v26  ;;  %v4374_v23 = vpop.f32.mrf.mxu0 }
 0x41a   :  { %v4926_v24 = vmul.f32 %v4805_v31, %v4478_v44  ;;  %v4375_v0 = vadd.f32 %v4374_v23, %v7428_v58  ;;  %v4840_v23 = vpop.permute.xlu0 %4839 }
 0x41b   :  { %v4376_v18 = vpop.f32.mrf.mxu0 }
 0x41c   :  { %v5039_v54 = vsel %vm4941_vm0, %v4926_v24, 0.0  ;;  %v4479_v42 = vmax.f32 %v4375_v0, 0.0 }
 0x41d   :  { %v5040_v29 = vadd.f32 %v5039_v54, %v5038_v36  ;;  %v4377_v9 = vpop.f32.mrf.mxu0 }
 0x41e   :  { %v4927_v61 = vmul.f32 %v4810_v35, %v4479_v42  ;;  %v4378_v49 = vadd.f32 %v4377_v9, %v7433_v7 }
 0x41f   :  { %v4379_v62 = vpop.f32.mrf.mxu0 }
 0x420   :  { %v5041_v20 = vsel %vm4941_vm0, %v4927_v61, 0.0  ;;  %v4480_v13 = vmax.f32 %v4378_v49, 0.0 }
 0x421   :  { %v5042_v5 = vadd.f32 %v5041_v20, %v5040_v29  ;;  %v4382_v59 = vpop.f32.mrf.mxu0  ;;  %v4845_v29 = vpop.permute.xlu1 %4844 }
 0x422   :  { %v4928_v51 = vmul.f32 %v4815_v55, %v4480_v13  ;;  %v4383_v58 = vadd.f32 %v4382_v59, %v7438_v34  ;;  %v4850_v55 = vpop.permute.xlu0 %4849 }
 0x423   :  { %v4384_v63 = vpop.f32.mrf.mxu0 }
 0x424   :  { %v5043_v47 = vsel %vm4941_vm0, %v4928_v51, 0.0  ;;  %v4481_v6 = vmax.f32 %v4383_v58, 0.0 }
 0x425   :  { %v5044_v16 = vadd.f32 %v5043_v47, %v5042_v5  ;;  %v4385_v32 = vpop.f32.mrf.mxu0 }
 0x426   :  { %v4929_v30 = vmul.f32 %v4820_v1, %v4481_v6  ;;  %v4386_v7 = vadd.f32 %v4385_v32, %v7443_v39  ;;  %v4855_v6 = vpop.permute.xlu1 %4854 }
 0x427   :  { %v4387_v43 = vpop.f32.mrf.mxu0 }
 0x428   :  { %v5045_v45 = vsel %vm4941_vm0, %v4929_v30, 0.0  ;;  %v4482_v53 = vmax.f32 %v4386_v7, 0.0 }
 0x429   :  { %v5046_v38 = vadd.f32 %v5045_v45, %v5044_v16  ;;  %v4390_v56 = vpop.f32.mrf.mxu0  ;;  %v4860_v45 = vpop.permute.xlu0 %4859 }
 0x42a   :  { %v4930_v21 = vmul.f32 %v4825_v60, %v4482_v53  ;;  %v4391_v34 = vadd.f32 %v4390_v56, %v7448_v15 }
 0x42b   :  { %v4392_v40 = vpop.f32.mrf.mxu0 }
 0x42c   :  { %v5047_v11 = vsel %vm4941_vm0, %v4930_v21, 0.0  ;;  %v4483_v57 = vmax.f32 %v4391_v34, 0.0  ;;  %v4865_v40 = vpop.permute.xlu1 %4864 }
 0x42d   :  { %v5048_v27 = vadd.f32 %v5047_v11, %v5046_v38  ;;  %v4393_v14 = vpop.f32.mrf.mxu0 }
 0x42e   :  { %v4931_v8 = vmul.f32 %v4830_v33, %v4483_v57  ;;  %v4394_v39 = vadd.f32 %v4393_v14, %v7453_v52  ;;  %v4137_v14 = vadd.f32 %v7492_v46, %v7253_v48 }
 0x42f   :  { %v4395_v22 = vpop.f32.mrf.mxu0 }
 0x430   :  { %v5049_v26 = vsel %vm4941_vm0, %v4931_v8, 0.0  ;;  %v4484_v41 = vmax.f32 %v4394_v39, 0.0  ;;  %v4870_v22 = vpop.permute.xlu0 %4869 }
 0x431   :  { %v5050_v37 = vadd.f32 %v5049_v26, %v5048_v27  ;;  %v4398_v4 = vpop.f32.mrf.mxu0 }
 0x432   :  { %v4932_v2 = vmul.f32 %v4835_v25, %v4484_v41  ;;  %v4399_v15 = vadd.f32 %v4398_v4, %v7458_v19 }
 0x433   :  { %v4400_v44 = vpop.f32.mrf.mxu0 }
 0x434   :  { %v5051_v31 = vsel %vm4941_vm0, %v4932_v2, 0.0  ;;  %v4485_v36 = vmax.f32 %v4399_v15, 0.0  ;;  %v4875_v15 = vpop.permute.xlu1 %4874 }
 0x435   :  { %v5052_v24 = vadd.f32 %v5051_v31, %v5050_v37  ;;  %v4401_v0 = vpop.f32.mrf.mxu0 }
 0x436   :  { %v4933_v18 = vmul.f32 %v4840_v23, %v4485_v36  ;;  %v4402_v52 = vadd.f32 %v4401_v0, %v7463_v28  ;;  %v5081_v36 = vlaneseq }
 0x437   :  { %v4403_v54 = vpop.f32.mrf.mxu0 }
 0x438   :  { %v5053_v42 = vsel %vm4941_vm0, %v4933_v18, 0.0  ;;  %v4486_v35 = vmax.f32 %v4402_v52, 0.0  ;;  %v5082_v46 = vshrl.u32 %v5081_v36, 7  ;;  %v5079_v54 = vpop.permute.xlu0 %5078 }
 0x439   :  { %v5054_v9 = vadd.f32 %v5053_v42, %v5052_v24  ;;  %v4406_v61 = vpop.f32.mrf.mxu0 }
 0x43a   :  { %v4934_v49 = vmul.f32 %v4845_v29, %v4486_v35  ;;  %v4407_v19 = vadd.f32 %v4406_v61, %v7468_v12  ;;  %v5083_v18 = vsub.s32 0, %v5082_v46 }
 0x43b   :  { %v4408_v62 = vpop.f32.mrf.mxu0 }
 0x43c   :  { %v5055_v20 = vsel %vm4941_vm0, %v4934_v49, 0.0  ;;  %v4487_v13 = vmax.f32 %v4407_v19, 0.0  ;;  %v5084_v35 = vrot.slane %v5079_v54, %v5083_v18 }
 0x43d   :  { %v5056_v5 = vadd.f32 %v5055_v20, %v5054_v9  ;;  %v4409_v59 = vpop.f32.mrf.mxu0 }
 0x43e   :  { %v4935_v51 = vmul.f32 %v4850_v55, %v4487_v13  ;;  %v4410_v28 = vadd.f32 %v4409_v59, %v7473_v3 }
 0x43f   :  { %v4411_v58 = vpop.f32.mrf.mxu0 }
 0x440   :  { %v5057_v63 = vsel %vm4941_vm0, %v4935_v51, 0.0  ;;  %v4488_v47 = vmax.f32 %v4410_v28, 0.0 }
 0x441   :  { %v5058_v1 = vadd.f32 %v5057_v63, %v5056_v5  ;;  %v4414_v16 = vpop.f32.mrf.mxu0 }
 0x442   :  { %v4936_v32 = vmul.f32 %v4855_v6, %v4488_v47  ;;  %v4415_v12 = vadd.f32 %v4414_v16, %v7478_v10 }
 0x443   :  { %v4416_v30 = vpop.f32.mrf.mxu0 }
 0x444   :  { %v5059_v7 = vsel %vm4941_vm0, %v4936_v32, 0.0  ;;  %v4489_v43 = vmax.f32 %v4415_v12, 0.0 }
 0x445   :  { %v5060_v53 = vadd.f32 %v5059_v7, %v5058_v1  ;;  %v4417_v60 = vpop.f32.mrf.mxu0 }
 0x446   :  { %v4937_v38 = vmul.f32 %v4860_v45, %v4489_v43  ;;  %v4418_v3 = vadd.f32 %v4417_v60, %v7483_v17 }
 0x447   :  { %v4419_v56 = vpop.f32.mrf.mxu0 }
 0x448   :  { %v5061_v21 = vsel %vm4941_vm0, %v4937_v38, 0.0  ;;  %v4490_v34 = vmax.f32 %v4418_v3, 0.0 }
 0x449   :  { %v5062_v11 = vadd.f32 %v5061_v21, %v5060_v53  ;;  %v4422_v57 = vpop.f32.mrf.mxu0 }
 0x44a   :  { %v4938_v33 = vmul.f32 %v4865_v40, %v4490_v34  ;;  %v4423_v10 = vadd.f32 %v4422_v57, %v7488_v50 }
 0x44b   :  { %v4424_v27 = vpop.f32.mrf.mxu0 }
 0x44c   :  { %v5063_v8 = vsel %vm4941_vm0, %v4938_v33, 0.0  ;;  %v4491_v39 = vmax.f32 %v4423_v10, 0.0 }
 0x44d   :  { %v5064_v26 = vadd.f32 %v5063_v8, %v5062_v11  ;;  %v4425_v17 = vpop.f32.mrf.mxu0 }
 0x44e   :  { %v4939_v41 = vmul.f32 %v4870_v22, %v4491_v39  ;;  %v4426_v25 = vadd.f32 %v4425_v17, %v4137_v14 }
 0x44f   :  { %v4427_v37 = vpop.f32.mrf.mxu0 }
 0x450   :  { %v5065_v4 = vsel %vm4941_vm0, %v4939_v41, 0.0  ;;  %v4492_v2 = vmax.f32 %v4426_v25, 0.0 }
 0x451   :  { %v5066_v44 = vadd.f32 %v5065_v4, %v5064_v26 }
 0x452   :  { %v4940_v31 = vmul.f32 %v4875_v15, %v4492_v2 }
 0x454   :  { %v5067_v50 = vsel %vm4941_vm0, %v4940_v31, 0.0 }
 0x455   :  { %v5068_v23 = vadd.f32 %v5067_v50, %v5066_v44 }
 0x457   :  { %v5069_v48 = vrot.slane %v5068_v23, 4 }
 0x459   :  { %v5070_v24 = vadd.f32 %v5069_v48, %v5068_v23 }
 0x45b   :  { %v5071_v0 = vrot.slane %v5070_v24, 2 }
 0x45d   :  { %v5072_v52 = vadd.f32 %v5071_v0, %v5070_v24 }
 0x45f   :  { %v5073_v42 = vrot.slane %v5072_v52, 1 }
 0x461   :  { %v5074_v29 = vadd.f32 %v5073_v42, %v5072_v52 }
 0x463   :  { %v5085_v9 = vadd.f32 %v5084_v35, %v5074_v29 }
 0x465   :  { %5732 = vtanh.f32 %v5085_v9 }
 0x472   :  { %v5733_v61 = vpop.eup %5732 }
 0x473   :  { %5088 = vst.msk [vmem:[%s7539_s6] sm:$0x1] %vm5087_vm1, %v5733_v61 }
 0x474   :  { %5093 = vsyncpa [#allocation4], 1 }

</bundles_post_ra>
